<compile_context>
chip_gen: v5e
topology: v5e:2x2
jax: 0.10.0
libtpu: 0.0.40
codegen_flags: <defaults>
</compile_context>

<pallas_src>
import functools
import math

import jax
import jax.numpy as jnp
from jax.experimental import pallas as pl
from jax.experimental.pallas import tpu as pltpu

# ----------------------------- configuration --------------------------------
NDIMS = 8
HIDDEN = 32
HIDDEN_LAYERS = 2
OUT_FEATURES = 3
FIRST_OMEGA = 30.0
HIDDEN_OMEGA = 30.0
IN_FEATURES = 2 * NDIMS + NDIMS * NDIMS + 2      # 82 (SO2)

FEAT_PAD = 8       # 4 per-direction features (D_x, D_z, |D_xz|, D_y) padded to 8
OUT_PAD = 8        # 3 output rows padded to 8 -> unmasked sublane store
TN_CAP = 8192      # direction-tile cap; VMEM per step stays in the low MiB
MXU_DTYPE = jnp.bfloat16   # hidden/final matmul operands; accum + sin/tanh stay f32


def _round_up(a, b):
    return (a + b - 1) // b * b


def _choose_tiling(B, nd):
    """Pick (TN, N_pad): TN a multiple of 128, N_pad = TN * n_tiles >= nd.
    Guarantees >= 2 grid steps when B == 1 and the direction axis allows it,
    so both TensorCores on v7x get work."""
    N128 = _round_up(max(nd, 1), 128)
    n_tiles = max(1, -(-N128 // TN_CAP))
    if B == 1 and N128 // 128 >= 2:
        n_tiles = max(n_tiles, 2)
    TN = _round_up(-(-N128 // n_tiles), 128)
    return TN, TN * n_tiles


# ------------------------------ Pallas kernel --------------------------------
def siren_kernel(xt_ref, w0_ref, b0_ref, wht_ref, bht_ref, wft_ref, bft_ref,
                 o_ref, *, hidden_layers):
    """Feature-major SIREN MLP: lane axis = direction tile (multiple of 128)."""
    # First SineLayer.  f32 operands (K=8 -> MXU cost negligible, argument
    # exact).  omega, the per-batch constant SO2 terms and the Z_xz fold are
    # all pre-applied to w0_ref / b0_ref in the wrapper.
    h = jnp.sin(
        jnp.dot(w0_ref[...], xt_ref[...], preferred_element_type=jnp.float32)
        + b0_ref[...])                                     # (HIDDEN, TN) f32
    # Hidden SineLayers (static unroll): bf16 MXU operands, f32 accumulate,
    # f32 sin (v5e-safe; no bf16 VALU/EUP there).
    for l in range(hidden_layers):
        h = jnp.sin(
            jnp.dot(wht_ref[l], h.astype(MXU_DTYPE),
                    preferred_element_type=jnp.float32)
            + bht_ref[l])
    # Final linear (rows padded to OUT_PAD -> unmasked store) + tanh, f32 out.
    o_ref[...] = jnp.tanh(
        jnp.dot(wft_ref[...], h.astype(MXU_DTYPE),
                preferred_element_type=jnp.float32)
        + bft_ref[...])


# ----------------------- one-time parameter preparation ----------------------
def prepare_params(params):
    """Fold omegas, split w0 by feature role (per-direction vs per-batch
    constant), transpose to feature-major, cast hidden/final MXU operands to
    bf16, zero-pad the final layer to OUT_PAD rows.  One-time transform."""
    w0, b0, wh, bh, wf, bf = params
    w0_s = w0 * FIRST_OMEGA
    # SO2 feature column layout of w0 rows:
    #   [0:8) innerprod, [8:72) G.flatten, 72 |D_xz|, [73:81) Z_y, 81 D_y
    w0_ip = w0_s[:NDIMS, :]                                      # (8, H)
    w0_const_G = w0_s[NDIMS:NDIMS + NDIMS * NDIMS, :]            # (64, H)
    w0_norm = w0_s[NDIMS + NDIMS * NDIMS, :]                     # (H,)
    w0_const_Zy = w0_s[NDIMS + NDIMS * NDIMS + 1:IN_FEATURES - 1, :]   # (8, H)
    w0_dy = w0_s[IN_FEATURES - 1, :]                             # (H,)
    b0_s = b0[0] * FIRST_OMEGA                                   # (H,)
    wht = jnp.transpose(wh * HIDDEN_OMEGA, (0, 2, 1)).astype(MXU_DTYPE)
    bht = jnp.transpose(bh * HIDDEN_OMEGA, (0, 2, 1))            # (L, H, 1) f32
    wft = jnp.zeros((OUT_PAD, HIDDEN), jnp.float32)
    wft = wft.at[:OUT_FEATURES].set(wf.T).astype(MXU_DTYPE)      # (8, H)
    bft = jnp.zeros((OUT_PAD, 1), jnp.float32)
    bft = bft.at[:OUT_FEATURES, 0].set(bf[0])                    # (8, 1)
    return dict(w0_ip=w0_ip, w0_const_G=w0_const_G, w0_norm=w0_norm,
                w0_const_Zy=w0_const_Zy, w0_dy=w0_dy, b0=b0_s,
                wht=wht, bht=bht, wft=wft, bft=bft)


# ------------------------------ forward wrapper -------------------------------
def reni_forward(Z, D, prep):
    """Z: (B, NDIMS, 3), D: (B, nd, 3) -> (B, nd, OUT_FEATURES) f32."""
    B, nd, _ = D.shape
    TN, N_pad = _choose_tiling(B, nd)

    # ---- per-batch folds of the SO2 representation (tiny, exact f32) ----
    Z_xz = jnp.stack((Z[:, :, 0], Z[:, :, 2]), -1)               # (B, n, 2)
    G = jnp.einsum("bnk,bmk->bnm", Z_xz, Z_xz)                   # (B, n, n)
    b0_batch = (G.reshape(B, NDIMS * NDIMS) @ prep["w0_const_G"]
                + Z[:, :, 1] @ prep["w0_const_Zy"]
                + prep["b0"])[:, :, None]                        # (B, H, 1)
    # Effective first-layer weight over features [D_x, D_z, |D_xz|, D_y, 0..]:
    # innerprod = D_xz @ Z_xz^T is folded into the D_x / D_z columns.
    W_dxz = jnp.einsum("bnk,nh->bhk", Z_xz, prep["w0_ip"])       # (B, H, 2)
    w0_eff = jnp.concatenate(
        (W_dxz,
         jnp.broadcast_to(prep["w0_norm"][None, :, None], (B, HIDDEN, 1)),
         jnp.broadcast_to(prep["w0_dy"][None, :, None], (B, HIDDEN, 1)),
         jnp.zeros((B, HIDDEN, FEAT_PAD - 4), jnp.float32)),
        axis=2)                                                  # (B, H, 8) f32

    # ---- per-direction features, feature-major (lane axis = directions) ----
    D_xz_norm = jnp.sqrt(D[:, :, 0] ** 2 + D[:, :, 2] ** 2)
    xt = jnp.stack((D[:, :, 0], D[:, :, 2], D_xz_norm, D[:, :, 1]), axis=1)
    xt = jnp.pad(xt, ((0, 0), (0, FEAT_PAD - 4), (0, N_pad - nd)))   # (B,8,Np) f32

    kernel = functools.partial(siren_kernel, hidden_layers=HIDDEN_LAYERS)

    flops = 2 * B * N_pad * (FEAT_PAD * HIDDEN
                             + HIDDEN_LAYERS * HIDDEN * HIDDEN
                             + HIDDEN * OUT_PAD)
    transcendentals = B * N_pad * (HIDDEN * (1 + HIDDEN_LAYERS) + OUT_PAD)
    bytes_accessed = (xt.size * 4 + B * OUT_PAD * N_pad * 4
                      + w0_eff.size * 4 + b0_batch.size * 4
                      + prep["wht"].size * 2 + prep["bht"].size * 4
                      + prep["wft"].size * 2 + prep["bft"].size * 4)

    out_t = pl.pallas_call(
        kernel,
        out_shape=jax.ShapeDtypeStruct((B, OUT_PAD, N_pad), jnp.float32),
        grid_spec=pltpu.PrefetchScalarGridSpec(
            num_scalar_prefetch=0,
            grid=(B, N_pad // TN),
            in_specs=[
                # per-direction features: tiled over (batch, direction-tile)
                pl.BlockSpec((pl.Squeezed(), FEAT_PAD, TN),
                             lambda b, i: (b, 0, i)),
                # per-batch first-layer weight / bias (constant over dir tiles)
                pl.BlockSpec((pl.Squeezed(), HIDDEN, FEAT_PAD),
                             lambda b, i: (b, 0, 0)),
                pl.BlockSpec((pl.Squeezed(), HIDDEN, 1),
                             lambda b, i: (b, 0, 0)),
                # shared weights/biases: constant index_maps -> DMA'd once,
                # stay resident in VMEM for the whole call
                pl.BlockSpec((HIDDEN_LAYERS, HIDDEN, HIDDEN),
                             lambda b, i: (0, 0, 0)),
                pl.BlockSpec((HIDDEN_LAYERS, HIDDEN, 1),
                             lambda b, i: (0, 0, 0)),
                pl.BlockSpec((OUT_PAD, HIDDEN), lambda b, i: (0, 0)),
                pl.BlockSpec((OUT_PAD, 1), lambda b, i: (0, 0)),
            ],
            out_specs=pl.BlockSpec((pl.Squeezed(), OUT_PAD, TN),
                                   lambda b, i: (b, 0, i)),
        ),
        compiler_params=pltpu.CompilerParams(
            dimension_semantics=("parallel", "parallel")),
        cost_estimate=pl.CostEstimate(flops=flops,
                                      transcendentals=transcendentals,
                                      bytes_accessed=bytes_accessed),
    )(xt, w0_eff, b0_batch, prep["wht"], prep["bht"],
      prep["wft"], prep["bft"])

    # (B, 8, N_pad) -> (B, nd, 3): drop row/direction padding, back to row-major.
    return jnp.transpose(out_t[:, :OUT_FEATURES, :nd], (0, 2, 1))


# ----------------------- deterministic parameter init ------------------------
def init_params(key):
    keys = jax.random.split(key, 6)
    # First SineLayer: weight ~ U(-1/in, 1/in); bias keeps torch Linear default
    lim0 = 1.0 / IN_FEATURES
    blim0 = 1.0 / math.sqrt(IN_FEATURES)
    w0 = jax.random.uniform(keys[0], (IN_FEATURES, HIDDEN), jnp.float32,
                            -lim0, lim0)
    b0 = jax.random.uniform(keys[1], (1, HIDDEN), jnp.float32, -blim0, blim0)
    # Hidden SineLayers + final linear: U(-sqrt(6/hidden)/omega, +)
    limh = math.sqrt(6.0 / HIDDEN) / HIDDEN_OMEGA
    blimh = 1.0 / math.sqrt(HIDDEN)
    wh = jax.random.uniform(keys[2], (HIDDEN_LAYERS, HIDDEN, HIDDEN),
                            jnp.float32, -limh, limh)
    bh = jax.random.uniform(keys[3], (HIDDEN_LAYERS, 1, HIDDEN),
                            jnp.float32, -blimh, blimh)
    wf = jax.random.uniform(keys[4], (HIDDEN, OUT_FEATURES), jnp.float32,
                            -limh, limh)
    bf = jax.random.uniform(keys[5], (1, OUT_FEATURES), jnp.float32,
                            -blimh, blimh)
    return w0, b0, wh, bh, wf, bf


# ------------------------------ pure-JAX reference ---------------------------
def so2_invariant_representation(Z, D):
    B, nd, _ = D.shape
    Z_xz = jnp.stack((Z[:, :, 0], Z[:, :, 2]), -1)
    D_xz = jnp.stack((D[:, :, 0], D[:, :, 2]), -1)
    G = jnp.einsum("bnk,bmk->bnm", Z_xz, Z_xz)
    Z_xz_invar = jnp.broadcast_to(
        G.reshape(B, 1, NDIMS * NDIMS), (B, nd, NDIMS * NDIMS))
    innerprod = jnp.einsum("bdk,bnk->bdn", D_xz, Z_xz)
    D_xz_norm = jnp.sqrt(D[:, :, 0] ** 2 + D[:, :, 2] ** 2)[:, :, None]
    Z_y = jnp.broadcast_to(Z[:, :, 1][:, None, :], (B, nd, NDIMS))
    D_y = D[:, :, 1][:, :, None]
    return jnp.concatenate((innerprod, Z_xz_invar, D_xz_norm, Z_y, D_y), 2)


def reference_forward(Z, D, params):
    w0, b0, wh, bh, wf, bf = params
    x = so2_invariant_representation(Z, D)
    h = jnp.sin(FIRST_OMEGA * (x @ w0 + b0[0]))
    for l in range(HIDDEN_LAYERS):
        h = jnp.sin(HIDDEN_OMEGA * (h @ wh[l] + bh[l, 0]))
    return jnp.tanh(h @ wf + bf[0])


if __name__ == "__main__":
    key = jax.random.PRNGKey(0)
    kz, kd, kp = jax.random.split(key, 3)

    B, NUM_DIRS = 2, 200   # non-multiple of 128 to exercise the padding path
    Z = jax.random.normal(kz, (B, NDIMS, 3), jnp.float32)
    D = jax.random.normal(kd, (B, NUM_DIRS, 3), jnp.float32)
    D = D / jnp.linalg.norm(D, axis=-1, keepdims=True)

    params = init_params(kp)
    prep = prepare_params(params)

    out = reni_forward(Z, D, prep)
    out = jax.block_until_ready(out)

    ref = reference_forward(Z, D, params)
    assert out.shape == (B, NUM_DIRS, OUT_FEATURES)
    assert out.dtype == jnp.float32
    # f32 first layer + bf16 hidden/final MXU operands (f32 accumulation):
    # observed error is ~1e-3; 2e-2 gives comfortable margin.
    assert jnp.allclose(out, ref, atol=2e-2, rtol=2e-2), "mismatch vs reference"

    print("KERNEL_OK")
</pallas_src>

<mosaic_0001>
module attributes {stable_mosaic.version = 11 : i64} {
  func.func @siren_kernel(%arg0: i32, %arg1: i32, %arg2: memref<1x8x256xf32, #tpu.memory_space<vmem>>, %arg3: memref<1x32x8xf32, #tpu.memory_space<vmem>>, %arg4: memref<1x32x1xf32, #tpu.memory_space<vmem>>, %arg5: memref<2x32x32xbf16, #tpu.memory_space<vmem>>, %arg6: memref<2x32x1xf32, #tpu.memory_space<vmem>>, %arg7: memref<8x32xbf16, #tpu.memory_space<vmem>>, %arg8: memref<8x1xf32, #tpu.memory_space<vmem>>, %arg9: memref<1x8x256xf32, #tpu.memory_space<vmem>>) attributes {dimension_semantics = [#tpu.dimension_semantics<parallel>, #tpu.dimension_semantics<parallel>], iteration_bounds = array<i64: 2, 1>, scalar_prefetch = 0 : i64, scratch_operands = 0 : i64, tpu.core_type = #tpu.core_type<tc>, window_params = [{transform_indices = @transform_0, window_bounds = array<i64: 1, 8, 256>}, {transform_indices = @transform_1, window_bounds = array<i64: 1, 32, 8>}, {transform_indices = @transform_2, window_bounds = array<i64: 1, 32, 1>}, {pipeline_mode = #tpu.pipeline_mode<synchronous>, transform_indices = @transform_3, window_bounds = array<i64: 2, 32, 32>}, {pipeline_mode = #tpu.pipeline_mode<synchronous>, transform_indices = @transform_4, window_bounds = array<i64: 2, 32, 1>}, {pipeline_mode = #tpu.pipeline_mode<synchronous>, transform_indices = @transform_5, window_bounds = array<i64: 8, 32>}, {pipeline_mode = #tpu.pipeline_mode<synchronous>, transform_indices = @transform_6, window_bounds = array<i64: 8, 1>}, {transform_indices = @transform_7, window_bounds = array<i64: 1, 8, 256>}]} {
    %c0 = arith.constant 0 : index
    %c0_0 = arith.constant 0 : index
    %c0_1 = arith.constant 0 : index
    %0 = vector.load %arg3[%c0, %c0_0, %c0_1] : memref<1x32x8xf32, #tpu.memory_space<vmem>>, vector<1x32x8xf32>
    %1 = vector.shape_cast %0 : vector<1x32x8xf32> to vector<32x8xf32>
    %c0_2 = arith.constant 0 : index
    %c0_3 = arith.constant 0 : index
    %c0_4 = arith.constant 0 : index
    %2 = vector.load %arg2[%c0_2, %c0_3, %c0_4] : memref<1x8x256xf32, #tpu.memory_space<vmem>>, vector<1x8x256xf32>
    %3 = vector.shape_cast %2 : vector<1x8x256xf32> to vector<8x256xf32>
    %cst = arith.constant dense<0.000000e+00> : vector<32x256xf32>
    %4 = tpu.matmul %1, %3, %cst {dimension_numbers = #tpu.dot_dimension_numbers<[1], [0], [0], [1], [0, 0, 1, 1], [], []>} : vector<32x8xf32>, vector<8x256xf32>, vector<32x256xf32> -> vector<32x256xf32>
    %c0_5 = arith.constant 0 : index
    %c0_6 = arith.constant 0 : index
    %c0_7 = arith.constant 0 : index
    %5 = vector.load %arg4[%c0_5, %c0_6, %c0_7] : memref<1x32x1xf32, #tpu.memory_space<vmem>>, vector<1x32x1xf32>
    %6 = vector.shape_cast %5 : vector<1x32x1xf32> to vector<32x1xf32>
    %7 = vector.broadcast %6 : vector<32x1xf32> to vector<32x256xf32>
    %8 = arith.addf %4, %7 : vector<32x256xf32>
    %9 = math.sin %8 : vector<32x256xf32>
    %c0_8 = arith.constant 0 : index
    %c0_9 = arith.constant 0 : index
    %c0_10 = arith.constant 0 : index
    %10 = vector.load %arg5[%c0_8, %c0_9, %c0_10] : memref<2x32x32xbf16, #tpu.memory_space<vmem>>, vector<1x32x32xbf16>
    %11 = vector.shape_cast %10 : vector<1x32x32xbf16> to vector<32x32xbf16>
    %12 = arith.truncf %9 : vector<32x256xf32> to vector<32x256xbf16>
    %cst_11 = arith.constant dense<0.000000e+00> : vector<32x256xf32>
    %13 = tpu.matmul %11, %12, %cst_11 {dimension_numbers = #tpu.dot_dimension_numbers<[1], [0], [0], [1], [0, 0, 1, 1], [], []>} : vector<32x32xbf16>, vector<32x256xbf16>, vector<32x256xf32> -> vector<32x256xf32>
    %c0_12 = arith.constant 0 : index
    %c0_13 = arith.constant 0 : index
    %c0_14 = arith.constant 0 : index
    %14 = vector.load %arg6[%c0_12, %c0_13, %c0_14] : memref<2x32x1xf32, #tpu.memory_space<vmem>>, vector<1x32x1xf32>
    %15 = vector.shape_cast %14 : vector<1x32x1xf32> to vector<32x1xf32>
    %16 = vector.broadcast %15 : vector<32x1xf32> to vector<32x256xf32>
    %17 = arith.addf %13, %16 : vector<32x256xf32>
    %18 = math.sin %17 : vector<32x256xf32>
    %c1 = arith.constant 1 : index
    %c0_15 = arith.constant 0 : index
    %c0_16 = arith.constant 0 : index
    %19 = vector.load %arg5[%c1, %c0_15, %c0_16] : memref<2x32x32xbf16, #tpu.memory_space<vmem>>, vector<1x32x32xbf16>
    %20 = vector.shape_cast %19 : vector<1x32x32xbf16> to vector<32x32xbf16>
    %21 = arith.truncf %18 : vector<32x256xf32> to vector<32x256xbf16>
    %cst_17 = arith.constant dense<0.000000e+00> : vector<32x256xf32>
    %22 = tpu.matmul %20, %21, %cst_17 {dimension_numbers = #tpu.dot_dimension_numbers<[1], [0], [0], [1], [0, 0, 1, 1], [], []>} : vector<32x32xbf16>, vector<32x256xbf16>, vector<32x256xf32> -> vector<32x256xf32>
    %c1_18 = arith.constant 1 : index
    %c0_19 = arith.constant 0 : index
    %c0_20 = arith.constant 0 : index
    %23 = vector.load %arg6[%c1_18, %c0_19, %c0_20] : memref<2x32x1xf32, #tpu.memory_space<vmem>>, vector<1x32x1xf32>
    %24 = vector.shape_cast %23 : vector<1x32x1xf32> to vector<32x1xf32>
    %25 = vector.broadcast %24 : vector<32x1xf32> to vector<32x256xf32>
    %26 = arith.addf %22, %25 : vector<32x256xf32>
    %27 = math.sin %26 : vector<32x256xf32>
    %c0_21 = arith.constant 0 : index
    %c0_22 = arith.constant 0 : index
    %28 = vector.load %arg7[%c0_21, %c0_22] : memref<8x32xbf16, #tpu.memory_space<vmem>>, vector<8x32xbf16>
    %29 = arith.truncf %27 : vector<32x256xf32> to vector<32x256xbf16>
    %cst_23 = arith.constant dense<0.000000e+00> : vector<8x256xf32>
    %30 = tpu.matmul %28, %29, %cst_23 {dimension_numbers = #tpu.dot_dimension_numbers<[1], [0], [0], [1], [0, 0, 1, 1], [], []>} : vector<8x32xbf16>, vector<32x256xbf16>, vector<8x256xf32> -> vector<8x256xf32>
    %c0_24 = arith.constant 0 : index
    %c0_25 = arith.constant 0 : index
    %31 = vector.load %arg8[%c0_24, %c0_25] : memref<8x1xf32, #tpu.memory_space<vmem>>, vector<8x1xf32>
    %32 = vector.broadcast %31 : vector<8x1xf32> to vector<8x256xf32>
    %33 = arith.addf %30, %32 : vector<8x256xf32>
    %34 = math.tanh %33 : vector<8x256xf32>
    %c0_26 = arith.constant 0 : index
    %c0_27 = arith.constant 0 : index
    %c0_28 = arith.constant 0 : index
    %35 = vector.load %arg9[%c0_26, %c0_27, %c0_28] : memref<1x8x256xf32, #tpu.memory_space<vmem>>, vector<1x8x256xf32>
    %36 = vector.shape_cast %35 : vector<1x8x256xf32> to vector<8x256xf32>
    %37 = vector.shape_cast %34 : vector<8x256xf32> to vector<1x8x256xf32>
    tpu.vector_store %arg9[%c0_26, %c0_27, %c0_28], %37 {strides = array<i32>} : memref<1x8x256xf32, #tpu.memory_space<vmem>>, vector<1x8x256xf32>,
    return
  }
  func.func @transform_0(%arg0: i32, %arg1: i32) -> (i32, i32, i32) {
    %c0_i32 = arith.constant 0 : i32
    %c0_i32_0 = arith.constant 0 : i32
    return %arg0, %c0_i32, %arg1 : i32, i32, i32
  }
  func.func @transform_1(%arg0: i32, %arg1: i32) -> (i32, i32, i32) {
    %c0_i32 = arith.constant 0 : i32
    %c0_i32_0 = arith.constant 0 : i32
    %c0_i32_1 = arith.constant 0 : i32
    return %arg0, %c0_i32, %c0_i32_0 : i32, i32, i32
  }
  func.func @transform_2(%arg0: i32, %arg1: i32) -> (i32, i32, i32) {
    %c0_i32 = arith.constant 0 : i32
    %c0_i32_0 = arith.constant 0 : i32
    %c0_i32_1 = arith.constant 0 : i32
    return %arg0, %c0_i32, %c0_i32_0 : i32, i32, i32
  }
  func.func @transform_3(%arg0: i32, %arg1: i32) -> (i32, i32, i32) {
    %c0_i32 = arith.constant 0 : i32
    %c0_i32_0 = arith.constant 0 : i32
    %c0_i32_1 = arith.constant 0 : i32
    %c0_i32_2 = arith.constant 0 : i32
    return %c0_i32, %c0_i32_0, %c0_i32_1 : i32, i32, i32
  }
  func.func @transform_4(%arg0: i32, %arg1: i32) -> (i32, i32, i32) {
    %c0_i32 = arith.constant 0 : i32
    %c0_i32_0 = arith.constant 0 : i32
    %c0_i32_1 = arith.constant 0 : i32
    %c0_i32_2 = arith.constant 0 : i32
    return %c0_i32, %c0_i32_0, %c0_i32_1 : i32, i32, i32
  }
  func.func @transform_5(%arg0: i32, %arg1: i32) -> (i32, i32) {
    %c0_i32 = arith.constant 0 : i32
    %c0_i32_0 = arith.constant 0 : i32
    %c0_i32_1 = arith.constant 0 : i32
    return %c0_i32, %c0_i32_0 : i32, i32
  }
  func.func @transform_6(%arg0: i32, %arg1: i32) -> (i32, i32) {
    %c0_i32 = arith.constant 0 : i32
    %c0_i32_0 = arith.constant 0 : i32
    %c0_i32_1 = arith.constant 0 : i32
    return %c0_i32, %c0_i32_0 : i32, i32
  }
  func.func @transform_7(%arg0: i32, %arg1: i32) -> (i32, i32, i32) {
    %c0_i32 = arith.constant 0 : i32
    %c0_i32_0 = arith.constant 0 : i32
    return %arg0, %c0_i32, %arg1 : i32, i32, i32
  }
}

</mosaic_0001>

<bundles_post_ra>
// kernel: tpu_custom_call.1
= control target key start
LH: loop header
LB: loop body
LE: loop exit
PB: predicated region body
PF: predicated region fallthrough
CT: control target
= control target key end

     0   :  { %12 = vsyncpa [#allocation3], 0  ;;  %s8764_s0 = inlined_call_operand.vmem [shape: f32[2,8,256], index: 0, kind: input, shape index: {}]   ;;  %s8765_s1 = inlined_call_operand.vmem [shape: f32[2,32,8], index: 1, kind: input, shape index: {}]   ;;  %s8766_s2 = inlined_call_operand.vmem [shape: f32[2,32,1], index: 2, kind: input, shape index: {}]   ;;  %s8767_s3 = inlined_call_operand.vmem [shape: bf16[2,32,32], index: 3, kind: input, shape index: {}]   ;;  %s8768_s4 = inlined_call_operand.vmem [shape: f32[2,32,1], index: 4, kind: input, shape index: {}]   ;;  %s8769_s5 = inlined_call_operand.vmem [shape: bf16[8,32], index: 5, kind: input, shape index: {}]   ;;  %s8770_s6 = inlined_call_operand.vmem [shape: f32[8,1], index: 6, kind: input, shape index: {}]   ;;  %s8771_s7 = inlined_call_operand.hbm [shape: f32[2,8,256], index: 7, kind: output, shape index: {}]  }
   0x1   :  { %14 = vsyncpa [#allocation3 + $0x1], 0  ;;  %s4843_s24 = smov 0   ;;  %s4845_s25 = smov 0  }
   0x2   :  { %s4847_s26 = smov 0   ;;  %s4849_s27 = smov 0  }
   0x3   :  { %s4851_s28 = smov 0   ;;  %s4853_s29 = smov 0  }
   0x4 LB: > { %s4508_s30 = sadd.s32 4294967295, %s4794_s29   ;;  %s4509_s8 = sadd.s32 4294967294, %s4794_s29   ;;  %s4794_s29 = sphi %s4853_s29, %s20_s29   ;;  %s4790_s28 = sphi %s4851_s28, %s9476_s28   ;;  %s4786_s27 = sphi %s4849_s27, %s9475_s27   ;;  %s4782_s26 = sphi %s4847_s26, %s9474_s26   ;;  %s4778_s25 = sphi %s4845_s25, %s9473_s25   ;;  %s4774_s24 = sphi %s4843_s24, %s9472_s24  }
   0x5   : > { %s32_s9 = sadd.s32 1, %s4790_s28  ;;  %s205_s10 = sadd.s32 1, %s4782_s26 }
   0x6   : > { %p34_p0 = scmp.ge.s32.totalorder %s32_s9, 2  ;;  %p215_p1 = scmp.ne.s32.totalorder %s4782_s26, %s4778_s25 }
   0x7   : > { %p216_p2 = scmp.eq.s32.totalorder %s4508_s30, 1  ;;  %p221_p3 = scmp.ne.s32.totalorder %s4778_s25, %s4774_s24 }
   0x8   : > { %s9478_s9 = smov (%p34_p0, %s32_s9), 0  ;;  %p222_p5 = scmp.eq.s32.totalorder %s4509_s8, 1 }
   0x9   : > { %p4883_p4 = por %p216_p2, %p215_p1  ;;  %s200_s12 = ssub.s32 %s4790_s28, %s9478_s9 }
   0xa   : > { %p4512_p6 = scmp.ge.s32.totalorder %s4794_s29, 1  ;;  %p203_p7 = scmp.eq.s32.totalorder %s200_s12, 0 }
   0xb   : > { %p4890_p8 = por %p222_p5, %p221_p3  ;;  %p281_p9 = scmp.lt.s32.totalorder %s4794_s29, 3 }
   0xc   : > { %s4896_s14 = scalar_select %p203_p7, %s4782_s26, %s205_s10  }
   0xd   : > { %p282_p10 = pnand %p4512_p6, %p281_p9 }
   0xf   : > { %285 = sbr.rel (%p282_p10) target bundleno = 1541 (0x605), region = 48 }
  0x14   : > { %p328_p11 = scmp.lt.s32.totalorder %s4786_s27, 1  ;;  %v8780_v0 = vmov 0   ;;  %vm379_vm0 = vcmask 64512   ;;  %v1698_v9 = vld [vmem:[%s8768_s4] sm:$0xff]  ;;  %v1699_v11 = vld [vmem:[%s8768_s4 + $0x8] sm:$0xff]  ;;  %v4595_v12 = vld [vmem:[%s8768_s4 + $0x38] sm:$0xff] }
  0x15   : > { %4709 = vset.pattern.permute.xlu0 %v8780_v0  ;;  %4710 = vset.pattern.permute.xlu1 %v8780_v0  ;;  %v4592_v14 = vld [vmem:[%s8768_s4 + $0x20] sm:$0xff]  ;;  %v8794_v34 = vmov 1326507024   ;;  %v8785_v40 = vmov 920167782   ;;  %s4646_s19 = sshll.u32 %s4786_s27, 4 }
  0x16   : > { %s329_s15 = scalar_select %p328_p11, %s4786_s27, 1  ;;  %4711 = vset.pattern.permute.xlu2 %v8780_v0  ;;  %v4350_v15 = vld [vmem:[%s8770_s6] sm:$0xff]  ;;  %v8805_v43 = vmov 2131351028   ;;  %v8783_v45 = vmov 2102212464  }
  0x17   : > { %v8801_v52 = vmov 2475754826   ;;  %s4403_s22 = scalar_lea.hbm %s8771_s7, %s4646_s19 }
  0x18   : > { %s4640_s16 = sshll.u32 %s329_s15, 5  ;;  %s4639_s17 = sshll.u32 %s329_s15, 4 }
  0x19   : > { %s346_s20 = scalar_lea.vmem %s8766_s2, %s4640_s16  ;;  %s335_s23 = scalar_lea.vmem %s8764_s0, %s4639_s17 }
  0x1a   : > { %v357_v1 = vld [vmem:[%s346_s20 + $0x10] sm:$0xff]  ;;  %v353_v2 = vld [vmem:[%s335_s23] sm:$0xff]  ;;  %v354_v3 = vld [vmem:[%s335_s23 + $0x8] sm:$0xff]  ;;  %s341_s10 = scalar_lea.vmem %s8765_s1, %s4640_s16  ;;  %s324_s16 = sand.u32 1, %s4778_s25  }
  0x1b   : > { %371 = vperm.xlu0 %4709, %v357_v1   ;;  %407 = vmatpush.msra.mxu0 %v353_v2  ;;  %v349_v4 = vld [vmem:[%s341_s10] sm:$0xff]  ;;  %v358_v6 = vld [vmem:[%s346_s20 + $0x18] sm:$0xff]  ;;  %v350_v7 = vld [vmem:[%s341_s10 + $0x8] sm:$0xff]  ;;  %v8796_v1 = vmov 683565275   ;;  %s4513_s17 = sshll.u32 %s324_s16, 4 }
  0x1c   : > { %v355_v5 = vld [vmem:[%s346_s20] sm:$0xff]  ;;  %436 = vmatpush.msra.mxu1 %v354_v3  ;;  %4520 = vmatmul.msk.f32.vlgmr.msra.gmra.mxu0 %vm379_vm0, %v349_v4  ;;  %v356_v8 = vld [vmem:[%s346_s20 + $0x8] sm:$0xff]  ;;  %v351_v10 = vld [vmem:[%s341_s10 + $0x10] sm:$0xff]  ;;  %s326_s18 = scalar_lea.vmem [#allocation2], %s4513_s17  ;;  %s4407_s30 = sshll.u32 %s4403_s22, 4  ;;  %s4408_s30 = int_to_ptr.hbm [resolvable:$true] %s4407_s30 }
  0x1d   : > { %4524 = vmatmul.msk.f32.vlgmr.msra.gmra.mxu1 %vm379_vm0, %v349_v4  ;;  %361 = vperm.xlu1 %4710, %v355_v5   ;;  %v352_v13 = vld [vmem:[%s341_s10 + $0x18] sm:$0xff]  ;;  %s4405_s23 = sshll.u32 %s326_s18, 4  ;;  %s4390_s8 = scalar_lea.sflag [#allocation3], %s324_s16  ;;  %s4406_s23 = int_to_ptr.vmem [resolvable:$true] %s4405_s23 }
  0x1e   : > { %s4730_s10 = sshra.s32 %s4408_s30, 4  ;;  %s4736_s17 = scalar_lea.hbm %s8771_s7, 32  ;;  %s4731_s10 = int_to_ptr.hbm [resolvable:$true] %s4730_s10 }
  0x1f   : > { %s4732_s12 = scalar_lea.hbm %s4731_s10, 16  ;;  %p4737_p1 = scmp.lt.s32.totalorder %s4731_s10, %s8771_s7 }
  0x20   : > { %p4733_p12 = scmp.ne.s32.totalorder %s4731_s10, %s4732_s12  ;;  %p4738_p2 = scmp.lt.s32.totalorder %s4736_s17, %s4732_s12 }
  0x22   : > { %p4734_p13 = pnand %p4733_p12, %p4883_p4  ;;  %p4739_p3 = por %p4738_p2, %p4737_p1 }
  0x23   : > { %376 = vperm.xlu0 %4709, %v358_v6  }
  0x24   : > { %4521 = vmatmul.msk.f32.gmra.mxu0 %vm379_vm0, %v350_v7  ;;  %p4735_p0 = pneg %p4734_p13 }
  0x25   : > { %4525 = vmatmul.msk.f32.gmra.mxu1 %vm379_vm0, %v350_v7  ;;  %366 = vperm.xlu1 %4710, %v356_v8  }
  0x26   : > { %p4740_p5 = pnand %p4739_p3, %p4735_p0 }
  0x2b   : > { %1704 = vperm.xlu0 %4709, %v1698_v9  }
  0x2c   : > { %4522 = vmatmul.msk.f32.gmra.mxu0 %vm379_vm0, %v351_v10 }
  0x2d   : > { %4526 = vmatmul.msk.f32.gmra.mxu1 %vm379_vm0, %v351_v10  ;;  %1709 = vperm.xlu1 %4710, %v1699_v11  }
  0x33   : > { %3048 = vperm.xlu0 %4709, %v4595_v12  }
  0x34   : > { %4523 = vmatmul.msk.f32.gmra.mxu0 %vm379_vm0, %v352_v13 }
  0x35   : > { %4527 = vmatmul.msk.f32.gmra.mxu1 %vm379_vm0, %v352_v13  ;;  %3033 = vperm.xlu1 %4710, %v4592_v14  }
  0x3b   : > { %4353 = vperm.xlu0 %4709, %v4350_v15  }
  0x8f   : > { %v362_v16 = vpop.permute.xlu1 %361 }
  0x97   : > { %v367_v38 = vpop.permute.xlu1 %366 }
  0x99   : > { %v409_v17 = vpop.f32.mrf.mxu0 }
  0x9a   : > { %v4935_v18 = vadd.f32 %v409_v17, %v362_v16  ;;  %v438_v19 = vpop.f32.mrf.mxu1 }
  0x9b   : > { %v4937_v20 = vadd.f32 %v438_v19, %v362_v16 }
  0x9c   : > { %8989 = vst [vmem:[#allocation5_spill] sm:$0xff] %v4935_v18  ;;  %v453_v21 = vand.u32 2139095040, %v4935_v18  ;;  %v8775_v32 = vand.u32 2147483647, %v4935_v18 }
  0x9d   : > { %8990 = vst [vmem:[#allocation6_spill] sm:$0xff] %v4937_v20  ;;  %v608_v23 = vand.u32 2139095040, %v4937_v20  ;;  %v8772_v36 = vand.u32 2147483647, %v4937_v20  ;;  %v9025_v20 = vmov 920167782  }
  0x9e   : > { %v454_v22 = vshrl.u32 %v453_v21, 23  ;;  %v457_v37 = vand.u32 8388607, %v8775_v32 }
  0x9f   : > { %v609_v26 = vshrl.u32 %v608_v23, 23  ;;  %v612_v50 = vand.u32 8388607, %v8772_v36 }
  0xa0   : > { %v4528_v24 = vadd.s32 4294967169, %v454_v22  ;;  %v458_v51 = vor.u32 8388608, %v457_v37 }
  0xa1   : > { %v4531_v29 = vadd.s32 4294967169, %v609_v26  ;;  %v412_v33 = vpop.f32.mrf.mxu0  ;;  %v613_v63 = vor.u32 8388608, %v612_v50 }
  0xa2   : > { %v460_v25 = vadd.s32 1, %v4528_v24  ;;  %v4949_v42 = vadd.f32 %v412_v33, %v367_v38  ;;  %v4965_v3 = vshll.u32 %v458_v51, 8  ;;  %v441_v4 = vpop.f32.mrf.mxu1 }
  0xa3   : > { %v615_v31 = vadd.s32 1, %v4531_v29  ;;  %v4973_v10 = vshll.u32 %v613_v63, 8  ;;  %v4975_v11 = vadd.f32 %v441_v4, %v367_v38 }
  0xa4   : > { %vm461_vm1 = vcmp.gt.s32.totalorder %v460_v25, 0  ;;  %8991 = vst [vmem:[#allocation7_spill] sm:$0xff] %v4949_v42  ;;  %v763_v58 = vand.u32 2139095040, %v4949_v42  ;;  %v4979_v12 = vand.u32 65535, %v4965_v3  ;;  %v4982_v13 = vshrl.u32 %v4965_v3, 16 }
  0xa5   : > { %v462_v27 = vsel %vm461_vm1, %v460_v25, 0  ;;  %vm616_vm2 = vcmp.gt.s32.totalorder %v615_v31, 0  ;;  %8992 = vst [vmem:[#allocation8_spill] sm:$0xff] %v4965_v3  ;;  %v8773_v14 = vand.u32 2147483647, %v4949_v42  ;;  %v5036_v63 = vshrl.u32 %v4973_v10, 16 }
  0xa6   : > { %v464_v28 = vand.u32 31, %v462_v27  ;;  %v4946_v39 = vshrl.u32 %v462_v27, 5  ;;  %v617_v48 = vsel %vm616_vm2, %v615_v31, 0  ;;  %v764_v9 = vshrl.u32 %v763_v58, 23  ;;  %8993 = vst [vmem:[#allocation9_spill] sm:$0xff] %v4973_v10 }
  0xa7   : > { %v619_v57 = vand.u32 31, %v617_v48  ;;  %8994 = vst [vmem:[#allocation10_spill] sm:$0xff] %v4975_v11  ;;  %v4997_v24 = vshrl.u32 %v617_v48, 5 }
  0xa8   : > { %v465_v30 = vsub.s32 32, %v464_v28  ;;  %v479_v41 = vshll.u32 %v8785_v40, %v464_v28  ;;  %v470_v53 = vshll.u32 %v8801_v52, %v464_v28  ;;  %v473_v54 = vshll.u32 %v8805_v43, %v464_v28  ;;  %8995 = vst [vmem:[#allocation11_spill] sm:$0xff] %v4979_v12 }
  0xa9   : > { %v476_v55 = vshll.u32 %v8783_v45, %v464_v28  ;;  %vm485_vm3 = vcmp.lt.s32.totalorder %v4946_v39, 4  ;;  %v467_v2 = vshll.u32 %v8796_v1, %v464_v28  ;;  %vm482_vm4 = vcmp.lt.s32.totalorder %v4946_v39, 1  ;;  %8998 = vst [vmem:[#allocation14_spill] sm:$0xff] %v5036_v63 }
  0xaa   : > { %v480_v35 = vshrl.u32 %v8794_v34, %v465_v30  ;;  %v471_v44 = vshrl.u32 %v8805_v43, %v465_v30  ;;  %v474_v46 = vshrl.u32 %v8783_v45, %v465_v30  ;;  %v477_v47 = vshrl.u32 %v8785_v40, %v465_v30 }
  0xab   : > { %v468_v56 = vshrl.u32 %v8801_v52, %v465_v30  ;;  %vm484_vm5 = vcmp.lt.s32.totalorder %v4946_v39, 3  ;;  %v620_v5 = vsub.s32 32, %v619_v57  ;;  %vm483_vm6 = vcmp.lt.s32.totalorder %v4946_v39, 2 }
  0xac   : > { %v481_v49 = vor.u32 %v480_v35, %v479_v41  ;;  %v472_v59 = vor.u32 %v471_v44, %v470_v53  ;;  %v475_v60 = vor.u32 %v474_v46, %v473_v54  ;;  %v478_v61 = vor.u32 %v477_v47, %v476_v55 }
  0xad   : > { %v469_v6 = vor.u32 %v468_v56, %v467_v2  ;;  %v632_v17 = vshrl.u32 %v8785_v40, %v620_v5  ;;  %v4534_v19 = vadd.s32 4294967169, %v764_v9  ;;  %v466_v21 = vshrl.u32 %v8796_v1, %v465_v30 }
  0xae   : > { %v495_v62 = vsel %vm485_vm3, %v481_v49, 1326507024  ;;  %v494_v7 = vsel %vm482_vm4, %v472_v59, %v475_v60  ;;  %v491_v15 = vsel %vm485_vm3, %v478_v61, 920167782  ;;  %v487_v22 = vsel %vm485_vm3, %v475_v60, 2102212464 }
  0xaf   : > { %v496_v8 = vsel %vm484_vm5, %v478_v61, %v495_v62  ;;  %v490_v23 = vsel %vm482_vm4, %v469_v6, %v472_v59  ;;  %v623_v25 = vshrl.u32 %v8801_v52, %v620_v5  ;;  %v629_v26 = vshrl.u32 %v8783_v45, %v620_v5 }
  0xb0   : > { %v4989_v16 = vsel %vm483_vm6, %v494_v7, %v496_v8  ;;  %v631_v27 = vshll.u32 %v8783_v45, %v619_v57  ;;  %v770_v28 = vadd.s32 1, %v4534_v19  ;;  %v492_v29 = vsel %vm484_vm5, %v475_v60, %v491_v15 }
  0xb1   : > { %v502_v30 = vshrl.u32 %v4989_v16, 16  ;;  %v626_v31 = vshrl.u32 %v8805_v43, %v620_v5  ;;  %v635_v33 = vshrl.u32 %v8794_v34, %v620_v5  ;;  %v622_v35 = vshll.u32 %v8796_v1, %v619_v57 }
  0xb2   : > { %v628_v37 = vshll.u32 %v8805_v43, %v619_v57  ;;  %v633_v38 = vor.u32 %v632_v17, %v631_v27  ;;  %vm771_vm7 = vcmp.gt.s32.totalorder %v770_v28, 0  ;;  %v486_v41 = vsel %vm482_vm4, %v466_v21, %v469_v6 }
  0xb3   : > { %v625_v44 = vshll.u32 %v8801_v52, %v619_v57  ;;  %v634_v46 = vshll.u32 %v8785_v40, %v619_v57  ;;  %v772_v47 = vsel %vm771_vm7, %v770_v28, 0  ;;  %v488_v48 = vsel %vm484_vm5, %v472_v59, %v487_v22 }
  0xb4   : > { %v5017_v49 = vsel %vm483_vm6, %v490_v23, %v492_v29  ;;  %v624_v50 = vor.u32 %v623_v25, %v622_v35  ;;  %v630_v51 = vor.u32 %v629_v26, %v628_v37  ;;  %v5020_v53 = vmul.u32 %v502_v30, %v4979_v12  ;;  %v415_v35 = vpop.f32.mrf.mxu0 }
  0xb5   : > { %v627_v54 = vor.u32 %v626_v31, %v625_v44  ;;  %v636_v55 = vor.u32 %v635_v33, %v634_v46  ;;  %vm640_vm8 = vcmp.lt.s32.totalorder %v4997_v24, 4  ;;  %v5026_v57 = vand.u32 65535, %v4973_v10  ;;  %v444_v44 = vpop.f32.mrf.mxu1  ;;  %v372_v46 = vpop.permute.xlu0 %371 }
  0xb6   : > { %v646_v56 = vsel %vm640_vm8, %v633_v38, 920167782  ;;  %v774_v58 = vand.u32 31, %v772_v47  ;;  %v918_v59 = vand.u32 2139095040, %v4975_v11  ;;  %v5031_v60 = vsel %vm483_vm6, %v486_v41, %v488_v48 }
  0xb7   : > { %8996 = vst [vmem:[#allocation12_spill] sm:$0xff] %v5026_v57  ;;  %v8777_v61 = vand.u32 65535, %v4989_v16  ;;  %v621_v62 = vshrl.u32 %v8796_v1, %v620_v5  ;;  %v524_v2 = vshrl.u32 %v5017_v49, 16  ;;  %vm637_vm9 = vcmp.lt.s32.totalorder %v4997_v24, 1 }
  0xb8   : > { %8997 = vst [vmem:[#allocation13_spill] sm:$0xff] %v5031_v60  ;;  %vm639_vm10 = vcmp.lt.s32.totalorder %v4997_v24, 3  ;;  %v642_v4 = vsel %vm640_vm8, %v630_v51, 2102212464  ;;  %v8779_v39 = vshll.u32 %v5020_v53, 16  ;;  %v645_v6 = vsel %vm637_vm9, %v624_v50, %v627_v54 }
  0xb9   : > { %v647_v5 = vsel %vm639_vm10, %v630_v51, %v646_v56  ;;  %v650_v7 = vsel %vm640_vm8, %v636_v55, 1326507024  ;;  %v767_v9 = vand.u32 8388607, %v8773_v14  ;;  %v775_v15 = vsub.s32 32, %v774_v58 }
  0xba   : > { %v919_v17 = vshrl.u32 %v918_v59, 23  ;;  %v5057_v19 = vmul.u32 %v8777_v61, %v4979_v12  ;;  %vm638_vm11 = vcmp.lt.s32.totalorder %v4997_v24, 2  ;;  %v641_v21 = vsel %vm637_vm9, %v621_v62, %v624_v50 }
  0xbb   : > { %v643_v22 = vsel %vm639_vm10, %v627_v54, %v642_v4  ;;  %v5067_v25 = vsel %vm638_vm11, %v645_v6, %v647_v5  ;;  %v649_v26 = vsel %vm637_vm9, %v627_v54, %v630_v51  ;;  %v651_v27 = vsel %vm639_vm10, %v633_v38, %v650_v7 }
  0xbc   : > { %8999 = vst [vmem:[#allocation15_spill] sm:$0xff] %v5067_v25  ;;  %v5074_v28 = vmul.u32 %v502_v30, %v4982_v13  ;;  %v5079_v29 = vadd.s32 %v8779_v39, %v5057_v19  ;;  %v5082_v31 = vmul.u32 %v524_v2, %v4979_v12  ;;  %v5085_v33 = vmul.u32 %v524_v2, %v4982_v13 }
  0xbd   : > { %v5089_v37 = vsel %vm638_vm11, %v641_v21, %v643_v22  ;;  %v768_v38 = vor.u32 8388608, %v767_v9  ;;  %v790_v30 = vshrl.u32 %v8794_v34, %v775_v15  ;;  %v4537_v41 = vadd.s32 4294967169, %v919_v17 }
  0xbe   : > { %9000 = vst [vmem:[#allocation16_spill] sm:$0xff] %v5082_v31  ;;  %v5094_v48 = vsel %vm638_vm11, %v649_v26, %v651_v27  ;;  %v787_v51 = vshrl.u32 %v8785_v40, %v775_v15  ;;  %v8774_v54 = vand.u32 2147483647, %v4975_v11  ;;  %v679_v55 = vshrl.u32 %v5067_v25, 16 }
  0xbf   : > { %9001 = vst [vmem:[#allocation17_spill] sm:$0xff] %v5085_v33  ;;  %v784_v56 = vshrl.u32 %v8783_v45, %v775_v15  ;;  %v789_v59 = vshll.u32 %v8785_v40, %v774_v58  ;;  %v5102_v62 = vadd.f32 %v415_v35, %v372_v46  ;;  %v773_v2 = vshrl.u32 %v772_v47, 5 }
  0xc0   : > { %9002 = vst [vmem:[#allocation18_spill] sm:$0xff] %v5089_v37  ;;  %v781_v4 = vshrl.u32 %v8805_v43, %v775_v15  ;;  %v786_v24 = vshll.u32 %v8783_v45, %v774_v58  ;;  %v5106_v6 = vadd.f32 %v444_v44, %v372_v46  ;;  %v778_v5 = vshrl.u32 %v8801_v52, %v775_v15 }
  0xc1   : > { %9003 = vst [vmem:[#allocation19_spill] sm:$0xff] %v5094_v48  ;;  %v783_v7 = vshll.u32 %v8805_v43, %v774_v58  ;;  %v791_v9 = vor.u32 %v790_v30, %v789_v59  ;;  %v925_v17 = vadd.s32 1, %v4537_v41  ;;  %v657_v21 = vshrl.u32 %v5094_v48, 16 }
  0xc2   : > { %v780_v22 = vshll.u32 %v8801_v52, %v774_v58  ;;  %v788_v26 = vor.u32 %v787_v51, %v786_v24  ;;  %v922_v47 = vand.u32 8388607, %v8774_v54  ;;  %v777_v35 = vshll.u32 %v8796_v1, %v774_v58 }
  0xc3   : > { %v785_v44 = vor.u32 %v784_v56, %v783_v7  ;;  %v1073_v46 = vand.u32 2139095040, %v5102_v62  ;;  %v8776_v36 = vand.u32 65535, %v5094_v48  ;;  %vm795_vm12 = vcmp.lt.s32.totalorder %v773_v2, 4  ;;  %v418_v56 = vpop.f32.mrf.mxu0 }
  0xc4   : > { %v782_v30 = vor.u32 %v781_v4, %v780_v22  ;;  %v1228_v41 = vand.u32 2139095040, %v5106_v6  ;;  %v779_v59 = vor.u32 %v778_v5, %v777_v35  ;;  %v805_v14 = vsel %vm795_vm12, %v791_v9, 1326507024  ;;  %v5126_v22 = vpop.permute.xlu0 %376 }
  0xc5   : > { %v5120_v51 = vshll.u32 %v768_v38, 8  ;;  %vm926_vm13 = vcmp.gt.s32.totalorder %v925_v17, 0  ;;  %v5123_v24 = vmul.u32 %v657_v21, %v5026_v57  ;;  %vm792_vm14 = vcmp.lt.s32.totalorder %v773_v2, 1 }
  0xc6   : > { %v801_v54 = vsel %vm795_vm12, %v788_v26, 920167782  ;;  %v923_v58 = vor.u32 8388608, %v922_v47  ;;  %v776_v7 = vshrl.u32 %v8796_v1, %v775_v15  ;;  %vm794_vm15 = vcmp.lt.s32.totalorder %v773_v2, 3 }
  0xc7   : > { %9004 = vst [vmem:[#allocation20_spill] sm:$0xff] %v5120_v51  ;;  %v797_v27 = vsel %vm795_vm12, %v785_v44, 2102212464  ;;  %v1074_v4 = vshrl.u32 %v1073_v46, 23  ;;  %v804_v5 = vsel %vm792_vm14, %v782_v30, %v785_v44  ;;  %v806_v38 = vsel %vm794_vm15, %v788_v26, %v805_v14 }
  0xc8   : > { %9005 = vst [vmem:[#allocation21_spill] sm:$0xff] %v5123_v24  ;;  %v927_v9 = vsel %vm926_vm13, %v925_v17, 0  ;;  %v1229_v35 = vshrl.u32 %v1228_v41, 23  ;;  %v800_v32 = vsel %vm792_vm14, %v779_v59, %v782_v30  ;;  %v802_v50 = vsel %vm794_vm15, %v785_v44, %v801_v54 }
  0xc9   : > { %v4540_v8 = vadd.s32 4294967169, %v1074_v4  ;;  %v5133_v47 = vadd.f32 %v418_v56, %v5126_v22  ;;  %v5136_v15 = vmul.u32 %v679_v55, %v5026_v57  ;;  %v5139_v46 = vmul.u32 %v679_v55, %v5036_v63 }
  0xca   : > { %vm793_vm0 = vcmp.lt.s32.totalorder %v773_v2, 2  ;;  %v796_v23 = vsel %vm792_vm14, %v776_v7, %v779_v59  ;;  %v798_v14 = vsel %vm794_vm15, %v782_v30, %v797_v27  ;;  %v929_v26 = vand.u32 31, %v927_v9 }
  0xcb   : > { %9006 = vst [vmem:[#allocation22_spill] sm:$0xff] %v5136_v15  ;;  %v5143_v17 = vsel %vm793_vm0, %v804_v5, %v806_v38  ;;  %v1080_v41 = vadd.s32 1, %v4540_v8  ;;  %v5148_v54 = vmul.u32 %v8776_v36, %v5026_v57  ;;  %v8778_v44 = vshll.u32 %v5123_v24, 16 }
  0xcc   : > { %9007 = vst [vmem:[#allocation23_spill] sm:$0xff] %v5139_v46  ;;  %v5151_v56 = vsel %vm793_vm0, %v800_v32, %v802_v50  ;;  %v4543_v55 = vadd.s32 4294967169, %v1229_v35  ;;  %v5154_v4 = vmul.u32 %v657_v21, %v5036_v63  ;;  %v5156_v59 = vshll.u32 %v923_v58, 8 }
  0xcd   : > { %9008 = vst [vmem:[#allocation24_spill] sm:$0xff] %v5143_v17  ;;  %vm1081_vm1 = vcmp.gt.s32.totalorder %v1080_v41, 0  ;;  %v1383_v2 = vand.u32 2139095040, %v5133_v47  ;;  %v5159_v27 = vsel %vm793_vm0, %v796_v23, %v798_v14  ;;  %v5162_v8 = vand.u32 65535, %v5120_v51 }
  0xce   : > { %9009 = vst [vmem:[#allocation25_spill] sm:$0xff] %v5148_v54  ;;  %v8782_v30 = vand.u32 65535, %v5143_v17  ;;  %v812_v7 = vshrl.u32 %v5143_v17, 16  ;;  %v834_v32 = vshrl.u32 %v5151_v56, 16  ;;  %v5167_v50 = vsub.s32 32, %v929_v26 }
  0xcf   : > { %9010 = vst [vmem:[#allocation26_spill] sm:$0xff] %v5151_v56  ;;  %v1082_v21 = vsel %vm1081_vm1, %v1080_v41, 0  ;;  %v1384_v5 = vshrl.u32 %v1383_v2, 23  ;;  %v5172_v58 = vadd.s32 %v8778_v44, %v5148_v54  ;;  %v5175_v23 = vshrl.u32 %v5120_v51, 16 }
  0xd0   : > { %9011 = vst [vmem:[#allocation27_spill] sm:$0xff] %v5154_v4  ;;  %v1084_v38 = vand.u32 31, %v1082_v21  ;;  %v1235_v35 = vadd.s32 1, %v4543_v55  ;;  %v5180_v36 = vand.u32 65535, %v5156_v59  ;;  %v5183_v61 = vshrl.u32 %v5156_v59, 16 }
  0xd1   : > { %9012 = vst [vmem:[#allocation28_spill] sm:$0xff] %v5156_v59  ;;  %v4546_v41 = vadd.s32 4294967169, %v1384_v5  ;;  %v5188_v2 = vmul.u32 %v8782_v30, %v5162_v8  ;;  %v5191_v44 = vmul.u32 %v812_v7, %v5162_v8  ;;  %v5194_v39 = vshrl.u32 %v927_v9, 5  ;;  %v447_v9 = vpop.f32.mrf.mxu1 }
  0xd2   : > { %9013 = vst [vmem:[#allocation29_spill] sm:$0xff] %v5159_v27  ;;  %v5197_v14 = vmul.u32 %v812_v7, %v5175_v23  ;;  %v5200_v0 = vmul.u32 %v834_v32, %v5162_v8  ;;  %v5203_v5 = vmul.u32 %v834_v32, %v5175_v23  ;;  %v945_v30 = vshrl.u32 %v8794_v34, %v5167_v50 }
  0xd3   : > { %9014 = vst [vmem:[#allocation30_spill] sm:$0xff] %v5162_v8  ;;  %v932_v45 = vshll.u32 %v8796_v1, %v929_v26  ;;  %v933_v40 = vshrl.u32 %v8801_v52, %v5167_v50  ;;  %v5210_v55 = vsub.s32 32, %v1084_v38  ;;  %vm1236_vm2 = vcmp.gt.s32.totalorder %v1235_v35, 0 }
  0xd4   : > { %9015 = vst [vmem:[#allocation31_spill] sm:$0xff] %v5167_v50  ;;  %v935_v7 = vshll.u32 %v8801_v52, %v929_v26  ;;  %v936_v11 = vshrl.u32 %v8805_v43, %v5167_v50  ;;  %v944_v32 = vshll.u32 %v9025_v20, %v929_v26  ;;  %v1390_v59 = vadd.s32 1, %v4546_v41 }
  0xd5   : > { %9016 = vst [vmem:[#allocation32_spill] sm:$0xff] %v5172_v58  ;;  %v938_v42 = vshll.u32 %v8805_v43, %v929_v26  ;;  %v9026_v34 = vmov 2102212464   ;;  %v942_v37 = vshrl.u32 %v9025_v20, %v5167_v50  ;;  %v1237_v46 = vsel %vm1236_vm2, %v1235_v35, 0 }
  0xd6   : > { %9017 = vst [vmem:[#allocation33_spill] sm:$0xff] %v5175_v23  ;;  %v939_v1 = vshrl.u32 %v9026_v34, %v5167_v50  ;;  %v946_v10 = vor.u32 %v945_v30, %v944_v32  ;;  %vm1391_vm3 = vcmp.gt.s32.totalorder %v1390_v59, 0  ;;  %v5223_v52 = vadd.f32 %v447_v9, %v5126_v22 }
  0xd7   : > { %9018 = vst [vmem:[#allocation34_spill] sm:$0xff] %v5180_v36  ;;  %v5225_v18 = vor.u32 %v933_v40, %v932_v45  ;;  %v1097_v41 = vshrl.u32 %v9025_v20, %v5210_v55  ;;  %v9028_v43 = vmov 1326507024   ;;  %v1392_v51 = vsel %vm1391_vm3, %v1390_v59, 0 }
  0xd8   : > { %9019 = vst [vmem:[#allocation35_spill] sm:$0xff] %v5183_v61  ;;  %v941_v61 = vshll.u32 %v9026_v34, %v929_v26  ;;  %v1100_v27 = vshrl.u32 %v9028_v43, %v5210_v55  ;;  %v5231_v25 = vor.u32 %v936_v11, %v935_v7  ;;  %vm950_vm4 = vcmp.lt.s32.totalorder %v5194_v39, 4 }
  0xd9   : > { %9020 = vst [vmem:[#allocation36_spill] sm:$0xff] %v5188_v2  ;;  %v5234_v26 = vand.u32 31, %v1392_v51  ;;  %v5237_v35 = vshrl.u32 %v1082_v21, 5  ;;  %v1096_v40 = vshll.u32 %v9026_v34, %v1084_v38  ;;  %v1099_v45 = vshll.u32 %v9025_v20, %v1084_v38 }
  0xda   : > { %9021 = vst [vmem:[#allocation37_spill] sm:$0xff] %v5191_v44  ;;  %v5241_v22 = vand.u32 31, %v1237_v46  ;;  %v5243_v9 = vor.u32 %v939_v1, %v938_v42  ;;  %v5245_v32 = vor.u32 %v942_v37, %v941_v61  ;;  %v5249_v11 = vsel %vm950_vm4, %v946_v10, 1326507024 }
  0xdb   : > { %9022 = vst [vmem:[#allocation38_spill] sm:$0xff] %v5197_v14  ;;  %v1538_v59 = vand.u32 2139095040, %v5223_v52  ;;  %v1098_v7 = vor.u32 %v1097_v41, %v1096_v40  ;;  %v1101_v30 = vor.u32 %v1100_v27, %v1099_v45  ;;  %v5253_v21 = vsub.s32 32, %v5234_v26 }
  0xdc   : > { %9023 = vst [vmem:[#allocation39_spill] sm:$0xff] %v5200_v0  ;;  %v9031_v57 = vmov 2475754826   ;;  %v9032_v58 = vand.u32 2147483647, %v5102_v62  ;;  %vm1105_vm5 = vcmp.lt.s32.totalorder %v5237_v35, 4  ;;  %v5271_v40 = vshll.u32 %v9026_v34, %v5241_v22 }
  0xdd   : > { %9024 = vst [vmem:[#allocation40_spill] sm:$0xff] %v5203_v5  ;;  %v1088_v15 = vshrl.u32 %v9031_v57, %v5210_v55  ;;  %v9033_v1 = vmov 683565275   ;;  %v1090_v37 = vshll.u32 %v9031_v57, %v1084_v38  ;;  %v9034_v10 = vmov 2131351028  }
  0xde   : > { %9027 = vst [vmem:[#allocation41_spill] sm:$0xff] %v5225_v18  ;;  %v1077_v42 = vand.u32 8388607, %v9032_v58  ;;  %v1087_v61 = vshll.u32 %v9033_v1, %v1084_v38  ;;  %v1091_v4 = vshrl.u32 %v9034_v10, %v5210_v55  ;;  %v5264_v41 = vshrl.u32 %v1237_v46, 5 }
  0xdf   : > { %9029 = vst [vmem:[#allocation42_spill] sm:$0xff] %v5231_v25  ;;  %v5267_v27 = vsub.s32 32, %v5241_v22  ;;  %v1093_v48 = vshll.u32 %v9034_v10, %v1084_v38  ;;  %v1094_v63 = vshrl.u32 %v9026_v34, %v5210_v55  ;;  %v1111_v5 = vsel %vm1105_vm5, %v1098_v7, 920167782 }
  0xe0   : > { %9030 = vst [vmem:[#allocation43_spill] sm:$0xff] %v5243_v9  ;;  %v1089_v45 = vor.u32 %v1088_v15, %v1087_v61  ;;  %v1092_v58 = vor.u32 %v1091_v4, %v1090_v37  ;;  %v5280_v46 = vshll.u32 %v9025_v20, %v5241_v22  ;;  %v1407_v54 = vshrl.u32 %v9025_v20, %v5253_v21 }
  0xe1   : > { %v1539_v24 = vshrl.u32 %v1538_v59, 23  ;;  %v1115_v15 = vsel %vm1105_vm5, %v1101_v30, 1326507024  ;;  %v1410_v4 = vshrl.u32 %v9028_v43, %v5253_v21  ;;  %v1078_v38 = vor.u32 8388608, %v1077_v42 }
  0xe2   : > { %v1095_v61 = vor.u32 %v1094_v63, %v1093_v48  ;;  %v5288_v37 = vshrl.u32 %v1392_v51, 5  ;;  %v1406_v56 = vshll.u32 %v9026_v34, %v5234_v26  ;;  %vm1102_vm6 = vcmp.lt.s32.totalorder %v5237_v35, 1 }
  0xe3   : > { %vm1104_vm7 = vcmp.lt.s32.totalorder %v5237_v35, 3  ;;  %v1409_v59 = vshll.u32 %v9025_v20, %v5234_v26  ;;  %vm1103_vm8 = vcmp.lt.s32.totalorder %v5237_v35, 2  ;;  %v1110_v30 = vsel %vm1102_vm6, %v1089_v45, %v1092_v58 }
  0xe4   : > { %v1112_v63 = vsel %vm1104_vm7, %v1095_v61, %v1111_v5  ;;  %v5301_v48 = vor.u32 %v1407_v54, %v1406_v56  ;;  %v4549_v51 = vadd.s32 4294967169, %v1539_v24  ;;  %v1086_v42 = vshrl.u32 %v9033_v1, %v5210_v55 }
  0xe5   : > { %v1113_v8 = vsel %vm1103_vm8, %v1110_v30, %v1112_v63  ;;  %v1411_v14 = vor.u32 %v1410_v4, %v1409_v59  ;;  %v1114_v60 = vsel %vm1102_vm6, %v1092_v58, %v1095_v61  ;;  %v1116_v3 = vsel %vm1104_vm7, %v1098_v7, %v1115_v15 }
  0xe6   : > { %v5311_v0 = vshll.u32 %v1078_v38, 8  ;;  %vm1415_vm9 = vcmp.lt.s32.totalorder %v5288_v37, 4  ;;  %v1107_v24 = vsel %vm1105_vm5, %v1095_v61, 2102212464  ;;  %v1117_v54 = vsel %vm1103_vm8, %v1114_v60, %v1116_v3 }
  0xe7   : > { %v1143_v56 = vand.u32 65535, %v1113_v8  ;;  %v1121_v4 = vand.u32 65535, %v1117_v54  ;;  %v1122_v59 = vshrl.u32 %v1117_v54, 16  ;;  %v5322_v7 = vshrl.u32 %v9025_v20, %v5267_v27 }
  0xe8   : > { %v1119_v55 = vand.u32 65535, %v5311_v0  ;;  %v1120_v5 = vshrl.u32 %v5311_v0, 16  ;;  %v5327_v15 = vsel %vm1415_vm9, %v5301_v48, 920167782  ;;  %v5329_v38 = vadd.s32 1, %v4549_v51 }
  0xe9   : > { %v1144_v61 = vshrl.u32 %v1113_v8, 16  ;;  %v1425_v3 = vsel %vm1415_vm9, %v1411_v14, 1326507024  ;;  %v1106_v60 = vsel %vm1102_vm6, %v1086_v42, %v1089_v45  ;;  %v1108_v54 = vsel %vm1104_vm7, %v1092_v58, %v1107_v24 }
  0xea   : > { %v1124_v30 = vmul.u32 %v1122_v59, %v1119_v55  ;;  %v1125_v63 = vmul.u32 %v1121_v4, %v1120_v5  ;;  %v1147_v2 = vmul.u32 %v1143_v56, %v1120_v5  ;;  %v8835_v17 = vand.u32 2147483647, %v5133_v47 }
  0xeb   : > { %v1146_v36 = vmul.u32 %v1144_v61, %v1119_v55  ;;  %v1123_v23 = vmul.u32 %v1121_v4, %v1119_v55  ;;  %v1126_v18 = vmul.u32 %v1122_v59, %v1120_v5  ;;  %v1145_v50 = vmul.u32 %v1143_v56, %v1119_v55 }
  0xec   : > { %v1127_v51 = vshll.u32 %v1124_v30, 16  ;;  %v1128_v8 = vshrl.u32 %v1124_v30, 16  ;;  %v1129_v44 = vshll.u32 %v1125_v63, 16  ;;  %v1148_v33 = vmul.u32 %v1144_v61, %v1120_v5 }
  0xed   : > { %v1149_v14 = vshll.u32 %v1146_v36, 16  ;;  %vm1546_vm10 = vcmp.gt.s32.totalorder %v5329_v38, 0  ;;  %v1130_v45 = vshrl.u32 %v1125_v63, 16  ;;  %v1151_v31 = vshll.u32 %v1147_v2, 16 }
  0xee   : > { %vm1131_vm11 = vc.u32 %v1123_v23, %v1127_v51  ;;  %v1133_v42 = vadd.s32 %v1127_v51, %v1123_v23  ;;  %v9035_v12 = vmov 0   ;;  %v1387_v4 = vand.u32 8388607, %v8835_v17 }
  0xef   : > { %v1132_v58 = vsel %vm1131_vm11, 1, %v9035_v12  ;;  %vm1153_vm12 = vc.u32 %v1145_v50, %v1149_v14  ;;  %v1155_v24 = vadd.s32 %v1149_v14, %v1145_v50  ;;  %v1150_v56 = vshrl.u32 %v1146_v36, 16 }
  0xf0   : > { %v1134_v59 = vadd.s32 %v1132_v58, %v1126_v18  ;;  %vm1135_vm13 = vc.u32 %v1133_v42, %v1129_v44  ;;  %v1154_v55 = vsel %vm1153_vm12, 1, %v9035_v12  ;;  %v1152_v61 = vshrl.u32 %v1147_v2, 16 }
  0xf1   : > { %v1136_v5 = vsel %vm1135_vm13, 1, %v9035_v12  ;;  %v1156_v30 = vadd.s32 %v1154_v55, %v1148_v33  ;;  %vm1157_vm14 = vc.u32 %v1155_v24, %v1151_v31  ;;  %v1388_v51 = vor.u32 8388608, %v1387_v4 }
  0xf2   : > { %v1138_v63 = vadd.s32 %v1136_v5, %v1134_v59  ;;  %v1158_v23 = vsel %vm1157_vm14, 1, %v9035_v12  ;;  %v1397_v50 = vshll.u32 %v9033_v1, %v5234_v26  ;;  %vm947_vm15 = vcmp.lt.s32.totalorder %v5194_v39, 1 }
  0xf3   : > { %vm949_vm0 = vcmp.lt.s32.totalorder %v5194_v39, 3  ;;  %v1160_v18 = vadd.s32 %v1158_v23, %v1156_v30  ;;  %v1398_v36 = vshrl.u32 %v9031_v57, %v5253_v21  ;;  %v1400_v44 = vshll.u32 %v9031_v57, %v5234_v26 }
  0xf4   : > { %v1401_v33 = vshrl.u32 %v9034_v10, %v5253_v21  ;;  %v1139_v2 = vadd.s32 %v1138_v63, %v1128_v8  ;;  %v5355_v14 = vadd.s32 %v1155_v24, %v1151_v31  ;;  %v1403_v42 = vshll.u32 %v9034_v10, %v5234_v26 }
  0xf5   : > { %v1404_v58 = vshrl.u32 %v9026_v34, %v5253_v21  ;;  %v1161_v4 = vadd.s32 %v1160_v18, %v1150_v56  ;;  %v5361_v59 = vor.u32 %v1398_v36, %v1397_v50  ;;  %vm1412_vm1 = vcmp.lt.s32.totalorder %v5288_v37, 1 }
  0xf6   : > { %v5363_v55 = vor.u32 %v1401_v33, %v1400_v44  ;;  %v5366_v5 = vadd.s32 %v1139_v2, %v1130_v45  ;;  %vm1414_vm2 = vcmp.lt.s32.totalorder %v5288_v37, 3  ;;  %v5369_v31 = vshll.u32 %v1388_v51, 8 }
  0xf7   : > { %v1405_v30 = vor.u32 %v1404_v58, %v1403_v42  ;;  %v1109_v26 = vsel %vm1103_vm8, %v1106_v60, %v1108_v54  ;;  %v1162_v8 = vadd.s32 %v1161_v4, %v1152_v61  ;;  %v1426_v56 = vsel %vm1414_vm2, %v5301_v48, %v1425_v3 }
  0xf8   : > { %v1420_v24 = vsel %vm1412_vm1, %v5361_v59, %v5363_v55  ;;  %v5382_v45 = vshrl.u32 %v9028_v43, %v5267_v27  ;;  %vm1165_vm3 = vc.u32 %v5366_v5, %v5355_v14  ;;  %vm1413_vm5 = vcmp.lt.s32.totalorder %v5288_v37, 2 }
  0xf9   : > { %v1422_v35 = vsel %vm1414_vm2, %v1405_v30, %v5327_v15  ;;  %v5393_v60 = vsel %vm1546_vm10, %v5329_v38, 0  ;;  %v1166_v54 = vadd.s32 1, %v1162_v8  ;;  %v1424_v3 = vsel %vm1412_vm1, %v5363_v55, %v1405_v30 }
  0xfa   : > { %v1423_v48 = vsel %vm1413_vm5, %v1420_v24, %v1422_v35  ;;  %v1163_v61 = vmul.u32 %v5311_v0, %v1109_v26  ;;  %v1427_v63 = vsel %vm1413_vm5, %v1424_v3, %v1426_v56  ;;  %v1429_v15 = vand.u32 65535, %v5369_v31 }
  0xfb   : > { %v1430_v23 = vshrl.u32 %v5369_v31, 16  ;;  %v1167_v51 = vsel %vm1165_vm3, %v1166_v54, %v1162_v8  ;;  %v1431_v38 = vand.u32 65535, %v1427_v63  ;;  %v1432_v50 = vshrl.u32 %v1427_v63, 16 }
  0xfc   : > { %v1453_v18 = vand.u32 65535, %v1423_v48  ;;  %v5409_v36 = vsel %vm947_vm15, %v5231_v25, %v5243_v9  ;;  %v5415_v0 = vsel %vm949_vm0, %v5245_v32, %v5249_v11  ;;  %v1168_v44 = vadd.s32 %v1167_v51, %v1163_v61 }
  0xfd   : > { %9036 = vst [vmem:[#allocation44_spill] sm:$0xff] %v5409_v36  ;;  %v1454_v33 = vshrl.u32 %v1423_v48, 16  ;;  %v5419_v2 = vor.u32 %v5322_v7, %v5271_v40  ;;  %v1256_v42 = vor.u32 %v5382_v45, %v5280_v46  ;;  %v1434_v58 = vmul.u32 %v1432_v50, %v1429_v15 }
  0xfe   : > { %9037 = vst [vmem:[#allocation45_spill] sm:$0xff] %v5415_v0  ;;  %v1435_v4 = vmul.u32 %v1431_v38, %v1430_v23  ;;  %v5424_v26 = vand.u32 31, %v5393_v60  ;;  %v1169_v8 = vadd.s32 536870912, %v1168_v44  ;;  %v1457_v56 = vmul.u32 %v1453_v18, %v1430_v23 }
  0xff   : > { %v1456_v24 = vmul.u32 %v1454_v33, %v1429_v15  ;;  %vm1260_vm6 = vcmp.lt.s32.totalorder %v5264_v41, 4  ;;  %v1396_v11 = vshrl.u32 %v9033_v1, %v5253_v21  ;;  %v1417_v40 = vsel %vm1415_vm9, %v1405_v30, 2102212464 }
 0x100   : > { %v1433_v7 = vmul.u32 %v1431_v38, %v1429_v15  ;;  %v1437_v35 = vshll.u32 %v1434_v58, 16  ;;  %v5431_v54 = vshrl.u32 %v1169_v8, 30  ;;  %v1436_v46 = vmul.u32 %v1432_v50, %v1430_v23 }
 0x101   : > { %v1455_v45 = vmul.u32 %v1453_v18, %v1429_v15  ;;  %v1459_v48 = vshll.u32 %v1456_v24, 16  ;;  %v1439_v3 = vshll.u32 %v1435_v4, 16  ;;  %v1458_v63 = vmul.u32 %v1454_v33, %v1430_v23 }
 0x102   : > { %vm1441_vm7 = vc.u32 %v1433_v7, %v1437_v35  ;;  %v1443_v61 = vadd.s32 %v1437_v35, %v1433_v7  ;;  %v1171_v51 = vshll.u32 %v5431_v54, 30  ;;  %v1461_v9 = vshll.u32 %v1457_v56, 16 }
 0x103   : > { %v1442_v17 = vsel %vm1441_vm7, 1, %v9035_v12  ;;  %vm1463_vm8 = vc.u32 %v1455_v45, %v1459_v48  ;;  %v1465_v38 = vadd.s32 %v1459_v48, %v1455_v45  ;;  %v5437_v8 = vsub.s32 32, %v5424_v26 }
 0x104   : > { %v1444_v21 = vadd.s32 %v1442_v17, %v1436_v46  ;;  %vm1445_vm10 = vc.u32 %v1443_v61, %v1439_v3  ;;  %v1464_v30 = vsel %vm1463_vm8, 1, %v9035_v12  ;;  %v1172_v15 = vsub.s32 %v1168_v44, %v1171_v51 }
 0x105   : > { %v1446_v50 = vsel %vm1445_vm10, 1, %v9035_v12  ;;  %v1466_v18 = vadd.s32 %v1464_v30, %v1458_v63  ;;  %v1416_v23 = vsel %vm1412_vm1, %v1396_v11, %v5361_v59  ;;  %v1438_v33 = vshrl.u32 %v1434_v58, 16 }
 0x106   : > { %v1448_v7 = vadd.s32 %v1446_v50, %v1444_v21  ;;  %vm1467_vm9 = vc.u32 %v1465_v38, %v1461_v9  ;;  %vm1173_vm11 = vcmp.lt.s32.totalorder %v1172_v15, 0  ;;  %v1174_v17 = vsub.s32 0, %v1172_v15 }
 0x107   : > { %v1418_v35 = vsel %vm1414_vm2, %v5363_v55, %v1417_v40  ;;  %v1468_v46 = vsel %vm1467_vm9, 1, %v9035_v12  ;;  %v1440_v45 = vshrl.u32 %v1435_v4, 16  ;;  %v1460_v48 = vshrl.u32 %v1456_v24, 16 }
 0x108   : > { %v1449_v44 = vadd.s32 %v1448_v7, %v1438_v33  ;;  %v1470_v3 = vadd.s32 %v1468_v46, %v1466_v18  ;;  %v1266_v61 = vsel %vm1260_vm6, %v5419_v2, 920167782  ;;  %v1270_v59 = vsel %vm1260_vm6, %v1256_v42, 1326507024 }
 0x109   : > { %v1175_v58 = vsel %vm1173_vm11, %v1174_v17, %v1172_v15  ;;  %v8838_v11 = vand.u32 2147483647, %v5106_v6  ;;  %v1462_v55 = vshrl.u32 %v1457_v56, 16  ;;  %v5456_v4 = vshrl.u32 %v5393_v60, 5 }
 0x10a   : > { %v1176_v63 = vclz %v1175_v58  ;;  %v5453_v51 = vadd.s32 %v1449_v44, %v1440_v45  ;;  %v1471_v40 = vadd.s32 %v1470_v3, %v1460_v48  ;;  %v1561_v24 = vshll.u32 %v9026_v34, %v5424_v26 }
 0x10b   : > { %v1419_v21 = vsel %vm1413_vm5, %v1416_v23, %v1418_v35  ;;  %v5462_v30 = vadd.s32 %v1465_v38, %v1461_v9  ;;  %v1562_v42 = vshrl.u32 %v9025_v20, %v5437_v8  ;;  %v1565_v50 = vshrl.u32 %v9028_v43, %v5437_v8 }
 0x10c   : > { %v4541_v18 = vadd.s32 4294967294, %v1176_v63  ;;  %v1472_v56 = vadd.s32 %v1471_v40, %v1462_v55  ;;  %v1232_v60 = vand.u32 8388607, %v8838_v11  ;;  %v1245_v37 = vshll.u32 %v9031_v57, %v5241_v22 }
 0x10d   : > { %vm1475_vm12 = vc.u32 %v5453_v51, %v5462_v30  ;;  %v1246_v9 = vshrl.u32 %v9034_v10, %v5267_v27  ;;  %v1473_v38 = vmul.u32 %v5369_v31, %v1419_v21  ;;  %v1249_v33 = vshrl.u32 %v9026_v34, %v5267_v27 }
 0x10e   : > { %vm4542_vm13 = vcmp.lt.s32.totalorder %v4541_v18, 0  ;;  %v1476_v23 = vadd.s32 1, %v1472_v56  ;;  %v1243_v17 = vshrl.u32 %v9031_v57, %v5267_v27  ;;  %v1248_v46 = vshll.u32 %v9034_v10, %v5241_v22 }
 0x10f   : > { %v1179_v7 = vsel %vm4542_vm13, 0, %v4541_v18  ;;  %v5481_v35 = vor.u32 %v1246_v9, %v1245_v37  ;;  %vm1072_vm14 = vcmp.lt.s32.totalorder %v5102_v62, 0  ;;  %v1164_v45 = vadd.s32 %v5355_v14, %v5366_v5 }
 0x110   : > { %v1180_v44 = vsub.s32 32, %v1179_v7  ;;  %v1184_v31 = vsub.s32 4294967266, %v1179_v7  ;;  %v1477_v48 = vsel %vm1475_vm12, %v1476_v23, %v1472_v56  ;;  %v1233_v58 = vor.u32 8388608, %v1232_v60 }
 0x111   : > { %v1478_v3 = vadd.s32 %v1477_v48, %v1473_v38  ;;  %v1242_v63 = vshll.u32 %v9033_v1, %v5241_v22  ;;  %v1250_v55 = vor.u32 %v1249_v33, %v1248_v46  ;;  %v1181_v40 = vshll.u32 %v1172_v15, %v1179_v7 }
 0x112   : > { %v1182_v21 = vshrl.u32 %v1164_v45, %v1180_v44  ;;  %v1185_v18 = vadd.s32 127, %v1184_v31  ;;  %vm1257_vm1 = vcmp.lt.s32.totalorder %v5264_v41, 1  ;;  %v1564_v14 = vshll.u32 %v9025_v20, %v5424_v26 }
 0x113   : > { %v9038_v5 = vand.u32 2147483647, %v5102_v62  ;;  %v1479_v56 = vadd.s32 536870912, %v1478_v3  ;;  %v5502_v60 = vor.u32 %v1243_v17, %v1242_v63  ;;  %v1269_v22 = vsel %vm1257_vm1, %v5481_v35, %v1250_v55 }
 0x114   : > { %v1183_v15 = vor.u32 %v1182_v21, %v1181_v40  ;;  %v1186_v9 = vshll.u32 %v1185_v18, 23  ;;  %v1194_v38 = vsub.s32 4, %v5431_v54  ;;  %vm1259_vm3 = vcmp.lt.s32.totalorder %v5264_v41, 3 }
 0x115   : > { %vm5498_vm2 = vcmp.le.f32.partialorder %v9038_v5, 0.7853982  ;;  %v5509_v23 = vshrl.u32 %v1479_v56, 30  ;;  %vm1258_vm5 = vcmp.lt.s32.totalorder %v5264_v41, 2  ;;  %v1271_v33 = vsel %vm1259_vm3, %v5419_v2, %v1270_v59 }
 0x116   : > { %v5515_v7 = vshll.u32 %v1233_v58, 8  ;;  %v5517_v17 = vor.u32 %v1562_v42, %v1561_v24  ;;  %v1566_v46 = vor.u32 %v1565_v50, %v1564_v14  ;;  %v1187_v45 = vor.u32 4788187, %v1186_v9 }
 0x117   : > { %v1272_v44 = vsel %vm1258_vm5, %v1269_v22, %v1271_v33  ;;  %v1190_v31 = vcvt.s32.f32 %v1183_v15  ;;  %v1481_v48 = vshll.u32 %v5509_v23, 30  ;;  %v1265_v63 = vsel %vm1257_vm1, %v5502_v60, %v5481_v35 }
 0x118   : > { %v1267_v2 = vsel %vm1259_vm3, %v1250_v55, %v1266_v61  ;;  %v1188_v59 = vand.u32 2147483647, %v1187_v45  ;;  %v1274_v24 = vand.u32 65535, %v5515_v7  ;;  %v1276_v42 = vand.u32 65535, %v1272_v44 }
 0x119   : > { %v1277_v50 = vshrl.u32 %v1272_v44, 16  ;;  %vm1570_vm7 = vcmp.lt.s32.totalorder %v5456_v4, 4  ;;  %v5533_v58 = vsel %vm1072_vm14, %v1194_v38, %v5431_v54  ;;  %v5535_v40 = vsub.s32 %v1478_v3, %v1481_v48 }
 0x11a   : > { %v1275_v21 = vshrl.u32 %v5515_v7, 16  ;;  %v5541_v61 = vsel %vm1570_vm7, %v5517_v17, 920167782  ;;  %v1191_v18 = vmul.f32 %v1190_v31, %v1188_v59  ;;  %v1268_v14 = vsel %vm1258_vm5, %v1265_v63, %v1267_v2 }
 0x11b   : > { %v1279_v5 = vmul.u32 %v1277_v50, %v1274_v24  ;;  %v5547_v56 = vsel %vm1570_vm7, %v1566_v46, 1326507024  ;;  %vm1483_vm8 = vcmp.lt.s32.totalorder %v5535_v40, 0  ;;  %v1484_v54 = vsub.s32 0, %v5535_v40 }
 0x11c   : > { %v5551_v3 = vmul.u32 %v1276_v42, %v1275_v21  ;;  %v1192_v22 = vxor.u32 2147483648, %v1191_v18  ;;  %v1197_v15 = vsel %vm5498_vm2, 0, %v5533_v58  ;;  %v1278_v9 = vmul.u32 %v1276_v42, %v1274_v24 }
 0x11d   : > { %v1282_v38 = vshll.u32 %v1279_v5, 16  ;;  %v1485_v33 = vsel %vm1483_vm8, %v1484_v54, %v5535_v40  ;;  %v1298_v44 = vand.u32 65535, %v1268_v14  ;;  %v1299_v46 = vshrl.u32 %v1268_v14, 16 }
 0x11e   : > { %v1284_v45 = vshll.u32 %v5551_v3, 16  ;;  %v1193_v31 = vsel %vm1072_vm14, %v1192_v22, %v1191_v18  ;;  %v1486_v48 = vclz %v1485_v33  ;;  %v1474_v59 = vadd.s32 %v5462_v30, %v5453_v51 }
 0x11f   : > { %vm1286_vm10 = vc.u32 %v1278_v9, %v1282_v38  ;;  %v1288_v63 = vadd.s32 %v1282_v38, %v1278_v9  ;;  %v5563_v2 = vsel %vm5498_vm2, %v5102_v62, %v1193_v31  ;;  %v1241_v42 = vshrl.u32 %v9033_v1, %v5267_v27 }
 0x120   : > { %v1281_v58 = vmul.u32 %v1277_v50, %v1275_v21  ;;  %v5571_v14 = vmul.f32 %v5563_v2, %v5563_v2  ;;  %v4547_v18 = vadd.s32 4294967294, %v1486_v48  ;;  %v1287_v54 = vsel %vm1286_vm10, 1, %v9035_v12 }
 0x121   : > { %vm1290_vm9 = vc.u32 %v1288_v63, %v1284_v45  ;;  %v1262_v37 = vsel %vm1260_vm6, %v1250_v55, 2102212464  ;;  %v1301_v38 = vmul.u32 %v1299_v46, %v1274_v24  ;;  %vm1382_vm11 = vcmp.lt.s32.totalorder %v5133_v47, 0 }
 0x122   : > { %v1289_v22 = vadd.s32 %v1287_v54, %v1281_v58  ;;  %v1291_v9 = vsel %vm1290_vm9, 1, %v9035_v12  ;;  %v1199_v51 = vmul.f32 -0.001358992, %v5571_v14  ;;  %v1206_v27 = vmul.f32 -0.00019511016, %v5571_v14 }
 0x123   : > { %vm4548_vm12 = vcmp.lt.s32.totalorder %v4547_v18, 0  ;;  %v1302_v30 = vmul.u32 %v1298_v44, %v1275_v21  ;;  %v1504_v33 = vsub.s32 4, %v5509_v23  ;;  %v1300_v31 = vmul.u32 %v1298_v44, %v1274_v24 }
 0x124   : > { %v1489_v50 = vsel %vm4548_vm12, 0, %v4547_v18  ;;  %v1304_v45 = vshll.u32 %v1301_v38, 16  ;;  %v1207_v48 = vadd.f32 0.008332121, %v1206_v27  ;;  %v1283_v55 = vshrl.u32 %v1279_v5, 16 }
 0x125   : > { %v1490_v63 = vsub.s32 32, %v1489_v50  ;;  %v1293_v58 = vadd.s32 %v1291_v9, %v1289_v22  ;;  %v1200_v54 = vadd.f32 0.041655596, %v1199_v51  ;;  %v9041_v11 = vand.u32 2147483647, %v5133_v47 }
 0x126   : > { %v1494_v43 = vsub.s32 4294967266, %v1489_v50  ;;  %v1303_v25 = vmul.u32 %v1299_v46, %v1275_v21  ;;  %vm1308_vm13 = vc.u32 %v1300_v31, %v1304_v45  ;;  %v1208_v18 = vmul.f32 %v1207_v48, %v5571_v14 }
 0x127   : > { %vm5583_vm6 = vcmp.le.f32.partialorder %v9041_v11, 0.7853982  ;;  %v1492_v36 = vshrl.u32 %v1474_v59, %v1490_v63  ;;  %v1306_v0 = vshll.u32 %v1302_v30, 16  ;;  %v1309_v24 = vsel %vm1308_vm13, 1, %v9035_v12 }
 0x128   : > { %v1491_v44 = vshll.u32 %v5535_v40, %v1489_v50  ;;  %v1495_v5 = vadd.s32 127, %v1494_v43  ;;  %v1310_v22 = vadd.s32 %v1304_v45, %v1300_v31  ;;  %v1311_v9 = vadd.s32 %v1309_v24, %v1303_v25 }
 0x129   : > { %v1209_v51 = vadd.f32 -0.16666654, %v1208_v18  ;;  %v1261_v11 = vsel %vm1257_vm1, %v1241_v42, %v5502_v60  ;;  %v1263_v21 = vsel %vm1259_vm3, %v5481_v35, %v1262_v37  ;;  %v1294_v46 = vadd.s32 %v1293_v58, %v1283_v55 }
 0x12a   : > { %v1201_v59 = vmul.f32 %v1200_v54, %v5571_v14  ;;  %v1493_v27 = vor.u32 %v1492_v36, %v1491_v44  ;;  %v1496_v48 = vshll.u32 %v1495_v5, 23  ;;  %vm1312_vm14 = vc.u32 %v1310_v22, %v1306_v0 }
 0x12b   : > { %v1210_v40 = vmul.f32 %v1209_v51, %v5571_v14  ;;  %v1214_v43 = vadd.s32 3, %v1197_v15  ;;  %v1285_v25 = vshrl.u32 %v5551_v3, 16  ;;  %v1313_v50 = vsel %vm1312_vm14, 1, %v9035_v12 }
 0x12c   : > { %v1497_v31 = vor.u32 4788187, %v1496_v48  ;;  %v1505_v60 = vsel %vm1382_vm11, %v1504_v33, %v5509_v23  ;;  %v1305_v42 = vshrl.u32 %v1301_v38, 16  ;;  %v1315_v35 = vadd.s32 %v1313_v50, %v1311_v9 }
 0x12d   : > { %v1264_v37 = vsel %vm1258_vm5, %v1261_v11, %v1263_v21  ;;  %v5605_v36 = vadd.s32 %v1294_v46, %v1285_v25  ;;  %v1307_v45 = vshrl.u32 %v1302_v30, 16  ;;  %v1535_v63 = vand.u32 2147483647, %v5223_v52 }
 0x12e   : > { %v1202_v15 = vadd.f32 -0.4999988, %v1201_v59  ;;  %v1498_v55 = vand.u32 2147483647, %v1497_v31  ;;  %v1500_v3 = vcvt.s32.f32 %v1493_v27  ;;  %v1316_v58 = vadd.s32 %v1315_v35, %v1305_v42 }
 0x12f   : > { %v1211_v54 = vadd.f32 1.0, %v1210_v40  ;;  %v5608_v18 = vand.u32 3, %v1214_v43  ;;  %v1507_v23 = vsel %vm5583_vm6, 0, %v1505_v60  ;;  %v1314_v38 = vadd.s32 %v1310_v22, %v1306_v0 }
 0x130   : > { %v1501_v33 = vmul.f32 %v1500_v3, %v1498_v55  ;;  %v1317_v24 = vadd.s32 %v1316_v58, %v1307_v45  ;;  %v1318_v41 = vmul.u32 %v5515_v7, %v1264_v37  ;;  %v1553_v30 = vshrl.u32 %v9031_v57, %v5437_v8 }
 0x131   : > { %vm1320_vm1 = vc.u32 %v5605_v36, %v1314_v38  ;;  %v1542_v44 = vand.u32 8388607, %v1535_v63  ;;  %v1555_v5 = vshll.u32 %v9031_v57, %v5424_v26  ;;  %v1556_v9 = vshrl.u32 %v9034_v10, %v5437_v8 }
 0x132   : > { %v1203_v0 = vmul.f32 %v1202_v15, %v5571_v14  ;;  %v1502_v22 = vxor.u32 2147483648, %v1501_v33  ;;  %v1321_v51 = vadd.s32 1, %v1317_v24  ;;  %v1552_v7 = vshll.u32 %v9033_v1, %v5424_v26 }
 0x133   : > { %v1212_v11 = vmul.f32 %v1211_v54, %v5563_v2  ;;  %v5626_v21 = vor.u32 %v1556_v9, %v1555_v5  ;;  %v1558_v46 = vshll.u32 %v9034_v10, %v5424_v26  ;;  %v1559_v59 = vshrl.u32 %v9026_v34, %v5437_v8 }
 0x134   : > { %vm1217_vm2 = vcmp.eq.s32.totalorder %v5608_v18, 0  ;;  %v1503_v14 = vsel %vm1382_vm11, %v1502_v22, %v1501_v33  ;;  %v1322_v27 = vsel %vm1320_vm1, %v1321_v51, %v1317_v24  ;;  %v5635_v48 = vor.u32 %v1553_v30, %v1552_v7 }
 0x135   : > { %v5640_v2 = vsel %vm5583_vm6, %v5133_v47, %v1503_v14  ;;  %v1323_v40 = vadd.s32 %v1322_v27, %v1318_v41  ;;  %v1543_v43 = vor.u32 8388608, %v1542_v44  ;;  %v1560_v25 = vor.u32 %v1559_v59, %v1558_v46 }
 0x136   : > { %v1204_v26 = vadd.f32 1.0, %v1203_v0  ;;  %v1508_v50 = vmul.f32 %v5640_v2, %v5640_v2  ;;  %v1524_v31 = vadd.s32 3, %v1507_v23  ;;  %vm1567_vm3 = vcmp.lt.s32.totalorder %v5456_v4, 1 }
 0x137   : > { %vm1216_vm5 = vcmp.lt.s32.totalorder %v5608_v18, 2  ;;  %v1218_v60 = vxor.u32 2147483648, %v1212_v11  ;;  %v1324_v42 = vadd.s32 536870912, %v1323_v40  ;;  %vm1569_vm8 = vcmp.lt.s32.totalorder %v5456_v4, 3 }
 0x138   : > { %v1579_v20 = vsel %vm1567_vm3, %v5626_v21, %v1560_v25  ;;  %v1509_v35 = vmul.f32 -0.001358992, %v1508_v50  ;;  %v1516_v37 = vmul.f32 -0.00019511016, %v1508_v50  ;;  %v1575_v45 = vsel %vm1567_vm3, %v5635_v48, %v5626_v21 }
 0x139   : > { %v1577_v15 = vsel %vm1569_vm8, %v1560_v25, %v5541_v61  ;;  %v5657_v55 = vshrl.u32 %v1324_v42, 30  ;;  %vm1568_vm10 = vcmp.lt.s32.totalorder %v5456_v4, 2  ;;  %v1581_v3 = vsel %vm1569_vm8, %v5517_v17, %v5547_v56 }
 0x13a   : > { %v5664_v58 = vshll.u32 %v1543_v43, 8  ;;  %vm1213_vm9 = vweird.f32 %v5102_v62  ;;  %v1221_v54 = vxor.u32 2147483648, %v1204_v26  ;;  %v1510_v23 = vadd.f32 0.041655596, %v1509_v35 }
 0x13b   : > { %v1517_v33 = vadd.f32 0.008332121, %v1516_v37  ;;  %v1582_v24 = vsel %vm1568_vm10, %v1579_v20, %v1581_v3  ;;  %vm1220_vm11 = vcmp.eq.s32.totalorder %v5608_v18, 2  ;;  %v1525_v61 = vand.u32 3, %v1524_v31 }
 0x13c   : > { %v1326_v41 = vshll.u32 %v5657_v55, 30  ;;  %v1578_v30 = vsel %vm1568_vm10, %v1575_v45, %v1577_v15  ;;  %v1511_v44 = vmul.f32 %v1510_v23, %v1508_v50  ;;  %v1319_v56 = vadd.s32 %v1314_v38, %v5605_v36 }
 0x13d   : > { %v1518_v17 = vmul.f32 %v1517_v33, %v1508_v50  ;;  %v1587_v5 = vshrl.u32 %v1582_v24, 16  ;;  %v1219_v9 = vsel %vm1217_vm2, %v1204_v26, %v1218_v60  ;;  %v1584_v22 = vand.u32 65535, %v5664_v58 }
 0x13e   : > { %v5676_v0 = vsub.s32 %v1323_v40, %v1326_v41  ;;  %v1586_v51 = vand.u32 65535, %v1582_v24  ;;  %v1222_v7 = vsel %vm1220_vm11, %v1221_v54, %v1212_v11  ;;  %v1512_v46 = vadd.f32 -0.4999988, %v1511_v44 }
 0x13f   : > { %v1519_v59 = vadd.f32 -0.16666654, %v1518_v17  ;;  %v1608_v14 = vand.u32 65535, %v1578_v30  ;;  %vm1527_vm12 = vcmp.eq.s32.totalorder %v1525_v61, 0  ;;  %vm1530_vm6 = vcmp.eq.s32.totalorder %v1525_v61, 2 }
 0x140   : > { %vm1328_vm13 = vcmp.lt.s32.totalorder %v5676_v0, 0  ;;  %v1329_v27 = vsub.s32 0, %v5676_v0  ;;  %v1585_v36 = vshrl.u32 %v5664_v58, 16  ;;  %v1589_v38 = vmul.u32 %v1587_v5, %v1584_v22 }
 0x141   : > { %v1223_v40 = vsel %vm1216_vm5, %v1219_v9, %v1222_v7  ;;  %v1513_v43 = vmul.f32 %v1512_v46, %v1508_v50  ;;  %v1520_v26 = vmul.f32 %v1519_v59, %v1508_v50  ;;  %vm1526_vm14 = vcmp.lt.s32.totalorder %v1525_v61, 2 }
 0x142   : > { %v1551_v11 = vshrl.u32 %v9033_v1, %v5437_v8  ;;  %vm1523_vm1 = vweird.f32 %v5133_v47  ;;  %v1330_v31 = vsel %vm1328_vm13, %v1329_v27, %v5676_v0  ;;  %v5688_v60 = vmul.u32 %v1586_v51, %v1585_v36 }
 0x143   : > { %v1592_v42 = vshll.u32 %v1589_v38, 16  ;;  %v1609_v20 = vshrl.u32 %v1578_v30, 16  ;;  %v1514_v35 = vadd.f32 1.0, %v1513_v43  ;;  %v1521_v37 = vadd.f32 1.0, %v1520_v26 }
 0x144   : > { %v1331_v45 = vclz %v1330_v31  ;;  %v1588_v15 = vmul.u32 %v1586_v51, %v1584_v22  ;;  %v1224_v18 = vsel %vm1213_vm9, nan, %v1223_v40  ;;  %v1572_v50 = vsel %vm1570_vm7, %v1560_v25, 2102212464 }
 0x145   : > { %v1591_v3 = vmul.u32 %v1587_v5, %v1585_v36  ;;  %v1610_v8 = vmul.u32 %v1608_v14, %v1584_v22  ;;  %v1522_v54 = vmul.f32 %v1521_v37, %v5640_v2  ;;  %v1531_v23 = vxor.u32 2147483648, %v1514_v35 }
 0x146   : > { %v4544_v33 = vadd.s32 4294967294, %v1331_v45  ;;  %vm1596_vm2 = vc.u32 %v1588_v15, %v1592_v42  ;;  %v1594_v24 = vshll.u32 %v5688_v60, 16  ;;  %v1598_v30 = vadd.s32 %v1592_v42, %v1588_v15 }
 0x147   : > { %v1597_v41 = vsel %vm1596_vm2, 1, %v9035_v12  ;;  %v1611_v44 = vmul.u32 %v1609_v20, %v1584_v22  ;;  %v9044_v17 = vshll.u32 %v5020_v53, 16  ;;  %v1528_v25 = vxor.u32 2147483648, %v1522_v54 }
 0x148   : > { %vm4545_vm7 = vcmp.lt.s32.totalorder %v4544_v33, 0  ;;  %v1593_v5 = vshrl.u32 %v1589_v38, 16  ;;  %v1599_v2 = vadd.s32 %v1597_v41, %v1591_v3  ;;  %vm1600_vm9 = vc.u32 %v1598_v30, %v1594_v24 }
 0x149   : > { %vm5700_vm5 = vc.u32 %v5057_v19, %v9044_v17  ;;  %v1334_v9 = vsel %vm4545_vm7, 0, %v4544_v33  ;;  %v1612_v51 = vmul.u32 %v1608_v14, %v1585_v36  ;;  %v1614_v7 = vshll.u32 %v1611_v44, 16 }
 0x14a   : > { %v1529_v46 = vsel %vm1527_vm12, %v1514_v35, %v1528_v25  ;;  %v1532_v59 = vsel %vm1530_vm6, %v1531_v23, %v1522_v54  ;;  %v1335_v22 = vsub.s32 32, %v1334_v9  ;;  %v1339_v27 = vsub.s32 4294967266, %v1334_v9 }
 0x14b   : > { %v1533_v40 = vsel %vm1526_vm14, %v1529_v46, %v1532_v59  ;;  %v1336_v19 = vshll.u32 %v5676_v0, %v1334_v9  ;;  %v1601_v43 = vsel %vm1600_vm9, 1, %v9035_v12  ;;  %v1613_v26 = vmul.u32 %v1609_v20, %v1585_v36  ;;  %v9052_v46 = vld [vmem:[#allocation11_spill] sm:$0xff] }
 0x14c   : > { %v1534_v38 = vsel %vm1523_vm1, nan, %v1533_v40  ;;  %v1337_v31 = vshrl.u32 %v1319_v56, %v1335_v22  ;;  %v1340_v42 = vadd.s32 127, %v1339_v27  ;;  %v1603_v14 = vadd.s32 %v1601_v43, %v1599_v2  ;;  %v9054_v22 = vld [vmem:[#allocation16_spill] sm:$0xff] }
 0x14d   : > { %v1696_v37 = vpack.c.bf16 %v1534_v38, %v1224_v18  ;;  %v1616_v45 = vshll.u32 %v1612_v51, 16  ;;  %vm1618_vm11 = vc.u32 %v1610_v8, %v1614_v7  ;;  %v1620_v35 = vadd.s32 %v1614_v7, %v1610_v8 }
 0x14e   : > { %v1338_v15 = vor.u32 %v1337_v31, %v1336_v19  ;;  %v1341_v3 = vshll.u32 %v1340_v42, 23  ;;  %v1604_v54 = vadd.s32 %v1603_v14, %v1593_v5  ;;  %v1619_v61 = vsel %vm1618_vm11, 1, %v9035_v12  ;;  %v9055_v14 = vld [vmem:[#allocation17_spill] sm:$0xff] }
 0x14f   : > { %1745 = vmatpush.bf16.msra.mxu2 %v1696_v37  ;;  %v1571_v0 = vsel %vm1567_vm3, %v1551_v11, %v5635_v48  ;;  %v1573_v47 = vsel %vm1569_vm8, %v5626_v21, %v1572_v50  ;;  %v1621_v56 = vadd.s32 %v1619_v61, %v1613_v26  ;;  %vm1622_vm12 = vc.u32 %v1620_v35, %v1616_v45 }
 0x150   : > { %vm1227_vm6 = vcmp.lt.s32.totalorder %v5106_v6, 0  ;;  %v1342_v36 = vor.u32 4788187, %v1341_v3  ;;  %v1595_v20 = vshrl.u32 %v5688_v60, 16  ;;  %v1623_v18 = vsel %vm1622_vm12, 1, %v9035_v12 }
 0x151   : > { %vm948_vm13 = vcmp.lt.s32.totalorder %v5194_v39, 2  ;;  %v9047_v8 = vand.u32 2147483647, %v5106_v6  ;;  %v1615_v48 = vshrl.u32 %v1611_v44, 16  ;;  %v1625_v11 = vadd.s32 %v1623_v18, %v1621_v56 }
 0x152   : > { %v9050_v21 = vand.u32 65535, %v4989_v16  ;;  %v1343_v33 = vand.u32 2147483647, %v1342_v36  ;;  %v1345_v24 = vcvt.s32.f32 %v1338_v15  ;;  %v1574_v60 = vsel %vm1568_vm10, %v1571_v0, %v1573_v47 }
 0x153   : > { %vm5724_vm14 = vcmp.le.f32.partialorder %v9047_v8, 0.7853982  ;;  %v5733_v41 = vadd.s32 %v1604_v54, %v1595_v20  ;;  %v1617_v30 = vshrl.u32 %v1612_v51, 16  ;;  %v1626_v17 = vadd.s32 %v1625_v11, %v1615_v48  ;;  %v9058_v54 = vld [vmem:[#allocation37_spill] sm:$0xff]  ;;  %v9059_v8 = vld [vmem:[#allocation31_spill] sm:$0xff]  ;;  %v9060_v11 = vld [vmem:[#allocation42_spill] sm:$0xff] }
 0x154   : > { %v505_v50 = vmul.u32 %v9050_v21, %v4982_v13  ;;  %v512_v5 = vsel %vm5700_vm5, 1, %v9035_v12  ;;  %v1346_v44 = vmul.f32 %v1345_v24, %v1343_v33  ;;  %v5738_v2 = vadd.s32 %v1620_v35, %v1616_v45  ;;  %v9056_v45 = vld [vmem:[#allocation45_spill] sm:$0xff]  ;;  %v9057_v35 = vld [vmem:[#allocation44_spill] sm:$0xff]  ;;  %v9062_v24 = vld [vmem:[#allocation43_spill] sm:$0xff] }
 0x155   : > { %v514_v16 = vadd.s32 %v512_v5, %v5074_v28  ;;  %v9051_v9 = vand.u32 65535, %v5017_v49  ;;  %v1627_v4 = vadd.s32 %v1626_v17, %v1617_v30  ;;  %v529_v27 = vshll.u32 %v9054_v22, 16  ;;  %v9061_v21 = vld [vmem:[#allocation41_spill] sm:$0xff] }
 0x156   : > { %v509_v25 = vshll.u32 %v505_v50, 16  ;;  %v1347_v62 = vxor.u32 2147483648, %v1346_v44  ;;  %v1628_v40 = vmul.u32 %v5664_v58, %v1574_v60  ;;  %vm1630_vm8 = vc.u32 %v5733_v41, %v5738_v2  ;;  %v9063_v5 = vld [vmem:[#allocation33_spill] sm:$0xff] }
 0x157   : > { %v527_v7 = vmul.u32 %v9051_v9, %v4982_v13  ;;  %v9053_v51 = vmov %v9051_v9  ;;  %v1631_v19 = vadd.s32 1, %v1627_v4  ;;  %v508_v49 = vshrl.u32 %v5020_v53, 16 }
 0x158   : > { %vm515_vm3 = vc.u32 %v5079_v29, %v509_v25  ;;  %v525_v59 = vmul.u32 %v9053_v51, %v9052_v46  ;;  %v1348_v29 = vsel %vm1227_vm6, %v1347_v62, %v1346_v44  ;;  %v956_v58 = vsel %vm950_vm4, %v5245_v32, 920167782  ;;  %v9064_v44 = vld [vmem:[#allocation24_spill] sm:$0xff] }
 0x159   : > { %v516_v28 = vsel %vm515_vm3, 1, %v9035_v12  ;;  %v531_v26 = vshll.u32 %v527_v7, 16  ;;  %v5763_v31 = vsel %vm5724_vm14, %v5106_v6, %v1348_v29  ;;  %v1632_v42 = vsel %vm1630_vm8, %v1631_v19, %v1627_v4  ;;  %v9066_v4 = vld [vmem:[#allocation36_spill] sm:$0xff] }
 0x15a   : > { %v518_v43 = vadd.s32 %v516_v28, %v514_v16  ;;  %vm533_vm10 = vc.u32 %v525_v59, %v529_v27  ;;  %v535_v13 = vadd.s32 %v529_v27, %v525_v59  ;;  %v5770_v53 = vsel %vm948_vm13, %v9057_v35, %v9056_v45  ;;  %v9070_v45 = vld [vmem:[#allocation39_spill] sm:$0xff] }
 0x15b   : > { %v534_v38 = vsel %vm533_vm10, 1, %v9035_v12  ;;  %v1633_v15 = vadd.s32 %v1632_v42, %v1628_v40  ;;  %v817_v61 = vshll.u32 %v9058_v54, 16  ;;  %v1349_v32 = vsub.s32 4, %v5657_v55 }
 0x15c   : > { %v536_v37 = vadd.s32 %v534_v38, %v9055_v14  ;;  %v519_v3 = vadd.s32 %v518_v43, %v508_v49  ;;  %vm537_vm1 = vc.u32 %v535_v13, %v531_v26  ;;  %v5776_v0 = vmul.f32 %v5763_v31, %v5763_v31  ;;  %v9069_v43 = vld [vmem:[#allocation34_spill] sm:$0xff] }
 0x15d   : > { %v538_v47 = vsel %vm537_vm1, 1, %v9035_v12  ;;  %v1634_v56 = vadd.s32 536870912, %v1633_v15  ;;  %v510_v36 = vshrl.u32 %v505_v50, 16  ;;  %v530_v20 = vshrl.u32 %v9054_v22, 16 }
 0x15e   : > { %v540_v18 = vadd.s32 %v538_v47, %v536_v37  ;;  %v5782_v48 = vshrl.u32 %v9033_v1, %v9059_v8  ;;  %v955_v33 = vsel %vm947_vm15, %v9061_v21, %v9060_v11  ;;  %v957_v60 = vsel %vm949_vm0, %v9062_v24, %v956_v58  ;;  %v9071_v47 = vld [vmem:[#allocation8_spill] sm:$0xff] }
 0x15f   : > { %v967_v30 = vshrl.u32 %v5770_v53, 16  ;;  %v1635_v17 = vshrl.u32 %v1634_v56, 30  ;;  %v5792_v50 = vadd.s32 %v519_v3, %v510_v36  ;;  %v9065_v16 = vand.u32 65535, %v9064_v44  ;;  %v9072_v56 = vld [vmem:[#allocation13_spill] sm:$0xff] }
 0x160   : > { %v541_v25 = vadd.s32 %v540_v18, %v530_v20  ;;  %vm5800_vm2 = vc.u32 %v9066_v4, %v817_v61  ;;  %v1350_v51 = vsel %vm1227_vm6, %v1349_v32, %v5657_v55  ;;  %v1354_v59 = vmul.f32 -0.001358992, %v5776_v0  ;;  %v9074_v18 = vld [vmem:[#allocation38_spill] sm:$0xff] }
 0x161   : > { %v5797_v9 = vmul.u32 %v9065_v16, %v9063_v5  ;;  %v532_v22 = vshrl.u32 %v527_v7, 16  ;;  %v823_v27 = vadd.s32 %v817_v61, %v9066_v4  ;;  %v5811_v62 = vsel %vm948_vm13, %v955_v33, %v957_v60  ;;  %v9075_v33 = vld [vmem:[#allocation30_spill] sm:$0xff] }
 0x162   : > { %v1636_v40 = vshll.u32 %v1635_v17, 30  ;;  %v5813_v28 = vadd.s32 %v535_v13, %v531_v26  ;;  %v966_v19 = vand.u32 65535, %v5770_v53  ;;  %v5819_v29 = vmul.u32 %v967_v30, %v9069_v43  ;;  %v9076_v60 = vld [vmem:[#allocation26_spill] sm:$0xff] }
 0x163   : > { %v1361_v55 = vmul.f32 -0.00019511016, %v5776_v0  ;;  %v542_v49 = vadd.s32 %v541_v25, %v532_v22  ;;  %v1352_v7 = vsel %vm5724_vm14, 0, %v1350_v51  ;;  %v819_v13 = vshll.u32 %v5797_v9, 16 }
 0x164   : > { %v1637_v38 = vsub.s32 %v1633_v15, %v1636_v40  ;;  %vm545_vm5 = vc.u32 %v5792_v50, %v5813_v28  ;;  %v989_v26 = vshrl.u32 %v5811_v62, 16  ;;  %v1355_v58 = vadd.f32 0.041655596, %v1354_v59 }
 0x165   : > { %v546_v42 = vadd.s32 1, %v542_v49  ;;  %v822_v14 = vsel %vm5800_vm2, 1, %v9035_v12  ;;  %vm825_vm9 = vc.u32 %v823_v27, %v819_v13  ;;  %v839_v23 = vshll.u32 %v9070_v45, 16 }
 0x166   : > { %vm1638_vm7 = vcmp.lt.s32.totalorder %v1637_v38, 0  ;;  %v1639_v37 = vsub.s32 0, %v1637_v38  ;;  %v972_v35 = vshll.u32 %v5819_v29, 16  ;;  %v1362_v15 = vadd.f32 0.008332121, %v1361_v55 }
 0x167   : > { %v1369_v3 = vadd.s32 3, %v1352_v7  ;;  %v547_v61 = vsel %vm545_vm5, %v546_v42, %v542_v49  ;;  %v9073_v36 = vmul.u32 %v9071_v47, %v9072_v56  ;;  %v824_v8 = vadd.s32 %v822_v14, %v9074_v18  ;;  %v9081_v14 = vld [vmem:[#allocation21_spill] sm:$0xff] }
 0x168   : > { %v1640_v32 = vsel %vm1638_vm7, %v1639_v37, %v1637_v38  ;;  %v9077_v25 = vand.u32 65535, %v9076_v60  ;;  %vm1537_vm11 = vcmp.lt.s32.totalorder %v5223_v52, 0  ;;  %v1659_v4 = vsub.s32 4, %v1635_v17 }
 0x169   : > { %v548_v20 = vadd.s32 %v547_v61, %v9073_v36  ;;  %v1641_v16 = vclz %v1640_v32  ;;  %v826_v46 = vsel %vm825_vm9, 1, %v9035_v12  ;;  %v1356_v51 = vmul.f32 %v1355_v58, %v5776_v0 }
 0x16a   : > { %v835_v44 = vmul.u32 %v9077_v25, %v9075_v33  ;;  %v9078_v22 = vmov %v9077_v25  ;;  %v1363_v40 = vmul.f32 %v1362_v15, %v5776_v0  ;;  %v5847_v55 = vand.u32 3, %v1369_v3  ;;  %v9083_v15 = vld [vmem:[#allocation25_spill] sm:$0xff]  ;;  %v9086_v33 = vld [vmem:[#allocation40_spill] sm:$0xff] }
 0x16b   : > { %v549_v59 = vadd.s32 536870912, %v548_v20  ;;  %v837_v27 = vmul.u32 %v9078_v22, %v9063_v5  ;;  %vm5851_vm6 = vcmp.le.f32.partialorder %v1535_v63, 0.7853982  ;;  %v4550_v7 = vadd.s32 4294967294, %v1641_v16 }
 0x16c   : > { %vm843_vm12 = vc.u32 %v835_v44, %v839_v23  ;;  %v1629_v13 = vadd.s32 %v5738_v2, %v5733_v41  ;;  %v828_v42 = vadd.s32 %v826_v46, %v824_v8  ;;  %v9082_v37 = vshll.u32 %v9081_v14, 16 }
 0x16d   : > { %v5857_v58 = vshrl.u32 %v549_v59, 30  ;;  %v844_v5 = vsel %vm843_vm12, 1, %v9035_v12  ;;  %vm4551_vm3 = vcmp.lt.s32.totalorder %v4550_v7, 0  ;;  %v1660_v63 = vsel %vm1537_vm11, %v1659_v4, %v1635_v17 }
 0x16e   : > { %vm5863_vm14 = vc.u32 %v9083_v15, %v9082_v37  ;;  %v818_v61 = vshrl.u32 %v9058_v54, 16  ;;  %v845_v32 = vadd.s32 %v839_v23, %v835_v44  ;;  %v1357_v41 = vadd.f32 -0.4999988, %v1356_v51 }
 0x16f   : > { %v1644_v2 = vsel %vm4551_vm3, 0, %v4550_v7  ;;  %v551_v47 = vshll.u32 %v5857_v58, 30  ;;  %v841_v56 = vshll.u32 %v837_v27, 16  ;;  %v1364_v36 = vadd.f32 -0.16666654, %v1363_v40 }
 0x170   : > { %v1645_v18 = vsub.s32 32, %v1644_v2  ;;  %v1649_v8 = vsub.s32 4294967266, %v1644_v2  ;;  %v846_v60 = vadd.s32 %v844_v5, %v9086_v33  ;;  %v1662_v25 = vsel %vm5851_vm6, 0, %v1660_v63 }
 0x171   : > { %v552_v16 = vsub.s32 %v548_v20, %v551_v47  ;;  %v829_v46 = vadd.s32 %v828_v42, %v818_v61  ;;  %vm847_vm8 = vc.u32 %v845_v32, %v841_v56  ;;  %v1646_v17 = vshll.u32 %v1637_v38, %v1644_v2  ;;  %v9087_v47 = vld [vmem:[#allocation14_spill] sm:$0xff] }
 0x172   : > { %v1647_v4 = vshrl.u32 %v1629_v13, %v1645_v18  ;;  %v1650_v54 = vadd.s32 127, %v1649_v8  ;;  %v848_v23 = vsel %vm847_vm8, 1, %v9035_v12  ;;  %v1358_v44 = vmul.f32 %v1357_v41, %v5776_v0 }
 0x173   : > { %vm553_vm10 = vcmp.lt.s32.totalorder %v552_v16, 0  ;;  %v554_v51 = vsub.s32 0, %v552_v16  ;;  %v820_v59 = vshrl.u32 %v5797_v9, 16  ;;  %v840_v7 = vshrl.u32 %v9070_v45, 16  ;;  %v9088_v45 = vld [vmem:[#allocation19_spill] sm:$0xff] }
 0x174   : > { %v1648_v22 = vor.u32 %v1647_v4, %v1646_v17  ;;  %v1651_v40 = vshll.u32 %v1650_v54, 23  ;;  %v850_v5 = vadd.s32 %v848_v23, %v846_v60  ;;  %v1365_v20 = vmul.f32 %v1364_v36, %v5776_v0  ;;  %v9090_v17 = vld [vmem:[#allocation27_spill] sm:$0xff]  ;;  %v9091_v54 = vld [vmem:[#allocation32_spill] sm:$0xff]  ;;  %v9092_v23 = vld [vmem:[#allocation22_spill] sm:$0xff] }
 0x175   : > { %v1679_v42 = vadd.s32 3, %v1662_v25  ;;  %v555_v37 = vsel %vm553_vm10, %v554_v51, %v552_v16  ;;  %v5879_v38 = vadd.s32 %v829_v46, %v820_v59  ;;  %v842_v63 = vshrl.u32 %v837_v27, 16 }
 0x176   : > { %v1652_v13 = vor.u32 4788187, %v1651_v40  ;;  %v556_v15 = vclz %v555_v37  ;;  %v851_v61 = vadd.s32 %v850_v5, %v840_v7  ;;  %v5881_v41 = vadd.f32 1.0, %v1358_v44  ;;  %v9093_v40 = vld [vmem:[#allocation12_spill] sm:$0xff]  ;;  %v9094_v7 = vld [vmem:[#allocation15_spill] sm:$0xff] }
 0x177   : > { %v544_v9 = vadd.s32 %v5813_v28, %v5792_v50  ;;  %v5885_v2 = vadd.s32 %v845_v32, %v841_v56  ;;  %v9089_v18 = vand.u32 65535, %v9088_v45  ;;  %v1655_v36 = vcvt.s32.f32 %v1648_v22 }
 0x178   : > { %v1653_v0 = vand.u32 2147483647, %v1652_v13  ;;  %v4529_v33 = vadd.s32 4294967294, %v556_v15  ;;  %v852_v60 = vadd.s32 %v851_v61, %v842_v63  ;;  %v1366_v25 = vadd.f32 1.0, %v1365_v20 }
 0x179   : > { %v5890_v8 = vmul.u32 %v9089_v18, %v9087_v47  ;;  %v5892_v46 = vand.u32 3, %v1679_v42  ;;  %v667_v50 = vsel %vm5863_vm14, 1, %v9035_v12  ;;  %vm855_vm2 = vc.u32 %v5879_v38, %v5885_v2  ;;  %v9097_v18 = vld [vmem:[#allocation20_spill] sm:$0xff] }
 0x17a   : > { %v1656_v28 = vmul.f32 %v1655_v36, %v1653_v0  ;;  %vm4530_vm1 = vcmp.lt.s32.totalorder %v4529_v33, 0  ;;  %v856_v32 = vadd.s32 1, %v852_v60  ;;  %v669_v4 = vadd.s32 %v667_v50, %v9090_v17  ;;  %v9098_v0 = vld [vmem:[#allocation29_spill] sm:$0xff] }
 0x17b   : > { %v664_v27 = vshll.u32 %v5890_v8, 16  ;;  %v559_v56 = vsel %vm4530_vm1, 0, %v4529_v33  ;;  %v684_v44 = vshll.u32 %v9092_v23, 16  ;;  %v9095_v3 = vand.u32 65535, %v9094_v7  ;;  %v9104_v7 = vld [vmem:[#allocation23_spill] sm:$0xff] }
 0x17c   : > { %v1657_v51 = vxor.u32 2147483648, %v1656_v28  ;;  %v560_v59 = vsub.s32 32, %v559_v56  ;;  %v564_v22 = vsub.s32 4294967266, %v559_v56  ;;  %v561_v20 = vshll.u32 %v552_v16, %v559_v56 }
 0x17d   : > { %vm670_vm5 = vc.u32 %v9091_v54, %v664_v27  ;;  %v680_v5 = vmul.u32 %v9095_v3, %v9093_v40  ;;  %v857_v42 = vsel %vm855_vm2, %v856_v32, %v852_v60  ;;  %v9096_v13 = vmov %v9095_v3  ;;  %v9100_v32 = vld [vmem:[#allocation5_spill] sm:$0xff] }
 0x17e   : > { %v671_v37 = vsel %vm670_vm5, 1, %v9035_v12  ;;  %v682_v15 = vmul.u32 %v9096_v13, %v9087_v47  ;;  %v1658_v63 = vsel %vm1537_vm11, %v1657_v51, %v1656_v28  ;;  %v562_v61 = vshrl.u32 %v544_v9, %v560_v59 }
 0x17f   : > { %v565_v45 = vadd.s32 127, %v564_v22  ;;  %v9099_v36 = vmul.u32 %v9097_v18, %v9098_v0  ;;  %v5916_v27 = vmul.f32 %v1366_v25, %v5763_v31  ;;  %v5921_v16 = vsel %vm5851_vm6, %v5223_v52, %v1658_v63 }
 0x180   : > { %v673_v60 = vadd.s32 %v671_v37, %v669_v4  ;;  %vm688_vm7 = vc.u32 %v680_v5, %v684_v44  ;;  %v1663_v47 = vmul.f32 %v5921_v16, %v5921_v16  ;;  %v563_v50 = vor.u32 %v562_v61, %v561_v20 }
 0x181   : > { %v858_v33 = vadd.s32 %v857_v42, %v9099_v36  ;;  %v566_v9 = vshll.u32 %v565_v45, 23  ;;  %vm452_vm9 = vcmp.lt.s32.totalorder %v9100_v32, 0  ;;  %vm1372_vm11 = vcmp.eq.s32.totalorder %v5847_v55, 0 }
 0x182   : > { %v663_v31 = vshrl.u32 %v9081_v14, 16  ;;  %v686_v25 = vshll.u32 %v682_v15, 16  ;;  %v689_v56 = vsel %vm688_vm7, 1, %v9035_v12  ;;  %v690_v49 = vadd.s32 %v684_v44, %v680_v5 }
 0x183   : > { %v859_v28 = vadd.s32 536870912, %v858_v33  ;;  %v968_v17 = vmul.u32 %v966_v19, %v9069_v43  ;;  %v1664_v4 = vmul.f32 -0.001358992, %v1663_v47  ;;  %v1671_v54 = vmul.f32 -0.00019511016, %v1663_v47 }
 0x184   : > { %v9101_v51 = vand.u32 2147483647, %v9100_v32  ;;  %v567_v22 = vor.u32 4788187, %v566_v9  ;;  %v674_v14 = vadd.s32 %v673_v60, %v663_v31  ;;  %v691_v3 = vadd.s32 %v689_v56, %v9104_v7 }
 0x185   : > { %v5938_v40 = vshrl.u32 %v859_v28, 30  ;;  %vm692_vm6 = vc.u32 %v690_v49, %v686_v25  ;;  %vm1375_vm14 = vcmp.eq.s32.totalorder %v5847_v55, 2  ;;  %v1665_v44 = vadd.f32 0.041655596, %v1664_v4 }
 0x186   : > { %vm5934_vm12 = vcmp.le.f32.partialorder %v9101_v51, 0.7853982  ;;  %v1672_v5 = vadd.f32 0.008332121, %v1671_v54  ;;  %v568_v20 = vand.u32 2147483647, %v567_v22  ;;  %v570_v42 = vcvt.s32.f32 %v563_v50 }
 0x187   : > { %v1373_v37 = vxor.u32 2147483648, %v5916_v27  ;;  %v861_v13 = vshll.u32 %v5938_v40, 30  ;;  %v665_v63 = vshrl.u32 %v5890_v8, 16  ;;  %v693_v61 = vsel %vm692_vm6, 1, %v9035_v12 }
 0x188   : > { %v1666_v45 = vmul.f32 %v1665_v44, %v1663_v47  ;;  %v1673_v18 = vmul.f32 %v1672_v5, %v1663_v47  ;;  %v571_v0 = vmul.f32 %v570_v42, %v568_v20  ;;  %v695_v36 = vadd.s32 %v693_v61, %v691_v3 }
 0x189   : > { %v1376_v60 = vxor.u32 2147483648, %v5881_v41  ;;  %v5947_v9 = vsub.s32 %v858_v33, %v861_v13  ;;  %v5949_v28 = vadd.s32 %v674_v14, %v665_v63  ;;  %v685_v50 = vshrl.u32 %v9092_v23, 16 }
 0x18a   : > { %v1667_v31 = vadd.f32 -0.4999988, %v1666_v45  ;;  %v1674_v56 = vadd.f32 -0.16666654, %v1673_v18  ;;  %v572_v4 = vxor.u32 2147483648, %v571_v0  ;;  %v687_v54 = vshrl.u32 %v682_v15, 16 }
 0x18b   : > { %vm863_vm3 = vcmp.lt.s32.totalorder %v5947_v9, 0  ;;  %v864_v8 = vsub.s32 0, %v5947_v9  ;;  %v5954_v51 = vadd.s32 %v690_v49, %v686_v25  ;;  %v696_v22 = vadd.s32 %v695_v36, %v685_v50  ;;  %v9108_v18 = vld [vmem:[#allocation18_spill] sm:$0xff] }
 0x18c   : > { %v1374_v33 = vsel %vm1372_vm11, %v5881_v41, %v1373_v37  ;;  %v1668_v7 = vmul.f32 %v1667_v31, %v1663_v47  ;;  %v1675_v14 = vmul.f32 %v1674_v56, %v1663_v47  ;;  %v573_v23 = vsel %vm452_vm9, %v572_v4, %v571_v0  ;;  %v9110_v56 = vld [vmem:[#allocation35_spill] sm:$0xff] }
 0x18d   : > { %v5964_v15 = vsel %vm5934_vm12, %v9100_v32, %v573_v23  ;;  %v865_v3 = vsel %vm863_vm3, %v864_v8, %v5947_v9  ;;  %v697_v44 = vadd.s32 %v696_v22, %v687_v54  ;;  %vm700_vm8 = vc.u32 %v5949_v28, %v5954_v51 }
 0x18e   : > { %vm5971_vm10 = vc.u32 %v968_v17, %v972_v35  ;;  %v1669_v47 = vadd.f32 1.0, %v1668_v7  ;;  %v1676_v25 = vadd.f32 1.0, %v1675_v14  ;;  %v5977_v49 = vmul.f32 %v5964_v15, %v5964_v15 }
 0x18f   : > { %v866_v5 = vclz %v865_v3  ;;  %v978_v20 = vadd.s32 %v972_v35, %v968_v17  ;;  %vm1371_vm1 = vcmp.lt.s32.totalorder %v5847_v55, 2  ;;  %v1377_v42 = vsel %vm1375_vm14, %v1376_v60, %v5916_v27  ;;  %v9107_v17 = vld [vmem:[#allocation9_spill] sm:$0xff] }
 0x190   : > { %v701_v37 = vadd.s32 1, %v697_v44  ;;  %vm1368_vm2 = vweird.f32 %v5106_v6  ;;  %v1378_v13 = vsel %vm1371_vm1, %v1374_v33, %v1377_v42  ;;  %v1677_v63 = vmul.f32 %v1676_v25, %v5921_v16 }
 0x191   : > { %v1686_v61 = vxor.u32 2147483648, %v1669_v47  ;;  %vm1678_vm5 = vweird.f32 %v5223_v52  ;;  %vm1681_vm7 = vcmp.lt.s32.totalorder %v5892_v46, 2  ;;  %v4535_v45 = vadd.s32 4294967294, %v866_v5 }
 0x192   : > { %v702_v35 = vsel %vm700_vm8, %v701_v37, %v697_v44  ;;  %vm1682_vm11 = vcmp.eq.s32.totalorder %v5892_v46, 0  ;;  %v1683_v55 = vxor.u32 2147483648, %v1677_v63  ;;  %vm1685_vm6 = vcmp.eq.s32.totalorder %v5892_v46, 2 }
 0x193   : > { %v586_v6 = vmul.f32 -0.00019511016, %v5977_v49  ;;  %v1379_v27 = vsel %vm1368_vm2, nan, %v1378_v13  ;;  %v574_v16 = vsub.s32 4, %v5857_v58  ;;  %vm4536_vm14 = vcmp.lt.s32.totalorder %v4535_v45, 0 }
 0x194   : > { %v9109_v0 = vmul.u32 %v9107_v17, %v9108_v18  ;;  %v1684_v60 = vsel %vm1682_vm11, %v1669_v47, %v1683_v55  ;;  %v1687_v50 = vsel %vm1685_vm6, %v1686_v61, %v1677_v63  ;;  %v869_v31 = vsel %vm4536_vm14, 0, %v4535_v45 }
 0x195   : > { %v6002_v4 = vmul.u32 %v966_v19, %v9110_v56  ;;  %v1688_v54 = vsel %vm1681_vm7, %v1684_v60, %v1687_v50  ;;  %v854_v46 = vadd.s32 %v5885_v2, %v5879_v38  ;;  %v870_v8 = vsub.s32 32, %v869_v31  ;;  %v9111_v19 = vld [vmem:[#allocation7_spill] sm:$0xff] }
 0x196   : > { %v703_v36 = vadd.s32 %v702_v35, %v9109_v0  ;;  %v874_v22 = vsub.s32 4294967266, %v869_v31  ;;  %v1689_v33 = vsel %vm1678_vm5, nan, %v1688_v54  ;;  %v579_v7 = vmul.f32 -0.001358992, %v5977_v49 }
 0x197   : > { %v587_v14 = vadd.f32 0.008332121, %v586_v6  ;;  %v1697_v3 = vpack.c.bf16 %v1689_v33, %v1379_v27  ;;  %v871_v44 = vshll.u32 %v5947_v9, %v869_v31  ;;  %v872_v47 = vshrl.u32 %v854_v46, %v870_v8 }
 0x198   : > { %v704_v23 = vadd.s32 536870912, %v703_v36  ;;  %v875_v25 = vadd.s32 127, %v874_v22  ;;  %vm762_vm3 = vcmp.lt.s32.totalorder %v9111_v19, 0  ;;  %v952_v38 = vsel %vm950_vm4, %v9062_v24, 2102212464 }
 0x199   : > { %v988_v2 = vand.u32 65535, %v5811_v62  ;;  %v974_v52 = vshll.u32 %v6002_v4, 16  ;;  %1764 = vmatpush.bf16.msra.mxu3 %v1697_v3  ;;  %v575_v42 = vsel %vm452_vm9, %v574_v16, %v5857_v58  ;;  %v873_v9 = vor.u32 %v872_v47, %v871_v44 }
 0x19a   : > { %v6015_v5 = vshrl.u32 %v704_v23, 30  ;;  %v876_v37 = vshll.u32 %v875_v25, 23  ;;  %v977_v13 = vsel %vm5971_vm10, 1, %v9035_v12  ;;  %v971_v24 = vmul.u32 %v967_v30, %v9110_v56 }
 0x19b   : > { %v6030_v63 = vmul.u32 %v989_v26, %v9069_v43  ;;  %vm980_vm4 = vc.u32 %v978_v20, %v974_v52  ;;  %v6037_v58 = vsel %vm947_vm15, %v5782_v48, %v9061_v21  ;;  %v580_v41 = vadd.f32 0.041655596, %v579_v7 }
 0x19c   : > { %v706_v61 = vshll.u32 %v6015_v5, 30  ;;  %v588_v45 = vmul.f32 %v587_v14, %v5977_v49  ;;  %v877_v35 = vor.u32 4788187, %v876_v37  ;;  %v6043_v53 = vsel %vm949_vm0, %v9060_v11, %v952_v38 }
 0x19d   : > { %v577_v30 = vsel %vm5934_vm12, 0, %v575_v42  ;;  %v979_v20 = vadd.s32 %v977_v13, %v971_v24  ;;  %v880_v27 = vcvt.s32.f32 %v873_v9  ;;  %v884_v48 = vsub.s32 4, %v5938_v40 }
 0x19e   : > { %v6047_v55 = vsub.s32 %v703_v36, %v706_v61  ;;  %v878_v6 = vand.u32 2147483647, %v877_v35  ;;  %v981_v21 = vsel %vm980_vm4, 1, %v9035_v12  ;;  %v992_v17 = vmul.u32 %v988_v2, %v9110_v56 }
 0x19f   : > { %v994_v11 = vshll.u32 %v6030_v63, 16  ;;  %v993_v59 = vmul.u32 %v989_v26, %v9110_v56  ;;  %v581_v18 = vmul.f32 %v580_v41, %v5977_v49  ;;  %v589_v0 = vadd.f32 -0.16666654, %v588_v45 }
 0x1a0   : > { %vm708_vm15 = vcmp.lt.s32.totalorder %v6047_v55, 0  ;;  %v709_v16 = vsub.s32 0, %v6047_v55  ;;  %v881_v36 = vmul.f32 %v880_v27, %v878_v6  ;;  %v9112_v60 = vand.u32 2147483647, %v9111_v19 }
 0x1a1   : > { %v983_v54 = vadd.s32 %v981_v21, %v979_v20  ;;  %v990_v46 = vmul.u32 %v988_v2, %v9069_v43  ;;  %v594_v8 = vadd.s32 3, %v577_v30  ;;  %v885_v62 = vsel %vm762_vm3, %v884_v48, %v5938_v40 }
 0x1a2   : > { %vm6061_vm0 = vcmp.le.f32.partialorder %v9112_v60, 0.7853982  ;;  %v710_v31 = vsel %vm708_vm15, %v709_v16, %v6047_v55  ;;  %v882_v22 = vxor.u32 2147483648, %v881_v36  ;;  %v973_v56 = vshrl.u32 %v5819_v29, 16 }
 0x1a3   : > { %v711_v26 = vclz %v710_v31  ;;  %v996_v33 = vshll.u32 %v992_v17, 16  ;;  %vm998_vm9 = vc.u32 %v990_v46, %v994_v11  ;;  %v1000_v7 = vadd.s32 %v994_v11, %v990_v46  ;;  %v9115_v46 = vld [vmem:[#allocation28_spill] sm:$0xff] }
 0x1a4   : > { %v582_v14 = vadd.f32 -0.4999988, %v581_v18  ;;  %v590_v23 = vmul.f32 %v589_v0, %v5977_v49  ;;  %v883_v3 = vsel %vm762_vm3, %v882_v22, %v881_v36  ;;  %v984_v47 = vadd.s32 %v983_v54, %v973_v56 }
 0x1a5   : > { %v4532_v44 = vadd.s32 4294967294, %v711_v26  ;;  %v886_v43 = vsel %vm6061_vm0, %v9111_v19, %v883_v3  ;;  %v999_v40 = vsel %vm998_vm9, 1, %v9035_v12  ;;  %vm1002_vm12 = vc.u32 %v1000_v7, %v996_v33 }
 0x1a6   : > { %v888_v25 = vmul.f32 %v886_v43, %v886_v43  ;;  %v1001_v29 = vadd.s32 %v999_v40, %v993_v59  ;;  %v1003_v38 = vsel %vm1002_vm12, 1, %v9035_v12  ;;  %v887_v2 = vsel %vm6061_vm0, 0, %v885_v62 }
 0x1a7   : > { %vm4533_vm8 = vcmp.lt.s32.totalorder %v4532_v44, 0  ;;  %v699_v52 = vadd.s32 %v5954_v51, %v5949_v28  ;;  %v975_v9 = vshrl.u32 %v6002_v4, 16  ;;  %v591_v37 = vadd.f32 1.0, %v590_v23 }
 0x1a8   : > { %v714_v42 = vsel %vm4533_vm8, 0, %v4532_v44  ;;  %v889_v13 = vmul.f32 -0.001358992, %v888_v25  ;;  %v896_v24 = vmul.f32 -0.00019511016, %v888_v25  ;;  %v583_v41 = vmul.f32 %v582_v14, %v5977_v49 }
 0x1a9   : > { %v715_v61 = vsub.s32 32, %v714_v42  ;;  %v719_v45 = vsub.s32 4294967266, %v714_v42  ;;  %v995_v35 = vshrl.u32 %v6030_v63, 16  ;;  %v1005_v30 = vadd.s32 %v1003_v38, %v1001_v29 }
 0x1aa   : > { %v890_v20 = vadd.f32 0.041655596, %v889_v13  ;;  %v897_v6 = vadd.f32 0.008332121, %v896_v24  ;;  %v6086_v48 = vadd.s32 %v984_v47, %v975_v9  ;;  %v716_v28 = vshll.u32 %v6047_v55, %v714_v42  ;;  %v9116_v24 = vld [vmem:[#allocation6_spill] sm:$0xff] }
 0x1ab   : > { %v717_v27 = vshrl.u32 %v699_v52, %v715_v61  ;;  %v720_v51 = vadd.s32 127, %v719_v45  ;;  %v997_v21 = vshrl.u32 %v992_v17, 16  ;;  %v1006_v4 = vadd.s32 %v1005_v30, %v995_v35 }
 0x1ac   : > { %v592_v16 = vmul.f32 %v591_v37, %v5964_v15  ;;  %v891_v11 = vmul.f32 %v890_v20, %v888_v25  ;;  %v898_v59 = vmul.f32 %v897_v6, %v888_v25  ;;  %v6090_v18 = vadd.s32 %v1000_v7, %v996_v33 }
 0x1ad   : > { %v954_v49 = vsel %vm948_vm13, %v6037_v58, %v6043_v53  ;;  %v718_v63 = vor.u32 %v717_v27, %v716_v28  ;;  %v721_v0 = vshll.u32 %v720_v51, 23  ;;  %v1007_v36 = vadd.s32 %v1006_v4, %v997_v21 }
 0x1ae   : > { %v584_v60 = vadd.f32 1.0, %v583_v41  ;;  %v892_v50 = vadd.f32 -0.4999988, %v891_v11  ;;  %v899_v55 = vadd.f32 -0.16666654, %v898_v59  ;;  %vm1010_vm10 = vc.u32 %v6086_v48, %v6090_v18 }
 0x1af   : > { %v595_v17 = vand.u32 3, %v594_v8  ;;  %v904_v15 = vadd.s32 3, %v887_v2  ;;  %v722_v31 = vor.u32 4788187, %v721_v0  ;;  %v1011_v54 = vadd.s32 1, %v1007_v36 }
 0x1b0   : > { %v1008_v22 = vmul.u32 %v9115_v46, %v954_v49  ;;  %v598_v62 = vxor.u32 2147483648, %v592_v16  ;;  %v893_v26 = vmul.f32 %v892_v50, %v888_v25  ;;  %v900_v56 = vmul.f32 %v899_v55, %v888_v25 }
 0x1b1   : > { %v723_v39 = vand.u32 2147483647, %v722_v31  ;;  %v725_v58 = vcvt.s32.f32 %v718_v63  ;;  %v1012_v53 = vsel %vm1010_vm10, %v1011_v54, %v1007_v36  ;;  %v601_v33 = vxor.u32 2147483648, %v584_v60  ;;  %v6121_v54 = vld [vmem:[%s8767_s3] sm:$0xff] }
 0x1b2   : > { %v894_v7 = vadd.f32 1.0, %v893_v26  ;;  %v901_v14 = vadd.f32 1.0, %v900_v56  ;;  %v1013_v23 = vadd.s32 %v1012_v53, %v1008_v22  ;;  %vm597_vm13 = vcmp.eq.s32.totalorder %v595_v17, 0 }
 0x1b3   : > { %v905_v3 = vand.u32 3, %v904_v15  ;;  %v726_v44 = vmul.f32 %v725_v58, %v723_v39  ;;  %v599_v47 = vsel %vm597_vm13, %v584_v60, %v598_v62  ;;  %vm596_vm1 = vcmp.lt.s32.totalorder %v595_v17, 2  ;;  %v9120_v58 = vld [vmem:[#allocation10_spill] sm:$0xff] }
 0x1b4   : > { %v902_v8 = vmul.f32 %v901_v14, %v886_v43  ;;  %v911_v40 = vxor.u32 2147483648, %v894_v7  ;;  %v1014_v29 = vadd.s32 536870912, %v1013_v23  ;;  %vm600_vm2 = vcmp.eq.s32.totalorder %v595_v17, 2 }
 0x1b5   : > { %v602_v38 = vsel %vm600_vm2, %v601_v33, %v592_v16  ;;  %v727_v52 = vxor.u32 2147483648, %v726_v44  ;;  %vm907_vm5 = vcmp.eq.s32.totalorder %v905_v3, 0  ;;  %vm910_vm7 = vcmp.eq.s32.totalorder %v905_v3, 2 }
 0x1b6   : > { %v908_v2 = vxor.u32 2147483648, %v902_v8  ;;  %v6099_v25 = vshrl.u32 %v1014_v29, 30  ;;  %v603_v42 = vsel %vm596_vm1, %v599_v47, %v602_v38  ;;  %vm906_vm11 = vcmp.lt.s32.totalorder %v905_v3, 2 }
 0x1b7   : > { %v912_v37 = vsel %vm910_vm7, %v911_v40, %v902_v8  ;;  %vm607_vm6 = vcmp.lt.s32.totalorder %v9116_v24, 0  ;;  %vm593_vm14 = vweird.f32 %v9100_v32  ;;  %vm903_vm3 = vweird.f32 %v9111_v19 }
 0x1b8   : > { %v909_v9 = vsel %vm907_vm5, %v894_v7, %v908_v2  ;;  %v1016_v13 = vshll.u32 %v6099_v25, 30  ;;  %v604_v61 = vsel %vm593_vm14, nan, %v603_v42  ;;  %v728_v45 = vsel %vm607_vm6, %v727_v52, %v726_v44 }
 0x1b9   : > { %v913_v43 = vsel %vm906_vm11, %v909_v9, %v912_v37  ;;  %v9117_v20 = vand.u32 2147483647, %v9116_v24  ;;  %v1009_v11 = vadd.s32 %v6090_v18, %v6086_v48  ;;  %vm1732_vm9 = vcmask 261120  }
 0x1ba   : > { %v914_v41 = vsel %vm903_vm3, nan, %v913_v43  ;;  %v1017_v35 = vsub.s32 %v1013_v23, %v1016_v13  ;;  %v729_v26 = vsub.s32 4, %v6015_v5  ;;  %vm917_vm12 = vcmp.lt.s32.totalorder %v9120_v58, 0  ;;  %v4643_v13 = vld [vmem:[%s8767_s3 + $0x8] sm:$0xff] }
 0x1bb   : > { %v1694_v30 = vpack.c.bf16 %v914_v41, %v604_v61  ;;  %vm6109_vm4 = vcmp.le.f32.partialorder %v9117_v20, 0.7853982  ;;  %v9121_v33 = vand.u32 2147483647, %v9120_v58  ;;  %v1039_v3 = vsub.s32 4, %v6099_v25 }
 0x1bc   : > { %vm1018_vm15 = vcmp.lt.s32.totalorder %v1017_v35, 0  ;;  %v1019_v27 = vsub.s32 0, %v1017_v35  ;;  %v731_v32 = vsel %vm6109_vm4, %v9116_v24, %v728_v45  ;;  %v730_v23 = vsel %vm607_vm6, %v729_v26, %v6015_v5 }
 0x1bd   : > { %1746 = vmatpush.bf16.msra.mxu2 %v1694_v30  ;;  %v733_v51 = vmul.f32 %v731_v32, %v731_v32  ;;  %vm6129_vm8 = vcmp.le.f32.partialorder %v9121_v33, 0.7853982  ;;  %v732_v40 = vsel %vm6109_vm4, 0, %v730_v23  ;;  %v1040_v52 = vsel %vm917_vm12, %v1039_v3, %v6099_v25 }
 0x1be   : > { %v1020_v19 = vsel %vm1018_vm15, %v1019_v27, %v1017_v35  ;;  %v749_v5 = vadd.s32 3, %v732_v40  ;;  %v1042_v61 = vsel %vm6129_vm8, 0, %v1040_v52  ;;  %vm748_vm11 = vweird.f32 %v9116_v24  ;;  %v4593_v24 = vld [vmem:[%s8768_s4 + $0x28] sm:$0xff] }
 0x1bf   : > { %v1021_v28 = vclz %v1020_v19  ;;  %v741_v4 = vmul.f32 -0.00019511016, %v733_v51  ;;  %v734_v50 = vmul.f32 -0.001358992, %v733_v51  ;;  %v1059_v27 = vadd.s32 3, %v1042_v61 }
 0x1c0   : > { %4560 = vmatmul.msk.bf16.vlgmr.msra.gmra.mxu2 %vm1732_vm9, %v6121_v54  ;;  %v750_v6 = vand.u32 3, %v749_v5  ;;  %vm1058_vm6 = vweird.f32 %v9120_v58 }
 0x1c1   : > { %v4538_v21 = vadd.s32 4294967294, %v1021_v28  ;;  %v742_v0 = vadd.f32 0.008332121, %v741_v4  ;;  %v735_v46 = vadd.f32 0.041655596, %v734_v50 }
 0x1c2   : > { %vm752_vm10 = vcmp.eq.s32.totalorder %v750_v6, 0  ;;  %vm755_vm13 = vcmp.eq.s32.totalorder %v750_v6, 2  ;;  %vm751_vm1 = vcmp.lt.s32.totalorder %v750_v6, 2 }
 0x1c3   : > { %vm4539_vm0 = vcmp.lt.s32.totalorder %v4538_v21, 0  ;;  %v743_v15 = vmul.f32 %v742_v0, %v733_v51  ;;  %v736_v56 = vmul.f32 %v735_v46, %v733_v51 }
 0x1c4   : > { %v1024_v16 = vsel %vm4539_vm0, 0, %v4538_v21 }
 0x1c5   : > { %v1025_v59 = vsub.s32 32, %v1024_v16  ;;  %v1029_v49 = vsub.s32 4294967266, %v1024_v16  ;;  %v1026_v36 = vshll.u32 %v1017_v35, %v1024_v16  ;;  %v744_v18 = vadd.f32 -0.16666654, %v743_v15 }
 0x1c6   : > { %v737_v47 = vadd.f32 -0.4999988, %v736_v56  ;;  %v1060_v16 = vand.u32 3, %v1059_v27 }
 0x1c7   : > { %v1027_v63 = vshrl.u32 %v1009_v11, %v1025_v59  ;;  %v1030_v60 = vadd.s32 127, %v1029_v49  ;;  %v745_v53 = vmul.f32 %v744_v18, %v733_v51 }
 0x1c8   : > { %v738_v42 = vmul.f32 %v737_v47, %v733_v51  ;;  %v1700_v51 = vld [vmem:[%s8768_s4 + $0x10] sm:$0xff]  ;;  %vm1062_vm2 = vcmp.eq.s32.totalorder %v1060_v16, 0  ;;  %vm1065_vm5 = vcmp.eq.s32.totalorder %v1060_v16, 2  ;;  %vm1061_vm7 = vcmp.lt.s32.totalorder %v1060_v16, 2 }
 0x1c9   : > { %v1028_v55 = vor.u32 %v1027_v63, %v1026_v36  ;;  %v1031_v17 = vshll.u32 %v1030_v60, 23  ;;  %v746_v29 = vadd.f32 1.0, %v745_v53  ;;  %1714 = vperm.xlu2 %4711, %v1700_v51   ;;  %v1701_v36 = vld [vmem:[%s8768_s4 + $0x18] sm:$0xff] }
 0x1ca   : > { %v739_v35 = vadd.f32 1.0, %v738_v42 }
 0x1cb   : > { %v1032_v31 = vor.u32 4788187, %v1031_v17  ;;  %v1035_v48 = vcvt.s32.f32 %v1028_v55  ;;  %v747_v43 = vmul.f32 %v746_v29, %v731_v32 }
 0x1cc   : > { %v756_v32 = vxor.u32 2147483648, %v739_v35 }
 0x1cd   : > { %v1033_v22 = vand.u32 2147483647, %v1032_v31  ;;  %v753_v25 = vxor.u32 2147483648, %v747_v43 }
 0x1ce   : > { %v757_v63 = vsel %vm755_vm13, %v756_v32, %v747_v43 }
 0x1cf   : > { %v1036_v62 = vmul.f32 %v1035_v48, %v1033_v22  ;;  %v754_v11 = vsel %vm752_vm10, %v739_v35, %v753_v25  ;;  %v4594_v22 = vld [vmem:[%s8768_s4 + $0x30] sm:$0xff]  ;;  %v1705_v48 = vpop.permute.xlu0 %1704 }
 0x1d0   : > { %4561 = vmatmul.msk.bf16.gmra.mxu2 %vm1732_vm9, %v4643_v13  ;;  %v758_v60 = vsel %vm751_vm1, %v754_v11, %v757_v63 }
 0x1d1   : > { %v1037_v39 = vxor.u32 2147483648, %v1036_v62  ;;  %1719 = vperm.xlu2 %4711, %v1701_v36   ;;  %v759_v15 = vsel %vm748_vm11, nan, %v758_v60 }
 0x1d3   : > { %v1038_v14 = vsel %vm917_vm12, %v1037_v39, %v1036_v62 }
 0x1d4   : > { %v1041_v44 = vsel %vm6129_vm8, %v9120_v58, %v1038_v14  ;;  %v9125_v14 = vmov 1326507024  }
 0x1d5   : > { %v1043_v8 = vmul.f32 %v1041_v44, %v1041_v44 }
 0x1d7   : > { %v1044_v38 = vmul.f32 -0.001358992, %v1043_v8  ;;  %v1051_v2 = vmul.f32 -0.00019511016, %v1043_v8 }
 0x1d9   : > { %v1045_v9 = vadd.f32 0.041655596, %v1044_v38  ;;  %v1052_v37 = vadd.f32 0.008332121, %v1051_v2  ;;  %3043 = vperm.xlu2 %4711, %v4594_v22   ;;  %v6175_v38 = vpop.permute.xlu1 %1709 }
 0x1db   : > { %v1046_v41 = vmul.f32 %v1045_v9, %v1043_v8  ;;  %v1053_v45 = vmul.f32 %v1052_v37, %v1043_v8 }
 0x1dd   : > { %v1047_v30 = vadd.f32 -0.4999988, %v1046_v41  ;;  %v1054_v20 = vadd.f32 -0.16666654, %v1053_v45 }
 0x1df   : > { %v1048_v19 = vmul.f32 %v1047_v30, %v1043_v8  ;;  %v1055_v28 = vmul.f32 %v1054_v20, %v1043_v8 }
 0x1e1   : > { %v1049_v21 = vadd.f32 1.0, %v1048_v19  ;;  %v1056_v4 = vadd.f32 1.0, %v1055_v28  ;;  %3038 = vperm.xlu2 %4711, %v4593_v24  }
 0x1e3   : > { %v1057_v59 = vmul.f32 %v1056_v4, %v1041_v44  ;;  %v1066_v49 = vxor.u32 2147483648, %v1049_v21  ;;  %v9126_v44 = vmov 920167782  }
 0x1e5   : > { %v1063_v0 = vxor.u32 2147483648, %v1057_v59  ;;  %v1067_v55 = vsel %vm1065_vm5, %v1066_v49, %v1057_v59 }
 0x1e7   : > { %v1064_v50 = vsel %vm1062_vm2, %v1049_v21, %v1063_v0 }
 0x1e8   : > { %v1068_v17 = vsel %vm1061_vm7, %v1064_v50, %v1067_v55 }
 0x1e9   : > { %v1069_v31 = vsel %vm1058_vm6, nan, %v1068_v17 }
 0x1ea   : > { %v1695_v46 = vpack.c.bf16 %v1069_v31, %v759_v15 }
 0x1ec   : > { %1765 = vmatpush.bf16.msra.mxu3 %v1695_v46 }
 0x1ef   : > { %4562 = vmatmul.msk.bf16.vlgmr.msra.gmra.mxu3 %vm1732_vm9, %v6121_v54 }
 0x1ff   : > { %4563 = vmatmul.msk.bf16.gmra.mxu3 %vm1732_vm9, %v4643_v13 }
 0x243   : > { %v1748_v18 = vpop.f32.mrf.mxu2 }
 0x244   : > { %v6166_v62 = vadd.f32 %v1748_v18, %v1705_v48 }
 0x246   : > { %9124 = vst [vmem:[#allocation11_spill] sm:$0xff] %v6166_v62  ;;  %v1780_v26 = vand.u32 2139095040, %v6166_v62  ;;  %v8846_v7 = vand.u32 2147483647, %v6166_v62 }
 0x248   : > { %v1781_v56 = vshrl.u32 %v1780_v26, 23  ;;  %v1784_v2 = vand.u32 8388607, %v8846_v7 }
 0x24a   : > { %v4564_v39 = vadd.s32 4294967169, %v1781_v56  ;;  %v1785_v27 = vor.u32 8388608, %v1784_v2 }
 0x24b   : > { %v1750_v42 = vpop.f32.mrf.mxu2 }
 0x24c   : > { %v1787_v58 = vadd.s32 1, %v4564_v39  ;;  %v6183_v43 = vadd.f32 %v1750_v42, %v6175_v38  ;;  %v6194_v11 = vshll.u32 %v1785_v27, 8 }
 0x24e   : > { %vm1788_vm14 = vcmp.gt.s32.totalorder %v1787_v58, 0  ;;  %9127 = vst [vmem:[#allocation16_spill] sm:$0xff] %v6183_v43  ;;  %v2090_v30 = vand.u32 2139095040, %v6183_v43  ;;  %v6203_v55 = vand.u32 65535, %v6194_v11  ;;  %v8845_v26 = vand.u32 2147483647, %v6183_v43 }
 0x24f   : > { %v1789_v53 = vsel %vm1788_vm14, %v1787_v58, 0  ;;  %9129 = vst [vmem:[#allocation45_spill] sm:$0xff] %v6194_v11 }
 0x250   : > { %v1791_v54 = vand.u32 31, %v1789_v53  ;;  %v1790_v3 = vshrl.u32 %v1789_v53, 5  ;;  %v2091_v25 = vshrl.u32 %v2090_v30, 23  ;;  %9131 = vst [vmem:[#allocation37_spill] sm:$0xff] %v6203_v55 }
 0x252   : > { %v1792_v33 = vsub.s32 32, %v1791_v54  ;;  %v1806_v47 = vshll.u32 %v9126_v44, %v1791_v54  ;;  %v1797_v9 = vshll.u32 %v9031_v57, %v1791_v54  ;;  %v1800_v37 = vshll.u32 %v9034_v10, %v1791_v54 }
 0x253   : > { %v1803_v5 = vshll.u32 %v9026_v34, %v1791_v54  ;;  %vm1812_vm3 = vcmp.lt.s32.totalorder %v1790_v3, 4  ;;  %vm1809_vm4 = vcmp.lt.s32.totalorder %v1790_v3, 1  ;;  %vm1811_vm15 = vcmp.lt.s32.totalorder %v1790_v3, 3 }
 0x254   : > { %v1807_v23 = vshrl.u32 %v9125_v14, %v1792_v33  ;;  %v1798_v8 = vshrl.u32 %v9034_v10, %v1792_v33  ;;  %v1801_v40 = vshrl.u32 %v9026_v34, %v1792_v33  ;;  %v1804_v29 = vshrl.u32 %v9126_v44, %v1792_v33 }
 0x255   : > { %v1795_v19 = vshrl.u32 %v9031_v57, %v1792_v33  ;;  %v4570_v21 = vadd.s32 4294967169, %v2091_v25  ;;  %v1794_v4 = vshll.u32 %v9033_v1, %v1791_v54  ;;  %vm1810_vm0 = vcmp.lt.s32.totalorder %v1790_v3, 2 }
 0x256   : > { %v1808_v52 = vor.u32 %v1807_v23, %v1806_v47  ;;  %v1799_v41 = vor.u32 %v1798_v8, %v1797_v9  ;;  %v1802_v45 = vor.u32 %v1801_v40, %v1800_v37  ;;  %v1805_v35 = vor.u32 %v1804_v29, %v1803_v5 }
 0x257   : > { %v1796_v59 = vor.u32 %v1795_v19, %v1794_v4  ;;  %v2097_v60 = vadd.s32 1, %v4570_v21  ;;  %v1793_v50 = vshrl.u32 %v9033_v1, %v1792_v33  ;;  %v2094_v47 = vand.u32 8388607, %v8845_v26 }
 0x258   : > { %v1822_v20 = vsel %vm1812_vm3, %v1808_v52, 1326507024  ;;  %v1821_v51 = vsel %vm1809_vm4, %v1799_v41, %v1802_v45  ;;  %v1814_v0 = vsel %vm1812_vm3, %v1802_v45, 2102212464  ;;  %v1818_v36 = vsel %vm1812_vm3, %v1805_v35, 920167782 }
 0x259   : > { %v1823_v32 = vsel %vm1811_vm15, %v1805_v35, %v1822_v20  ;;  %v1813_v31 = vsel %vm1809_vm4, %v1793_v50, %v1796_v59  ;;  %v1815_v46 = vsel %vm1811_vm15, %v1799_v41, %v1814_v0  ;;  %v1817_v22 = vsel %vm1809_vm4, %v1796_v59, %v1799_v41 }
 0x25a   : > { %v6197_v49 = vsel %vm1810_vm0, %v1821_v51, %v1823_v32  ;;  %v1819_v24 = vsel %vm1811_vm15, %v1802_v45, %v1818_v36  ;;  %vm2098_vm8 = vcmp.gt.s32.totalorder %v2097_v60, 0  ;;  %v6219_v58 = vsel %vm1810_vm0, %v1813_v31, %v1815_v46 }
 0x25b   : > { %9130 = vst [vmem:[#allocation44_spill] sm:$0xff] %v6197_v49  ;;  %v1829_v17 = vshrl.u32 %v6197_v49, 16  ;;  %v6213_v56 = vsel %vm1810_vm0, %v1817_v22, %v1819_v24  ;;  %v2099_v53 = vsel %vm2098_vm8, %v2097_v60, 0  ;;  %v8849_v54 = vand.u32 65535, %v6197_v49 }
 0x25c   : > { %9132 = vst [vmem:[#allocation31_spill] sm:$0xff] %v6213_v56  ;;  %v1851_v8 = vshrl.u32 %v6213_v56, 16  ;;  %v2101_v29 = vand.u32 31, %v2099_v53  ;;  %v6231_v3 = vshrl.u32 %v6194_v11, 16  ;;  %v2095_v5 = vor.u32 8388608, %v2094_v47 }
 0x25d   : > { %v6216_v39 = vmul.u32 %v1829_v17, %v6203_v55  ;;  %9134 = vst [vmem:[#allocation41_spill] sm:$0xff] %v6219_v58  ;;  %v6238_v42 = vmul.u32 %v8849_v54, %v6203_v55  ;;  %v6273_v21 = vshrl.u32 %v2099_v53, 5 }
 0x25e   : > { %9135 = vst [vmem:[#allocation43_spill] sm:$0xff] %v6231_v3  ;;  %v6247_v45 = vmul.u32 %v1851_v8, %v6203_v55  ;;  %v6258_v20 = vmul.u32 %v1851_v8, %v6231_v3  ;;  %v6261_v27 = vsub.s32 32, %v2101_v29  ;;  %v6275_v4 = vshll.u32 %v2095_v5, 8  ;;  %v1753_v5 = vpop.f32.mrf.mxu2 }
 0x25f   : > { %9133 = vst [vmem:[#allocation42_spill] sm:$0xff] %v6216_v39  ;;  %v8850_v40 = vshll.u32 %v6216_v39, 16  ;;  %v2104_v50 = vshll.u32 %v9033_v1, %v2101_v29  ;;  %v2116_v53 = vshll.u32 %v9126_v44, %v2101_v29  ;;  %v2110_v47 = vshll.u32 %v9034_v10, %v2101_v29 }
 0x260   : > { %9136 = vst [vmem:[#allocation33_spill] sm:$0xff] %v6238_v42  ;;  %v2108_v24 = vshrl.u32 %v9034_v10, %v6261_v27  ;;  %v2114_v8 = vshrl.u32 %v9126_v44, %v6261_v27  ;;  %vm2122_vm5 = vcmp.lt.s32.totalorder %v6273_v21, 4  ;;  %vm2119_vm7 = vcmp.lt.s32.totalorder %v6273_v21, 1 }
 0x261   : > { %9138 = vst [vmem:[#allocation36_spill] sm:$0xff] %v6247_v45  ;;  %v6255_v30 = vadd.s32 %v8850_v40, %v6238_v42  ;;  %vm2121_vm11 = vcmp.lt.s32.totalorder %v6273_v21, 3  ;;  %vm2120_vm14 = vcmp.lt.s32.totalorder %v6273_v21, 2 }
 0x262   : > { %9141 = vst [vmem:[#allocation8_spill] sm:$0xff] %v6258_v20 }
 0x263   : > { %9140 = vst [vmem:[#allocation39_spill] sm:$0xff] %v6255_v30 }
 0x264   : > { %9143 = vst [vmem:[#allocation38_spill] sm:$0xff] %v6275_v4 }
 0x272   : > { %v1767_v13 = vpop.f32.mrf.mxu3 }
 0x273   : > { %v6185_v61 = vadd.f32 %v1767_v13, %v1705_v48  ;;  %v6243_v13 = vmul.u32 %v1829_v17, %v6231_v3  ;;  %v2117_v17 = vshrl.u32 %v9125_v14, %v6261_v27 }
 0x275   : > { %9128 = vst [vmem:[#allocation17_spill] sm:$0xff] %v6185_v61  ;;  %v1935_v6 = vand.u32 2139095040, %v6185_v61  ;;  %v8844_v48 = vand.u32 2147483647, %v6185_v61 }
 0x276   : > { %9137 = vst [vmem:[#allocation24_spill] sm:$0xff] %v6243_v13 }
 0x277   : > { %v1936_v28 = vshrl.u32 %v1935_v6, 23  ;;  %v1939_v33 = vand.u32 8388607, %v8844_v48 }
 0x279   : > { %v4567_v16 = vadd.s32 4294967169, %v1936_v28  ;;  %v1940_v9 = vor.u32 8388608, %v1939_v33  ;;  %v2107_v33 = vshll.u32 %v9031_v57, %v2101_v29 }
 0x27a   : > { %v1769_v2 = vpop.f32.mrf.mxu3 }
 0x27b   : > { %v1942_v63 = vadd.s32 1, %v4567_v16  ;;  %v6250_v35 = vadd.f32 %v1769_v2, %v6175_v38  ;;  %v6271_v32 = vshll.u32 %v1940_v9, 8  ;;  %v2105_v9 = vshrl.u32 %v9031_v57, %v6261_v27 }
 0x27d   : > { %vm1943_vm12 = vcmp.gt.s32.totalorder %v1942_v63, 0  ;;  %9139 = vst [vmem:[#allocation34_spill] sm:$0xff] %v6250_v35  ;;  %v2245_v0 = vand.u32 2139095040, %v6250_v35 }
 0x27e   : > { %v1944_v15 = vsel %vm1943_vm12, %v1942_v63, 0  ;;  %9142 = vst [vmem:[#allocation13_spill] sm:$0xff] %v6271_v32 }
 0x27f   : > { %v1946_v18 = vand.u32 31, %v1944_v15  ;;  %v6263_v25 = vshrl.u32 %v1944_v15, 5 }
 0x281   : > { %v6224_v23 = vsub.s32 32, %v1946_v18  ;;  %v1961_v6 = vshll.u32 %v9126_v44, %v1946_v18  ;;  %v1952_v16 = vshll.u32 %v9031_v57, %v1946_v18  ;;  %v1955_v59 = vshll.u32 %v9034_v10, %v1946_v18 }
 0x282   : > { %v1958_v63 = vshll.u32 %v9026_v34, %v1946_v18  ;;  %v1949_v36 = vshll.u32 %v9033_v1, %v1946_v18  ;;  %vm1967_vm10 = vcmp.lt.s32.totalorder %v6263_v25, 4  ;;  %v2111_v18 = vshrl.u32 %v9026_v34, %v6261_v27 }
 0x283   : > { %v1962_v37 = vshrl.u32 %v9125_v14, %v6224_v23  ;;  %v1953_v19 = vshrl.u32 %v9034_v10, %v6224_v23  ;;  %v1956_v38 = vshrl.u32 %v9026_v34, %v6224_v23  ;;  %v1959_v28 = vshrl.u32 %v9126_v44, %v6224_v23 }
 0x284   : > { %v1950_v60 = vshrl.u32 %v9031_v57, %v6224_v23  ;;  %vm1964_vm13 = vcmp.lt.s32.totalorder %v6263_v25, 1  ;;  %vm1966_vm1 = vcmp.lt.s32.totalorder %v6263_v25, 3  ;;  %vm1965_vm2 = vcmp.lt.s32.totalorder %v6263_v25, 2 }
 0x285   : > { %v1963_v51 = vor.u32 %v1962_v37, %v1961_v6  ;;  %v1954_v15 = vor.u32 %v1953_v19, %v1952_v16  ;;  %v1957_v31 = vor.u32 %v1956_v38, %v1955_v59  ;;  %v1960_v46 = vor.u32 %v1959_v28, %v1958_v63 }
 0x286   : > { %v1951_v2 = vor.u32 %v1950_v60, %v1949_v36  ;;  %v2118_v37 = vor.u32 %v2117_v17, %v2116_v53  ;;  %v2113_v38 = vshll.u32 %v9026_v34, %v2101_v29  ;;  %v2246_v28 = vshrl.u32 %v2245_v0, 23 }
 0x287   : > { %v1977_v22 = vsel %vm1967_vm10, %v1963_v51, 1326507024  ;;  %v1976_v6 = vsel %vm1964_vm13, %v1954_v15, %v1957_v31  ;;  %v1715_v51 = vpop.permute.xlu2 %1714  ;;  %v1973_v16 = vsel %vm1967_vm10, %v1960_v46, 920167782  ;;  %v2109_v59 = vor.u32 %v2108_v24, %v2107_v33 }
 0x288   : > { %v1978_v19 = vsel %vm1966_vm1, %v1960_v46, %v1977_v22  ;;  %v2112_v63 = vor.u32 %v2111_v18, %v2110_v47  ;;  %v2115_v36 = vor.u32 %v2114_v8, %v2113_v38  ;;  %v4573_v60 = vadd.s32 4294967169, %v2246_v28 }
 0x289   : > { %v6312_v17 = vadd.f32 %v1753_v5, %v1715_v51  ;;  %v1948_v22 = vshrl.u32 %v9033_v1, %v6224_v23  ;;  %v6318_v29 = vsel %vm1965_vm2, %v1976_v6, %v1978_v19  ;;  %v2132_v0 = vsel %vm2122_vm5, %v2118_v37, 1326507024 }
 0x28a   : > { %9144 = vst [vmem:[#allocation30_spill] sm:$0xff] %v6318_v29  ;;  %v8843_v46 = vand.u32 2147483647, %v6250_v35  ;;  %v1969_v24 = vsel %vm1967_vm10, %v1957_v31, 2102212464  ;;  %v1972_v18 = vsel %vm1964_vm13, %v1951_v2, %v1954_v15  ;;  %v2106_v53 = vor.u32 %v2105_v9, %v2104_v50 }
 0x28b   : > { %v2252_v33 = vadd.s32 1, %v4573_v60  ;;  %v1974_v23 = vsel %vm1966_vm1, %v1957_v31, %v1973_v16  ;;  %v2400_v47 = vand.u32 2139095040, %v6312_v17  ;;  %v1984_v8 = vshrl.u32 %v6318_v29, 16 }
 0x28c   : > { %v2128_v37 = vsel %vm2122_vm5, %v2115_v36, 920167782  ;;  %v2131_v5 = vsel %vm2119_vm7, %v2109_v59, %v2112_v63  ;;  %v2133_v50 = vsel %vm2121_vm11, %v2115_v36, %v2132_v0  ;;  %v6340_v9 = vand.u32 65535, %v6271_v32 }
 0x28d   : > { %v6343_v31 = vand.u32 65535, %v6275_v4  ;;  %vm2253_vm6 = vcmp.gt.s32.totalorder %v2252_v33, 0  ;;  %v2401_v6 = vshrl.u32 %v2400_v47, 23  ;;  %v1968_v19 = vsel %vm1964_vm13, %v1948_v22, %v1951_v2 }
 0x28e   : > { %9145 = vst [vmem:[#allocation26_spill] sm:$0xff] %v6340_v9  ;;  %v1970_v38 = vsel %vm1966_vm1, %v1954_v15, %v1969_v24  ;;  %v6351_v28 = vsel %vm1965_vm2, %v1972_v18, %v1974_v23  ;;  %v2127_v16 = vsel %vm2119_vm7, %v2106_v53, %v2109_v59  ;;  %v2129_v36 = vsel %vm2121_vm11, %v2112_v63, %v2128_v37 }
 0x28f   : > { %9146 = vst [vmem:[#allocation21_spill] sm:$0xff] %v6343_v31  ;;  %v6360_v60 = vsel %vm2120_vm14, %v2131_v5, %v2133_v50  ;;  %v2249_v2 = vand.u32 8388607, %v8843_v46  ;;  %v6365_v15 = vmul.u32 %v1984_v8, %v6340_v9  ;;  %v2124_v22 = vsel %vm2122_vm5, %v2112_v63, 2102212464  ;;  %v1772_v5 = vpop.f32.mrf.mxu3 }
 0x290   : > { %9147 = vst [vmem:[#allocation25_spill] sm:$0xff] %v6351_v28  ;;  %v6370_v0 = vshrl.u32 %v6275_v4, 16  ;;  %v2254_v24 = vsel %vm2253_vm6, %v2252_v33, 0  ;;  %v6374_v18 = vsel %vm1965_vm2, %v1968_v19, %v1970_v38  ;;  %v8847_v23 = vand.u32 65535, %v6318_v29 }
 0x291   : > { %9148 = vst [vmem:[#allocation40_spill] sm:$0xff] %v6360_v60  ;;  %v2103_v47 = vshrl.u32 %v9033_v1, %v6261_v27  ;;  %v4576_v37 = vadd.s32 4294967169, %v2401_v6  ;;  %v6380_v50 = vshrl.u32 %v6271_v32, 16  ;;  %v2006_v63 = vshrl.u32 %v6351_v28, 16 }
 0x292   : > { %9149 = vst [vmem:[#allocation14_spill] sm:$0xff] %v6365_v15  ;;  %v6385_v46 = vsel %vm2120_vm14, %v2127_v16, %v2129_v36  ;;  %v2139_v25 = vshrl.u32 %v6360_v60, 16  ;;  %v2125_v19 = vsel %vm2121_vm11, %v2109_v59, %v2124_v22  ;;  %v2250_v27 = vor.u32 8388608, %v2249_v2 }
 0x293   : > { %9150 = vst [vmem:[#allocation19_spill] sm:$0xff] %v6370_v0  ;;  %v2123_v33 = vsel %vm2119_vm7, %v2103_v47, %v2106_v53  ;;  %v2256_v6 = vand.u32 31, %v2254_v24  ;;  %v8848_v38 = vshll.u32 %v6365_v15, 16  ;;  %v6396_v7 = vadd.f32 %v1772_v5, %v1715_v51 }
 0x294   : > { %9151 = vst [vmem:[#allocation27_spill] sm:$0xff] %v6374_v18  ;;  %v6401_v16 = vmul.u32 %v8847_v23, %v6340_v9  ;;  %v6404_v53 = vmul.u32 %v1984_v8, %v6380_v50  ;;  %v2161_v59 = vshrl.u32 %v6385_v46, 16  ;;  %v2407_v36 = vadd.s32 1, %v4576_v37 }
 0x295   : > { %9152 = vst [vmem:[#allocation32_spill] sm:$0xff] %v6380_v50  ;;  %v6408_v2 = vmul.u32 %v2006_v63, %v6340_v9  ;;  %v6412_v22 = vsel %vm2120_vm14, %v2123_v33, %v2125_v19  ;;  %v8851_v51 = vand.u32 65535, %v6360_v60  ;;  %v6416_v47 = vmul.u32 %v2139_v25, %v6343_v31 }
 0x296   : > { %9153 = vst [vmem:[#allocation22_spill] sm:$0xff] %v6385_v46  ;;  %v6419_v5 = vmul.u32 %v2006_v63, %v6380_v50  ;;  %v2257_v8 = vsub.s32 32, %v2256_v6  ;;  %v6421_v26 = vshll.u32 %v2250_v27, 8  ;;  %vm2408_vm3 = vcmp.gt.s32.totalorder %v2407_v36, 0 }
 0x297   : > { %9154 = vst [vmem:[#allocation12_spill] sm:$0xff] %v6396_v7  ;;  %v6426_v37 = vadd.s32 %v8848_v38, %v6401_v16  ;;  %v8860_v21 = vand.u32 2147483647, %v6312_v17  ;;  %v2409_v33 = vsel %vm2408_vm3, %v2407_v36, 0  ;;  %v8863_v19 = vand.u32 2147483647, %v6396_v7 }
 0x298   : > { %9155 = vst [vmem:[#allocation15_spill] sm:$0xff] %v6401_v16  ;;  %v6432_v23 = vmul.u32 %v2161_v59, %v6343_v31  ;;  %v6435_v63 = vmul.u32 %v2161_v59, %v6370_v0  ;;  %v6442_v52 = vmul.u32 %v8851_v51, %v6343_v31  ;;  %v6445_v36 = vmul.u32 %v2139_v25, %v6370_v0 }
 0x299   : > { %9156 = vst [vmem:[#allocation20_spill] sm:$0xff] %v6404_v53  ;;  %v6448_v48 = vshrl.u32 %v2254_v24, 5  ;;  %v2269_v41 = vshrl.u32 %v9126_v44, %v2257_v8  ;;  %v2272_v59 = vshrl.u32 %v9125_v14, %v2257_v8  ;;  %v6453_v54 = vand.u32 65535, %v6421_v26 }
 0x29a   : > { %9157 = vst [vmem:[#allocation29_spill] sm:$0xff] %v6408_v2  ;;  %v2411_v27 = vand.u32 31, %v2409_v33  ;;  %v2259_v40 = vshll.u32 %v9033_v1, %v2256_v6  ;;  %v6458_v51 = vand.u32 8388607, %v8860_v21  ;;  %v2555_v25 = vand.u32 2139095040, %v6396_v7 }
 0x29b   : > { %9158 = vst [vmem:[#allocation5_spill] sm:$0xff] %v6412_v22  ;;  %v6463_v24 = vand.u32 8388607, %v8863_v19  ;;  %v2262_v38 = vshll.u32 %v9031_v57, %v2256_v6  ;;  %v2268_v35 = vshll.u32 %v9026_v34, %v2256_v6  ;;  %v2271_v61 = vshll.u32 %v9126_v44, %v2256_v6 }
 0x29c   : > { %9159 = vst [vmem:[#allocation23_spill] sm:$0xff] %v6416_v47  ;;  %v2412_v43 = vsub.s32 32, %v2411_v27  ;;  %v2260_v18 = vshrl.u32 %v9031_v57, %v2257_v8  ;;  %v2263_v32 = vshrl.u32 %v9034_v10, %v2257_v8  ;;  %v2265_v21 = vshll.u32 %v9034_v10, %v2256_v6 }
 0x29d   : > { %9160 = vst [vmem:[#allocation9_spill] sm:$0xff] %v6419_v5  ;;  %vm2274_vm4 = vcmp.lt.s32.totalorder %v6448_v48, 1  ;;  %v2258_v62 = vshrl.u32 %v9033_v1, %v2257_v8  ;;  %v2266_v19 = vshrl.u32 %v9026_v34, %v2257_v8  ;;  %v2270_v5 = vor.u32 %v2269_v41, %v2268_v35 }
 0x29e   : > { %9161 = vst [vmem:[#allocation18_spill] sm:$0xff] %v6421_v26  ;;  %v2273_v28 = vor.u32 %v2272_v59, %v2271_v61  ;;  %v2421_v9 = vshrl.u32 %v9026_v34, %v2412_v43  ;;  %v2426_v2 = vshll.u32 %v9126_v44, %v2411_v27  ;;  %v2427_v53 = vshrl.u32 %v9125_v14, %v2412_v43 }
 0x29f   : > { %9162 = vst [vmem:[#allocation35_spill] sm:$0xff] %v6426_v37  ;;  %v2556_v22 = vshrl.u32 %v2555_v25, 23  ;;  %vm2275_vm15 = vcmp.lt.s32.totalorder %v6448_v48, 2  ;;  %vm2277_vm0 = vcmp.lt.s32.totalorder %v6448_v48, 4  ;;  %v2410_v6 = vshrl.u32 %v2409_v33, 5 }
 0x2a0   : > { %9163 = vst [vmem:[#allocation7_spill] sm:$0xff] %v6432_v23  ;;  %v2418_v4 = vshrl.u32 %v9034_v10, %v2412_v43  ;;  %v2424_v37 = vshrl.u32 %v9126_v44, %v2412_v43  ;;  %v2261_v29 = vor.u32 %v2260_v18, %v2259_v40  ;;  %v6481_v8 = vor.u32 %v2263_v32, %v2262_v38 }
 0x2a1   : > { %9164 = vst [vmem:[#allocation28_spill] sm:$0xff] %v6435_v63  ;;  %v2420_v61 = vshll.u32 %v9034_v10, %v2411_v27  ;;  %v2428_v41 = vor.u32 %v2427_v53, %v2426_v2  ;;  %v6484_v35 = vor.u32 %v2266_v19, %v2265_v21  ;;  %v2415_v59 = vshrl.u32 %v9031_v57, %v2412_v43 }
 0x2a2   : > { %9165 = vst [vmem:[#allocation6_spill] sm:$0xff] %v6442_v52  ;;  %v2417_v25 = vshll.u32 %v9031_v57, %v2411_v27  ;;  %v2423_v50 = vshll.u32 %v9026_v34, %v2411_v27  ;;  %v2283_v33 = vsel %vm2277_vm0, %v2270_v5, 920167782  ;;  %v2287_v63 = vsel %vm2277_vm0, %v2273_v28, 1326507024 }
 0x2a3   : > { %9166 = vst [vmem:[#allocation10_spill] sm:$0xff] %v6445_v36  ;;  %v2422_v40 = vor.u32 %v2421_v9, %v2420_v61  ;;  %v4579_v32 = vadd.s32 4294967169, %v2556_v22  ;;  %v2414_v18 = vshll.u32 %v9033_v1, %v2411_v27  ;;  %vm2432_vm12 = vcmp.lt.s32.totalorder %v2410_v6, 4  ;;  %v1755_v22 = vpop.f32.mrf.mxu2  ;;  %v1720_v27 = vpop.permute.xlu2 %1719 }
 0x2a4   : > { %9167 = vst [vmem:[#allocation46_spill] sm:$0xff] %v6448_v48  ;;  %v2419_v38 = vor.u32 %v2418_v4, %v2417_v25  ;;  %v2425_v53 = vor.u32 %v2424_v37, %v2423_v50  ;;  %vm2276_vm8 = vcmp.lt.s32.totalorder %v6448_v48, 3  ;;  %v2282_v2 = vsel %vm2274_vm4, %v2261_v29, %v6481_v8 }
 0x2a5   : > { %9168 = vst [vmem:[#allocation47_spill] sm:$0xff] %v6481_v8  ;;  %v2405_v21 = vor.u32 8388608, %v6458_v51  ;;  %v2442_v19 = vsel %vm2432_vm12, %v2428_v41, 1326507024  ;;  %v2284_v9 = vsel %vm2276_vm8, %v6484_v35, %v2283_v33  ;;  %v2286_v4 = vsel %vm2274_vm4, %v6481_v8, %v6484_v35 }
 0x2a6   : > { %9169 = vst [vmem:[#allocation48_spill] sm:$0xff] %v6484_v35  ;;  %v2288_v28 = vsel %vm2276_vm8, %v2270_v5, %v2287_v63  ;;  %v2416_v50 = vor.u32 %v2415_v59, %v2414_v18  ;;  %vm2429_vm10 = vcmp.lt.s32.totalorder %v2410_v6, 1  ;;  %vm2431_vm13 = vcmp.lt.s32.totalorder %v2410_v6, 3 }
 0x2a7   : > { %v2434_v51 = vsel %vm2432_vm12, %v2422_v40, 2102212464  ;;  %v2562_v37 = vadd.s32 1, %v4579_v32  ;;  %v2413_v61 = vshrl.u32 %v9033_v1, %v2412_v43  ;;  %v2438_v41 = vsel %vm2432_vm12, %v2425_v53, 920167782 }
 0x2a8   : > { %v2441_v25 = vsel %vm2429_vm10, %v2419_v38, %v2422_v40  ;;  %v2443_v33 = vsel %vm2431_vm13, %v2425_v53, %v2442_v19  ;;  %v6516_v8 = vsel %vm2275_vm15, %v2286_v4, %v2288_v28  ;;  %vm2430_vm1 = vcmp.lt.s32.totalorder %v2410_v6, 2 }
 0x2a9   : > { %vm2563_vm2 = vcmp.gt.s32.totalorder %v2562_v37, 0  ;;  %v6518_v5 = vadd.f32 %v1755_v22, %v1720_v27  ;;  %v2433_v63 = vsel %vm2429_vm10, %v2413_v61, %v2416_v50  ;;  %v2435_v59 = vsel %vm2431_vm13, %v2419_v38, %v2434_v51  ;;  %v1774_v61 = vpop.f32.mrf.mxu3 }
 0x2aa   : > { %v6522_v32 = vshll.u32 %v2405_v21, 8  ;;  %v2564_v43 = vsel %vm2563_vm2, %v2562_v37, 0  ;;  %v2437_v18 = vsel %vm2429_vm10, %v2416_v50, %v2419_v38  ;;  %v2439_v35 = vsel %vm2431_vm13, %v2422_v40, %v2438_v41 }
 0x2ab   : > { %v6527_v53 = vsel %vm2430_vm1, %v2441_v25, %v2443_v33  ;;  %v2566_v19 = vand.u32 31, %v2564_v43  ;;  %v9170_v4 = vshll.u32 %v6416_v47, 16  ;;  %v6536_v22 = vsel %vm2274_vm4, %v2258_v62, %v2261_v29 }
 0x2ac   : > { %9172 = vst [vmem:[#allocation50_spill] sm:$0xff] %v6536_v22  ;;  %v6540_v21 = vsel %vm2275_vm15, %v2282_v2, %v2284_v9  ;;  %v6543_v38 = vshrl.u32 %v6421_v26, 16  ;;  %v6546_v40 = vsel %vm2430_vm1, %v2433_v63, %v2435_v59  ;;  %v2560_v50 = vor.u32 8388608, %v6463_v24 }
 0x2ad   : > { %v6532_v28 = vadd.s32 %v9170_v4, %v6442_v52  ;;  %9173 = vst [vmem:[#allocation51_spill] sm:$0xff] %v6540_v21  ;;  %v2567_v51 = vsub.s32 32, %v2566_v19  ;;  %v2710_v37 = vand.u32 2139095040, %v6518_v5  ;;  %v6552_v62 = vsel %vm2430_vm1, %v2437_v18, %v2439_v35 }
 0x2ae   : > { %9174 = vst [vmem:[#allocation52_spill] sm:$0xff] %v6543_v38  ;;  %v8876_v29 = vand.u32 65535, %v6527_v53  ;;  %v2449_v2 = vshrl.u32 %v6527_v53, 16  ;;  %v6560_v24 = vand.u32 65535, %v6522_v32  ;;  %v6563_v63 = vshrl.u32 %v6522_v32, 16 }
 0x2af   : > { %9171 = vst [vmem:[#allocation49_spill] sm:$0xff] %v6532_v28  ;;  %v2582_v35 = vshrl.u32 %v9125_v14, %v2567_v51  ;;  %v6568_v59 = vadd.f32 %v1774_v61, %v1720_v27  ;;  %v2471_v4 = vshrl.u32 %v6552_v62, 16  ;;  %v6572_v25 = vshll.u32 %v2560_v50, 8 }
 0x2b0   : > { %v2711_v33 = vshrl.u32 %v2710_v37, 23  ;;  %v6577_v41 = vmul.u32 %v8876_v29, %v6560_v24  ;;  %v6580_v9 = vmul.u32 %v2449_v2, %v6560_v24  ;;  %v6583_v6 = vmul.u32 %v2449_v2, %v6563_v63 }
 0x2b1   : > { %9175 = vst [vmem:[#allocation53_spill] sm:$0xff] %v6568_v59  ;;  %v2581_v27 = vshll.u32 %v9126_v44, %v2566_v19  ;;  %v6586_v61 = vshrl.u32 %v2564_v43, 5  ;;  %v2573_v18 = vshrl.u32 %v9034_v10, %v2567_v51  ;;  %v2576_v50 = vshrl.u32 %v9026_v34, %v2567_v51 }
 0x2b2   : > { %v2579_v37 = vshrl.u32 %v9126_v44, %v2567_v51  ;;  %v4582_v22 = vadd.s32 4294967169, %v2711_v33  ;;  %v2865_v48 = vand.u32 2139095040, %v6568_v59  ;;  %v2570_v21 = vshrl.u32 %v9031_v57, %v2567_v51 }
 0x2b3   : > { %v2583_v26 = vor.u32 %v2582_v35, %v2581_v27  ;;  %v2572_v2 = vshll.u32 %v9031_v57, %v2566_v19  ;;  %v2575_v38 = vshll.u32 %v9034_v10, %v2566_v19  ;;  %v2578_v43 = vshll.u32 %v9026_v34, %v2566_v19 }
 0x2b4   : > { %v6599_v11 = vmul.u32 %v2471_v4, %v6560_v24  ;;  %v2569_v35 = vshll.u32 %v9033_v1, %v2566_v19  ;;  %v2717_v27 = vadd.s32 1, %v4582_v22  ;;  %vm2587_vm5 = vcmp.lt.s32.totalorder %v6586_v61, 4 }
 0x2b5   : > { %v6602_v29 = vor.u32 %v2573_v18, %v2572_v2  ;;  %v2577_v33 = vor.u32 %v2576_v50, %v2575_v38  ;;  %v2580_v16 = vor.u32 %v2579_v37, %v2578_v43  ;;  %v2597_v15 = vsel %vm2587_vm5, %v2583_v26, 1326507024 }
 0x2b6   : > { %v9176_v23 = vand.u32 2147483647, %v6518_v5  ;;  %vm2718_vm7 = vcmp.gt.s32.totalorder %v2717_v27, 0  ;;  %v2866_v58 = vshrl.u32 %v2865_v48, 23  ;;  %v6610_v28 = vmul.u32 %v2471_v4, %v6563_v63 }
 0x2b7   : > { %v2571_v46 = vor.u32 %v2570_v21, %v2569_v35  ;;  %v6613_v19 = vand.u32 65535, %v6572_v25  ;;  %v6616_v22 = vshrl.u32 %v6572_v25, 16  ;;  %vm2584_vm11 = vcmp.lt.s32.totalorder %v6586_v61, 1 }
 0x2b8   : > { %v2714_v31 = vand.u32 8388607, %v9176_v23  ;;  %vm2586_vm6 = vcmp.lt.s32.totalorder %v6586_v61, 3  ;;  %v2719_v26 = vsel %vm2718_vm7, %v2717_v27, 0  ;;  %v4585_v38 = vadd.s32 4294967169, %v2866_v58 }
 0x2b9   : > { %v2568_v23 = vshrl.u32 %v9033_v1, %v2567_v51  ;;  %v2596_v48 = vsel %vm2584_vm11, %v6602_v29, %v2577_v33  ;;  %v2598_v18 = vsel %vm2586_vm6, %v2580_v16, %v2597_v15  ;;  %v2721_v21 = vand.u32 31, %v2719_v26 }
 0x2ba   : > { %v9177_v4 = vshll.u32 %v6580_v9, 16  ;;  %vm2585_vm14 = vcmp.lt.s32.totalorder %v6586_v61, 2  ;;  %v2715_v37 = vor.u32 8388608, %v2714_v31  ;;  %v2589_v58 = vsel %vm2587_vm5, %v2577_v33, 2102212464 }
 0x2bb   : > { %v6631_v43 = vsel %vm2584_vm11, %v2568_v23, %v2571_v46  ;;  %v2592_v51 = vsel %vm2584_vm11, %v2571_v46, %v6602_v29  ;;  %v2722_v35 = vsub.s32 32, %v2721_v21  ;;  %v2593_v15 = vsel %vm2587_vm5, %v2580_v16, 920167782 }
 0x2bc   : > { %v6627_v50 = vadd.s32 %v9177_v4, %v6577_v41  ;;  %v6640_v27 = vsel %vm2585_vm14, %v2596_v48, %v2598_v18  ;;  %v2720_v4 = vshrl.u32 %v2719_v26, 5  ;;  %v2872_v36 = vadd.s32 1, %v4585_v38 }
 0x2bd   : > { %v2727_v31 = vshll.u32 %v9031_v57, %v2721_v21  ;;  %v2728_v23 = vshrl.u32 %v9034_v10, %v2722_v35  ;;  %v2730_v2 = vshll.u32 %v9034_v10, %v2721_v21  ;;  %v2731_v60 = vshrl.u32 %v9026_v34, %v2722_v35 }
 0x2be   : > { %v2733_v46 = vshll.u32 %v9026_v34, %v2721_v21  ;;  %v2734_v0 = vshrl.u32 %v9126_v44, %v2722_v35  ;;  %v2736_v16 = vshll.u32 %v9126_v44, %v2721_v21  ;;  %v2737_v20 = vshrl.u32 %v9125_v14, %v2722_v35 }
 0x2bf   : > { %v2594_v26 = vsel %vm2586_vm6, %v2577_v33, %v2593_v15  ;;  %v2725_v38 = vshrl.u32 %v9031_v57, %v2722_v35  ;;  %v2729_v48 = vor.u32 %v2728_v23, %v2727_v31  ;;  %v2732_v18 = vor.u32 %v2731_v60, %v2730_v2 }
 0x2c0   : > { %v2735_v55 = vor.u32 %v2734_v0, %v2733_v46  ;;  %v2738_v45 = vor.u32 %v2737_v20, %v2736_v16  ;;  %vm2739_vm3 = vcmp.lt.s32.totalorder %v2720_v4, 1  ;;  %vm2873_vm4 = vcmp.gt.s32.totalorder %v2872_v36, 0 }
 0x2c1   : > { %v2604_v56 = vshrl.u32 %v6640_v27, 16  ;;  %v2724_v52 = vshll.u32 %v9033_v1, %v2721_v21  ;;  %vm2742_vm12 = vcmp.lt.s32.totalorder %v2720_v4, 4  ;;  %v2751_v47 = vsel %vm2739_vm3, %v2729_v48, %v2732_v18 }
 0x2c2   : > { %v6658_v13 = vsel %vm2585_vm14, %v2592_v51, %v2594_v26  ;;  %vm2741_vm10 = vcmp.lt.s32.totalorder %v2720_v4, 3  ;;  %v2752_v33 = vsel %vm2742_vm12, %v2738_v45, 1326507024  ;;  %v2874_v15 = vsel %vm2873_vm4, %v2872_v36, 0 }
 0x2c3   : > { %v2726_v60 = vor.u32 %v2725_v38, %v2724_v52  ;;  %vm2740_vm13 = vcmp.lt.s32.totalorder %v2720_v4, 2  ;;  %v2753_v20 = vsel %vm2741_vm10, %v2735_v55, %v2752_v33  ;;  %v6662_v0 = vshll.u32 %v2715_v37, 8 }
 0x2c4   : > { %v8903_v2 = vand.u32 65535, %v6640_v27  ;;  %v2748_v21 = vsel %vm2742_vm12, %v2735_v55, 920167782  ;;  %v6667_v31 = vsel %vm2740_vm13, %v2751_v47, %v2753_v20  ;;  %v2876_v23 = vand.u32 31, %v2874_v15 }
 0x2c5   : > { %v6672_v51 = vsel %vm2586_vm6, %v6602_v29, %v2589_v58  ;;  %v6675_v52 = vmul.u32 %v2604_v56, %v6613_v19  ;;  %v2626_v45 = vshrl.u32 %v6658_v13, 16  ;;  %v2744_v36 = vsel %vm2742_vm12, %v2732_v18, 2102212464 }
 0x2c6   : > { %v2723_v55 = vshrl.u32 %v9033_v1, %v2722_v35  ;;  %v9178_v47 = vand.u32 2147483647, %v6568_v59  ;;  %v2877_v16 = vsub.s32 32, %v2876_v23  ;;  %v2747_v26 = vsel %vm2739_vm3, %v2726_v60, %v2729_v48 }
 0x2c7   : > { %v2749_v29 = vsel %vm2741_vm10, %v2732_v18, %v2748_v21  ;;  %v6688_v58 = vand.u32 65535, %v6662_v0  ;;  %v2759_v38 = vshrl.u32 %v6667_v31, 16  ;;  %v9179_v33 = vshll.u32 %v6580_v9, 16 }
 0x2c8   : > { %v6683_v46 = vand.u32 8388607, %v9178_v47  ;;  %v6701_v35 = vmul.u32 %v8903_v2, %v6613_v19  ;;  %v2743_v47 = vsel %vm2739_vm3, %v2723_v55, %v2726_v60  ;;  %v2745_v18 = vsel %vm2741_vm10, %v2729_v48, %v2744_v36 }
 0x2c9   : > { %vm6694_vm1 = vc.u32 %v6577_v41, %v9179_v33  ;;  %v6706_v21 = vshrl.u32 %v6662_v0, 16  ;;  %v6709_v37 = vmul.u32 %v2604_v56, %v6616_v22  ;;  %v2609_v41 = vshll.u32 %v6675_v52, 16 }
 0x2ca   : > { %v6713_v33 = vmul.u32 %v2626_v45, %v6613_v19  ;;  %v6716_v59 = vmul.u32 %v2626_v45, %v6616_v22  ;;  %v6719_v2 = vsel %vm2740_vm13, %v2747_v26, %v2749_v29  ;;  %v2870_v60 = vor.u32 8388608, %v6683_v46 }
 0x2cb   : > { %v2892_v48 = vshrl.u32 %v9125_v14, %v2877_v16  ;;  %v9182_v36 = vand.u32 65535, %v6527_v53  ;;  %v6729_v55 = vsel %vm2740_vm13, %v2743_v47, %v2745_v18  ;;  %v6732_v30 = vmul.u32 %v2759_v38, %v6688_v58 }
 0x2cc   : > { %v2891_v45 = vshll.u32 %v9126_v44, %v2876_v23  ;;  %v2455_v26 = vshrl.u32 %v6580_v9, 16  ;;  %v6736_v29 = vshrl.u32 %v2874_v15, 5  ;;  %v2883_v46 = vshrl.u32 %v9034_v10, %v2877_v16 }
 0x2cd   : > { %v6726_v56 = vmul.u32 %v9182_v36, %v6563_v63  ;;  %v2886_v14 = vshrl.u32 %v9026_v34, %v2877_v16  ;;  %v2889_v53 = vshrl.u32 %v9126_v44, %v2877_v16  ;;  %v6742_v36 = vadd.s32 %v2609_v41, %v6701_v35 }
 0x2ce   : > { %v2758_v4 = vand.u32 65535, %v6667_v31  ;;  %v2781_v47 = vshrl.u32 %v6719_v2, 16  ;;  %v2893_v18 = vor.u32 %v2892_v48, %v2891_v45  ;;  %v2880_v49 = vshrl.u32 %v9031_v57, %v2877_v16 }
 0x2cf   : > { %v2882_v9 = vshll.u32 %v9031_v57, %v2876_v23  ;;  %v2885_v15 = vshll.u32 %v9034_v10, %v2876_v23  ;;  %v2888_v3 = vshll.u32 %v9026_v34, %v2876_v23  ;;  %v2764_v42 = vshll.u32 %v6732_v30, 16 }
 0x2d0   : > { %v2780_v44 = vand.u32 65535, %v6719_v2  ;;  %v2879_v31 = vshll.u32 %v9033_v1, %v2876_v23  ;;  %vm2897_vm2 = vcmp.lt.s32.totalorder %v6736_v29, 4  ;;  %v2760_v57 = vmul.u32 %v2758_v4, %v6688_v58 }
 0x2d1   : > { %v6755_v7 = vor.u32 %v2883_v46, %v2882_v9  ;;  %v2887_v48 = vor.u32 %v2886_v14, %v2885_v15  ;;  %v2890_v45 = vor.u32 %v2889_v53, %v2888_v3  ;;  %v2763_v10 = vmul.u32 %v2759_v38, %v6706_v21 }
 0x2d2   : > { %v6761_v34 = vmul.u32 %v2781_v47, %v6688_v58  ;;  %v2907_v2 = vsel %vm2897_vm2, %v2893_v18, 1326507024  ;;  %v6766_v39 = vmul.u32 %v2781_v47, %v6706_v21  ;;  %v2878_v23 = vshrl.u32 %v9033_v1, %v2877_v16 }
 0x2d3   : > { %v2881_v46 = vor.u32 %v2880_v49, %v2879_v31  ;;  %v2456_v14 = vshll.u32 %v6726_v56, 16  ;;  %vm6770_vm5 = vc.u32 %v2760_v57, %v2764_v42  ;;  %vm2894_vm7 = vcmp.lt.s32.totalorder %v6736_v29, 1 }
 0x2d4   : > { %vm2896_vm11 = vcmp.lt.s32.totalorder %v6736_v29, 3  ;;  %v2459_v38 = vsel %vm6694_vm1, 1, %v9035_v12  ;;  %v2906_v53 = vsel %vm2894_vm7, %v6755_v7, %v2887_v48  ;;  %v2770_v47 = vadd.s32 %v2764_v42, %v2760_v57 }
 0x2d5   : > { %v2908_v49 = vsel %vm2896_vm11, %v2890_v45, %v2907_v2  ;;  %v2461_v16 = vadd.s32 %v2459_v38, %v6583_v6  ;;  %vm2462_vm6 = vc.u32 %v6627_v50, %v2456_v14  ;;  %v9185_v9 = vand.u32 65535, %v6552_v62 }
 0x2d6   : > { %v2463_v18 = vsel %vm2462_vm6, 1, %v9035_v12  ;;  %v2476_v20 = vshll.u32 %v6599_v11, 16  ;;  %vm2895_vm3 = vcmp.lt.s32.totalorder %v6736_v29, 2  ;;  %v2903_v31 = vsel %vm2897_vm2, %v2890_v45, 920167782 }
 0x2d7   : > { %v2474_v15 = vmul.u32 %v9185_v9, %v6563_v63  ;;  %v2465_v1 = vadd.s32 %v2463_v18, %v2461_v16  ;;  %v9186_v6 = vmov %v9185_v9  ;;  %v6799_v57 = vsel %vm2894_vm7, %v2878_v23, %v2881_v46 }
 0x2d8   : > { %v2472_v2 = vmul.u32 %v9186_v6, %v6560_v24  ;;  %v6803_v42 = vsel %vm2897_vm2, %v2887_v48, 2102212464  ;;  %v6808_v63 = vsel %vm2894_vm7, %v2881_v46, %v6755_v7  ;;  %v6812_v50 = vsel %vm2895_vm3, %v2906_v53, %v2908_v49 }
 0x2d9   : > { %vm6815_vm4 = vc.u32 %v6701_v35, %v2609_v41  ;;  %v2478_v24 = vshll.u32 %v2474_v15, 16  ;;  %v2762_v23 = vmul.u32 %v2758_v4, %v6706_v21  ;;  %v6822_v14 = vsel %vm2896_vm11, %v2887_v48, %v2903_v31 }
 0x2da   : > { %vm2480_vm12 = vc.u32 %v2472_v2, %v2476_v20  ;;  %v2482_v45 = vadd.s32 %v2476_v20, %v2472_v2  ;;  %v6824_v46 = vshll.u32 %v2870_v60, 8  ;;  %v2466_v38 = vadd.s32 %v2465_v1, %v2455_v26 }
 0x2db   : > { %v2481_v53 = vsel %vm2480_vm12, 1, %v9035_v12  ;;  %v2914_v49 = vshrl.u32 %v6812_v50, 16  ;;  %v2457_v35 = vshrl.u32 %v6726_v56, 16  ;;  %v2766_v18 = vshll.u32 %v2762_v23, 16 }
 0x2dc   : > { %v2483_v41 = vadd.s32 %v2481_v53, %v6610_v28  ;;  %vm2484_vm10 = vc.u32 %v2482_v45, %v2478_v24  ;;  %v2769_v4 = vsel %vm6770_vm5, 1, %v9035_v12  ;;  %v2784_v60 = vmul.u32 %v2780_v44, %v6706_v21 }
 0x2dd   : > { %v2485_v16 = vsel %vm2484_vm10, 1, %v9035_v12  ;;  %v2477_v1 = vshrl.u32 %v6599_v11, 16  ;;  %v2479_v26 = vshrl.u32 %v2474_v15, 16  ;;  %v2771_v9 = vadd.s32 %v2769_v4, %v2763_v10 }
 0x2de   : > { %v2487_v48 = vadd.s32 %v2485_v16, %v2483_v41  ;;  %v6836_v20 = vadd.s32 %v2466_v38, %v2457_v35  ;;  %vm2772_vm13 = vc.u32 %v2770_v47, %v2766_v18  ;;  %v2782_v28 = vmul.u32 %v2780_v44, %v6688_v58 }
 0x2df   : > { %v2786_v56 = vshll.u32 %v6761_v34, 16  ;;  %v6840_v31 = vadd.s32 %v2482_v45, %v2478_v24  ;;  %v2765_v3 = vshrl.u32 %v6732_v30, 16  ;;  %v2773_v2 = vsel %vm2772_vm13, 1, %v9035_v12 }
 0x2e0   : > { %v2488_v6 = vadd.s32 %v2487_v48, %v2477_v1  ;;  %v2775_v21 = vadd.s32 %v2773_v2, %v2771_v9  ;;  %v2788_v53 = vshll.u32 %v2784_v60, 16  ;;  %v2767_v10 = vshrl.u32 %v2762_v23, 16 }
 0x2e1   : > { %vm2790_vm1 = vc.u32 %v2782_v28, %v2786_v56  ;;  %v2792_v11 = vadd.s32 %v2786_v56, %v2782_v28  ;;  %v9189_v44 = vand.u32 65535, %v6640_v27  ;;  %vm2492_vm2 = vc.u32 %v6836_v20, %v6840_v31 }
 0x2e2   : > { %v2489_v15 = vadd.s32 %v2488_v6, %v2479_v26  ;;  %v2791_v38 = vsel %vm2790_vm1, 1, %v9035_v12  ;;  %v2776_v47 = vadd.s32 %v2775_v21, %v2765_v3  ;;  %v6852_v24 = vand.u32 65535, %v6824_v46 }
 0x2e3   : > { %v2607_v58 = vmul.u32 %v9189_v44, %v6616_v22  ;;  %v2793_v30 = vadd.s32 %v2791_v38, %v6766_v39  ;;  %vm2794_vm5 = vc.u32 %v2792_v11, %v2788_v53  ;;  %v2787_v16 = vshrl.u32 %v6761_v34, 16 }
 0x2e4   : > { %v2493_v45 = vadd.s32 1, %v2489_v15  ;;  %v2795_v35 = vsel %vm2794_vm5, 1, %v9035_v12  ;;  %v6855_v41 = vadd.s32 %v2776_v47, %v2767_v10  ;;  %v2614_v18 = vsel %vm6815_vm4, 1, %v9035_v12 }
 0x2e5   : > { %v2611_v23 = vshll.u32 %v2607_v58, 16  ;;  %v2797_v27 = vadd.s32 %v2795_v35, %v2793_v30  ;;  %v2616_v39 = vadd.s32 %v2614_v18, %v6709_v37  ;;  %v9190_v1 = vand.u32 65535, %v6658_v13 }
 0x2e6   : > { %v2494_v4 = vsel %vm2492_vm2, %v2493_v45, %v2489_v15  ;;  %v6869_v48 = vmul.u32 %v2914_v49, %v6852_v24  ;;  %v9191_v34 = vmul.u32 %v6522_v32, %v6546_v40  ;;  %v2789_v62 = vshrl.u32 %v2784_v60, 16 }
 0x2e7   : > { %vm2617_vm7 = vc.u32 %v6742_v36, %v2611_v23  ;;  %v2629_v26 = vmul.u32 %v9190_v1, %v6616_v22  ;;  %v2798_v28 = vadd.s32 %v2797_v27, %v2787_v16  ;;  %v6874_v56 = vadd.s32 %v2792_v11, %v2788_v53 }
 0x2e8   : > { %v2495_v9 = vadd.s32 %v2494_v4, %v9191_v34  ;;  %v2618_v37 = vsel %vm2617_vm7, 1, %v9035_v12  ;;  %v9192_v36 = vmov %v9190_v1  ;;  %v2631_v22 = vshll.u32 %v6713_v33, 16 }
 0x2e9   : > { %v2627_v6 = vmul.u32 %v9192_v36, %v6613_v19  ;;  %v2799_v2 = vadd.s32 %v2798_v28, %v2789_v62  ;;  %v2610_v21 = vshrl.u32 %v6675_v52, 16  ;;  %v2620_v15 = vadd.s32 %v2618_v37, %v2616_v39 }
 0x2ea   : > { %v2496_v3 = vadd.s32 536870912, %v2495_v9  ;;  %vm2802_vm6 = vc.u32 %v6855_v41, %v6874_v56  ;;  %v2633_v32 = vshll.u32 %v2629_v26, 16  ;;  %v6888_v60 = vsel %vm2895_vm3, %v6808_v63, %v6822_v14 }
 0x2eb   : > { %vm2635_vm4 = vc.u32 %v2627_v6, %v2631_v22  ;;  %v2637_v40 = vadd.s32 %v2631_v22, %v2627_v6  ;;  %v2803_v19 = vadd.s32 1, %v2799_v2  ;;  %v2913_v52 = vand.u32 65535, %v6812_v50 }
 0x2ec   : > { %v6890_v13 = vshrl.u32 %v2496_v3, 30  ;;  %v2636_v53 = vsel %vm2635_vm4, 1, %v9035_v12  ;;  %v2621_v11 = vadd.s32 %v2620_v15, %v2610_v21  ;;  %v2900_v38 = vsel %vm2896_vm11, %v6755_v7, %v6803_v42 }
 0x2ed   : > { %v2638_v10 = vadd.s32 %v2636_v53, %v6716_v59  ;;  %vm2639_vm12 = vc.u32 %v2637_v40, %v2633_v32  ;;  %v6900_v44 = vshrl.u32 %v6824_v46, 16  ;;  %v2804_v14 = vsel %vm2802_vm6, %v2803_v19, %v2799_v2 }
 0x2ee   : > { %v2498_v63 = vshll.u32 %v6890_v13, 30  ;;  %v2919_v47 = vshll.u32 %v6869_v48, 16  ;;  %v9193_v30 = vmul.u32 %v6662_v0, %v6729_v55  ;;  %v2612_v35 = vshrl.u32 %v2607_v58, 16 }
 0x2ef   : > { %v2640_v59 = vsel %vm2639_vm12, 1, %v9035_v12  ;;  %v2936_v23 = vshrl.u32 %v6888_v60, 16  ;;  %v2632_v7 = vshrl.u32 %v6713_v33, 16  ;;  %v2915_v27 = vmul.u32 %v2913_v52, %v6852_v24 }
 0x2f0   : > { %v2805_v45 = vadd.s32 %v2804_v14, %v9193_v30  ;;  %v2499_v16 = vsub.s32 %v2495_v9, %v2498_v63  ;;  %v2642_v42 = vadd.s32 %v2640_v59, %v2638_v10  ;;  %v6911_v4 = vadd.s32 %v2621_v11, %v2612_v35 }
 0x2f1   : > { %v6914_v39 = vmul.u32 %v2913_v52, %v6900_v44  ;;  %v2634_v55 = vshrl.u32 %v2629_v26, 16  ;;  %v2591_v1 = vsel %vm2585_vm14, %v6631_v43, %v6672_v51  ;;  %v2925_v34 = vadd.s32 %v2919_v47, %v2915_v27 }
 0x2f2   : > { %v2806_v18 = vadd.s32 536870912, %v2805_v45  ;;  %vm2500_vm11 = vcmp.lt.s32.totalorder %v2499_v16, 0  ;;  %v2501_v0 = vsub.s32 0, %v2499_v16  ;;  %v2643_v58 = vadd.s32 %v2642_v42, %v2632_v7 }
 0x2f3   : > { %v6922_v9 = vadd.s32 %v2637_v40, %v2633_v32  ;;  %v6927_v62 = vsel %vm2895_vm3, %v6799_v57, %v2900_v38  ;;  %vm2923_vm10 = vc.u32 %v2915_v27, %v2919_v47  ;;  %v2921_v61 = vshll.u32 %v6914_v39, 16 }
 0x2f4   : > { %v6920_v33 = vshrl.u32 %v2806_v18, 30  ;;  %v2502_v28 = vsel %vm2500_vm11, %v2501_v0, %v2499_v16  ;;  %v2644_v37 = vadd.s32 %v2643_v58, %v2634_v55  ;;  %v9194_v43 = vshrl.u32 %v6516_v8, 16 }
 0x2f5   : > { %v2503_v26 = vclz %v2502_v28  ;;  %vm2647_vm13 = vc.u32 %v6911_v4, %v6922_v9  ;;  %v2645_v29 = vmul.u32 %v6572_v25, %v2591_v1  ;;  %v6940_v57 = vmul.u32 %v2936_v23, %v6852_v24 }
 0x2f6   : > { %v2808_v36 = vshll.u32 %v6920_v33, 30  ;;  %v6936_v51 = vmul.u32 %v9194_v43, %v6453_v54  ;;  %v2648_v6 = vadd.s32 1, %v2644_v37  ;;  %v2924_v2 = vsel %vm2923_vm10, 1, %v9035_v12 }
 0x2f7   : > { %v4577_v22 = vadd.s32 4294967294, %v2503_v26  ;;  %vm2927_vm14 = vc.u32 %v2925_v34, %v2921_v61  ;;  %v2918_v21 = vmul.u32 %v2914_v49, %v6900_v44  ;;  %v2935_v15 = vand.u32 65535, %v6888_v60 }
 0x2f8   : > { %v6942_v3 = vsub.s32 %v2805_v45, %v2808_v36  ;;  %v2955_v32 = vmul.u32 %v6824_v46, %v6927_v62  ;;  %v2649_v25 = vsel %vm2647_vm13, %v2648_v6, %v2644_v37  ;;  %v2491_v40 = vadd.s32 %v6840_v31, %v6836_v20 }
 0x2f9   : > { %vm4578_vm3 = vcmp.lt.s32.totalorder %v4577_v22, 0  ;;  %v2650_v52 = vadd.s32 %v2649_v25, %v2645_v29  ;;  %v2926_v11 = vadd.s32 %v2924_v2, %v2918_v21  ;;  %v2928_v50 = vsel %vm2927_vm14, 1, %v9035_v12 }
 0x2fa   : > { %vm2810_vm1 = vcmp.lt.s32.totalorder %v6942_v3, 0  ;;  %v2811_v19 = vsub.s32 0, %v6942_v3  ;;  %v2506_v53 = vsel %vm4578_vm3, 0, %v4577_v22  ;;  %v2941_v38 = vshll.u32 %v6940_v57, 16 }
 0x2fb   : > { %v2507_v49 = vsub.s32 32, %v2506_v53  ;;  %v2511_v10 = vsub.s32 4294967266, %v2506_v53  ;;  %vm2399_vm2 = vcmp.lt.s32.totalorder %v6312_v17, 0  ;;  %v2940_v20 = vmul.u32 %v2936_v23, %v6900_v44 }
 0x2fc   : > { %v2812_v60 = vsel %vm2810_vm1, %v2811_v19, %v6942_v3  ;;  %v2651_v63 = vadd.s32 536870912, %v2650_v52  ;;  %v2937_v14 = vmul.u32 %v2935_v15, %v6852_v24  ;;  %v2508_v47 = vshll.u32 %v2499_v16, %v2506_v53 }
 0x2fd   : > { %v2813_v31 = vclz %v2812_v60  ;;  %v2509_v30 = vshrl.u32 %v2491_v40, %v2507_v49  ;;  %v2512_v45 = vadd.s32 127, %v2511_v10  ;;  %v2939_v35 = vmul.u32 %v2935_v15, %v6900_v44 }
 0x2fe   : > { %v2521_v59 = vsub.s32 4, %v6890_v13  ;;  %v2801_v7 = vadd.s32 %v6874_v56, %v6855_v41  ;;  %v2930_v27 = vadd.s32 %v2928_v50, %v2926_v11  ;;  %v9195_v18 = vand.u32 2147483647, %v6312_v17 }
 0x2ff   : > { %v4583_v42 = vadd.s32 4294967294, %v2813_v31  ;;  %v2510_v0 = vor.u32 %v2509_v30, %v2508_v47  ;;  %v2513_v24 = vshll.u32 %v2512_v45, 23  ;;  %v6971_v16 = vshrl.u32 %v2651_v63, 30 }
 0x300   : > { %vm6967_vm5 = vcmp.le.f32.partialorder %v9195_v18, 0.7853982  ;;  %vm2945_vm7 = vc.u32 %v2937_v14, %v2941_v38  ;;  %v2920_v44 = vshrl.u32 %v6869_v48, 16  ;;  %v2947_v58 = vadd.s32 %v2941_v38, %v2937_v14 }
 0x301   : > { %vm4584_vm6 = vcmp.lt.s32.totalorder %v4583_v42, 0  ;;  %v2946_v55 = vsel %vm2945_vm7, 1, %v9035_v12  ;;  %v2514_v41 = vor.u32 4788187, %v2513_v24  ;;  %v2653_v1 = vshll.u32 %v6971_v16, 30 }
 0x302   : > { %v2816_v56 = vsel %vm4584_vm6, 0, %v4583_v42  ;;  %v2943_v34 = vshll.u32 %v2939_v35, 16  ;;  %vm2709_vm4 = vcmp.lt.s32.totalorder %v6518_v5, 0  ;;  %v2517_v28 = vcvt.s32.f32 %v2510_v0 }
 0x303   : > { %v2817_v37 = vsub.s32 32, %v2816_v56  ;;  %v2821_v26 = vsub.s32 4294967266, %v2816_v56  ;;  %v2931_v36 = vadd.s32 %v2930_v27, %v2920_v44  ;;  %v2515_v61 = vand.u32 2147483647, %v2514_v41 }
 0x304   : > { %v2654_v43 = vsub.s32 %v2650_v52, %v2653_v1  ;;  %v2948_v29 = vadd.s32 %v2946_v55, %v2940_v20  ;;  %vm2949_vm12 = vc.u32 %v2947_v58, %v2943_v34  ;;  %v2818_v48 = vshll.u32 %v6942_v3, %v2816_v56 }
 0x305   : > { %v2819_v6 = vshrl.u32 %v2801_v7, %v2817_v37  ;;  %v2822_v22 = vadd.s32 127, %v2821_v26  ;;  %v2950_v2 = vsel %vm2949_vm12, 1, %v9035_v12  ;;  %v2518_v21 = vmul.f32 %v2517_v28, %v2515_v61 }
 0x306   : > { %v2522_v15 = vsel %vm2399_vm2, %v2521_v59, %v6890_v13  ;;  %v9198_v25 = vand.u32 2147483647, %v6518_v5  ;;  %vm2655_vm10 = vcmp.lt.s32.totalorder %v2654_v43, 0  ;;  %v2656_v19 = vsub.s32 0, %v2654_v43 }
 0x307   : > { %v2820_v53 = vor.u32 %v2819_v6, %v2818_v48  ;;  %v2823_v52 = vshll.u32 %v2822_v22, 23  ;;  %v2831_v3 = vsub.s32 4, %v6920_v33  ;;  %v2922_v11 = vshrl.u32 %v6914_v39, 16 }
 0x308   : > { %vm6984_vm11 = vcmp.le.f32.partialorder %v9198_v25, 0.7853982  ;;  %v2519_v50 = vxor.u32 2147483648, %v2518_v21  ;;  %v2657_v49 = vsel %vm2655_vm10, %v2656_v19, %v2654_v43  ;;  %v2942_v10 = vshrl.u32 %v6940_v57, 16  ;;  %v9202_v19 = vld [vmem:[#allocation42_spill] sm:$0xff] }
 0x309   : > { %v2952_v60 = vadd.s32 %v2950_v2, %v2948_v29  ;;  %v2524_v13 = vsel %vm6967_vm5, 0, %v2522_v15  ;;  %v2824_v38 = vor.u32 4788187, %v2823_v52  ;;  %v2658_v20 = vclz %v2657_v49  ;;  %v9201_v15 = vld [vmem:[#allocation12_spill] sm:$0xff]  ;;  %v9204_v52 = vld [vmem:[#allocation33_spill] sm:$0xff] }
 0x30a   : > { %v6993_v31 = vadd.s32 %v2931_v36, %v2922_v11  ;;  %v2520_v63 = vsel %vm2399_vm2, %v2519_v50, %v2518_v21  ;;  %v2944_v14 = vshrl.u32 %v2939_v35, 16  ;;  %v6997_v47 = vadd.s32 %v2947_v58, %v2943_v34 }
 0x30b   : > { %v2953_v30 = vadd.s32 %v2952_v60, %v2942_v10  ;;  %v7002_v39 = vsel %vm6967_vm5, %v6312_v17, %v2520_v63  ;;  %v2825_v57 = vand.u32 2147483647, %v2824_v38  ;;  %v2827_v45 = vcvt.s32.f32 %v2820_v53 }
 0x30c   : > { %v4580_v59 = vadd.s32 4294967294, %v2658_v20  ;;  %v2525_v7 = vmul.f32 %v7002_v39, %v7002_v39  ;;  %v2832_v42 = vsel %vm2709_vm4, %v2831_v3, %v6920_v33  ;;  %v2646_v35 = vadd.s32 %v6922_v9, %v6911_v4 }
 0x30d   : > { %v2954_v27 = vadd.s32 %v2953_v30, %v2944_v14  ;;  %v2541_v18 = vadd.s32 3, %v2524_v13  ;;  %v2828_v0 = vmul.f32 %v2827_v45, %v2825_v57  ;;  %vm2957_vm14 = vc.u32 %v6993_v31, %v6997_v47 }
 0x30e   : > { %vm4581_vm13 = vcmp.lt.s32.totalorder %v4580_v59, 0  ;;  %v2526_v23 = vmul.f32 -0.001358992, %v2525_v7  ;;  %v2533_v24 = vmul.f32 -0.00019511016, %v2525_v7  ;;  %v2834_v41 = vsel %vm6984_vm11, 0, %v2832_v42 }
 0x30f   : > { %v2661_v44 = vsel %vm4581_vm13, 0, %v4580_v59  ;;  %v2958_v55 = vadd.s32 1, %v2954_v27  ;;  %v2829_v58 = vxor.u32 2147483648, %v2828_v0  ;;  %v2299_v61 = vshll.u32 %v6936_v51, 16 }
 0x310   : > { %v2662_v56 = vsub.s32 32, %v2661_v44  ;;  %v2666_v33 = vsub.s32 4294967266, %v2661_v44  ;;  %v2527_v1 = vadd.f32 0.041655596, %v2526_v23  ;;  %v2534_v34 = vadd.f32 0.008332121, %v2533_v24 }
 0x311   : > { %v2663_v4 = vshll.u32 %v2654_v43, %v2661_v44  ;;  %v2959_v9 = vsel %vm2957_vm14, %v2958_v55, %v2954_v27  ;;  %v2830_v28 = vsel %vm2709_vm4, %v2829_v58, %v2828_v0  ;;  %vm2554_vm3 = vcmp.lt.s32.totalorder %v9201_v15, 0  ;;  %v9211_v55 = vld [vmem:[#allocation43_spill] sm:$0xff]  ;;  %v9212_v58 = vld [vmem:[#allocation44_spill] sm:$0xff] }
 0x312   : > { %v2664_v37 = vshrl.u32 %v2646_v35, %v2662_v56  ;;  %v2667_v26 = vadd.s32 127, %v2666_v33  ;;  %v2960_v36 = vadd.s32 %v2959_v9, %v2955_v32  ;;  %v2528_v29 = vmul.f32 %v2527_v1, %v2525_v7 }
 0x313   : > { %v2535_v48 = vmul.f32 %v2534_v34, %v2525_v7  ;;  %v7024_v6 = vsel %vm6984_vm11, %v6518_v5, %v2830_v28  ;;  %v7029_v62 = vand.u32 3, %v2541_v18  ;;  %v2851_v32 = vadd.s32 3, %v2834_v41 }
 0x314   : > { %v2835_v43 = vmul.f32 %v7024_v6, %v7024_v6  ;;  %v2665_v22 = vor.u32 %v2664_v37, %v2663_v4  ;;  %v2668_v2 = vshll.u32 %v2667_v26, 23  ;;  %v2961_v21 = vadd.s32 536870912, %v2960_v36 }
 0x315   : > { %v2529_v25 = vadd.f32 -0.4999988, %v2528_v29  ;;  %v2536_v46 = vadd.f32 -0.16666654, %v2535_v48  ;;  %v9203_v53 = vshll.u32 %v9202_v19, 16  ;;  %v9207_v3 = vand.u32 65535, %v6516_v8 }
 0x316   : > { %v2836_v50 = vmul.f32 -0.001358992, %v2835_v43  ;;  %v2843_v49 = vmul.f32 -0.00019511016, %v2835_v43  ;;  %v2669_v10 = vor.u32 4788187, %v2668_v2  ;;  %v2672_v45 = vcvt.s32.f32 %v2665_v22 }
 0x317   : > { %vm7034_vm1 = vc.u32 %v9204_v52, %v9203_v53  ;;  %v7041_v11 = vmul.u32 %v9207_v3, %v6453_v54  ;;  %v2530_v60 = vmul.f32 %v2529_v25, %v2525_v7  ;;  %v2537_v13 = vmul.f32 %v2536_v46, %v2525_v7 }
 0x318   : > { %v9208_v38 = vand.u32 2147483647, %v9201_v15  ;;  %v7049_v63 = vshrl.u32 %v2961_v21, 30  ;;  %v2837_v14 = vadd.f32 0.041655596, %v2836_v50  ;;  %vm2544_vm5 = vcmp.eq.s32.totalorder %v7029_v62, 0 }
 0x319   : > { %v2844_v30 = vadd.f32 0.008332121, %v2843_v49  ;;  %v2670_v57 = vand.u32 2147483647, %v2669_v10  ;;  %v2538_v59 = vadd.f32 1.0, %v2537_v13  ;;  %v2852_v42 = vand.u32 3, %v2851_v32 }
 0x31a   : > { %vm7045_vm2 = vcmp.le.f32.partialorder %v9208_v38, 0.7853982  ;;  %v2963_v35 = vshll.u32 %v7049_v63, 30  ;;  %v2838_v27 = vmul.f32 %v2837_v14, %v2835_v43  ;;  %v2676_v0 = vsub.s32 4, %v6971_v16  ;;  %v9214_v32 = vld [vmem:[#allocation39_spill] sm:$0xff] }
 0x31b   : > { %v2845_v7 = vmul.f32 %v2844_v30, %v2835_v43  ;;  %v2673_v18 = vmul.f32 %v2672_v45, %v2670_v57  ;;  %v2531_v23 = vadd.f32 1.0, %v2530_v60  ;;  %v2539_v24 = vmul.f32 %v2538_v59, %v7002_v39  ;;  %v9216_v59 = vld [vmem:[#allocation23_spill] sm:$0xff] }
 0x31c   : > { %vm2543_vm7 = vcmp.lt.s32.totalorder %v7029_v62, 2  ;;  %v7056_v44 = vsub.s32 %v2960_v36, %v2963_v35  ;;  %v9213_v41 = vand.u32 65535, %v9212_v58  ;;  %vm2547_vm6 = vcmp.eq.s32.totalorder %v7029_v62, 2 }
 0x31d   : > { %v2839_v33 = vadd.f32 -0.4999988, %v2838_v27  ;;  %v2846_v1 = vadd.f32 -0.16666654, %v2845_v7  ;;  %v2674_v34 = vxor.u32 2147483648, %v2673_v18  ;;  %v2545_v4 = vxor.u32 2147483648, %v2539_v24 }
 0x31e   : > { %v7061_v56 = vmul.u32 %v9213_v41, %v9211_v55  ;;  %vm2854_vm4 = vcmp.eq.s32.totalorder %v2852_v42, 0  ;;  %vm2965_vm12 = vcmp.lt.s32.totalorder %v7056_v44, 0  ;;  %v2966_v39 = vsub.s32 0, %v7056_v44  ;;  %v9221_v27 = vld [vmem:[#allocation31_spill] sm:$0xff] }
 0x31f   : > { %v2840_v9 = vmul.f32 %v2839_v33, %v2835_v43  ;;  %v2847_v28 = vmul.f32 %v2846_v1, %v2835_v43  ;;  %vm2853_vm11 = vcmp.lt.s32.totalorder %v2852_v42, 2  ;;  %v2675_v37 = vsel %vm2554_vm3, %v2674_v34, %v2673_v18  ;;  %v9224_v33 = vld [vmem:[#allocation37_spill] sm:$0xff] }
 0x320   : > { %v2677_v26 = vsel %vm2554_vm3, %v2676_v0, %v6971_v16  ;;  %vm2540_vm10 = vweird.f32 %v6312_v17  ;;  %v2548_v36 = vxor.u32 2147483648, %v2531_v23  ;;  %vm2850_vm13 = vweird.f32 %v6518_v5  ;;  %v9223_v0 = vld [vmem:[#allocation36_spill] sm:$0xff] }
 0x321   : > { %v7076_v29 = vsel %vm7045_vm2, %v9201_v15, %v2675_v37  ;;  %v2967_v48 = vsel %vm2965_vm12, %v2966_v39, %v7056_v44  ;;  %v1836_v43 = vshll.u32 %v7061_v56, 16  ;;  %v2841_v22 = vadd.f32 1.0, %v2840_v9 }
 0x322   : > { %v2848_v2 = vadd.f32 1.0, %v2847_v28  ;;  %vm2857_vm14 = vcmp.eq.s32.totalorder %v2852_v42, 2  ;;  %v7082_v16 = vmul.f32 %v7076_v29, %v7076_v29  ;;  %v2546_v21 = vsel %vm2544_vm5, %v2531_v23, %v2545_v4 }
 0x323   : > { %v2968_v25 = vclz %v2967_v48  ;;  %v1839_v46 = vsel %vm7034_vm1, 1, %v9035_v12  ;;  %vm1842_vm3 = vc.u32 %v9214_v32, %v1836_v43  ;;  %v2858_v52 = vxor.u32 2147483648, %v2841_v22  ;;  %v9227_v32 = vld [vmem:[#allocation8_spill] sm:$0xff] }
 0x324   : > { %v2849_v53 = vmul.f32 %v2848_v2, %v7024_v6  ;;  %v2679_v3 = vsel %vm7045_vm2, 0, %v2677_v26  ;;  %v2688_v50 = vmul.f32 -0.00019511016, %v7082_v16  ;;  %v2549_v49 = vsel %vm2547_vm6, %v2548_v36, %v2539_v24  ;;  %v9215_v6 = vld [vmem:[#allocation24_spill] sm:$0xff] }
 0x325   : > { %v2956_v10 = vadd.s32 %v6997_v47, %v6993_v31  ;;  %v4586_v60 = vadd.s32 4294967294, %v2968_v25  ;;  %v1835_v40 = vshrl.u32 %v9202_v19, 16  ;;  %v2550_v13 = vsel %vm2543_vm7, %v2546_v21, %v2549_v49  ;;  %v9218_v31 = vld [vmem:[#allocation6_spill] sm:$0xff]  ;;  %v9226_v21 = vld [vmem:[#allocation53_spill] sm:$0xff] }
 0x326   : > { %v2855_v38 = vxor.u32 2147483648, %v2849_v53  ;;  %v1841_v14 = vadd.s32 %v1839_v46, %v9215_v6  ;;  %v1843_v20 = vsel %vm1842_vm3, 1, %v9035_v12  ;;  %v2859_v30 = vsel %vm2857_vm14, %v2858_v52, %v2849_v53  ;;  %v9238_v47 = vld [vmem:[#allocation21_spill] sm:$0xff] }
 0x327   : > { %v2681_v57 = vmul.f32 -0.001358992, %v7082_v16  ;;  %v2689_v45 = vadd.f32 0.008332121, %v2688_v50  ;;  %vm4587_vm1 = vcmp.lt.s32.totalorder %v4586_v60, 0  ;;  %v9217_v35 = vshll.u32 %v9216_v59, 16 }
 0x328   : > { %v2856_v62 = vsel %vm2854_vm4, %v2841_v22, %v2855_v38  ;;  %v2971_v19 = vsel %vm4587_vm1, 0, %v4586_v60  ;;  %v9222_v7 = vand.u32 65535, %v9221_v27  ;;  %v1856_v23 = vshll.u32 %v9223_v0, 16 }
 0x329   : > { %vm7108_vm2 = vc.u32 %v9218_v31, %v9217_v35  ;;  %v2860_v24 = vsel %vm2853_vm11, %v2856_v62, %v2859_v30  ;;  %v2972_v58 = vsub.s32 32, %v2971_v19  ;;  %v2976_v41 = vsub.s32 4294967266, %v2971_v19 }
 0x32a   : > { %v1854_v18 = vmul.u32 %v9222_v7, %v9211_v55  ;;  %v9225_v1 = vmov %v9222_v7  ;;  %v2551_v4 = vsel %vm2540_vm10, nan, %v2550_v13  ;;  %v2861_v39 = vsel %vm2850_vm13, nan, %v2860_v24  ;;  %v9234_v24 = vld [vmem:[#allocation10_spill] sm:$0xff] }
 0x32b   : > { %v1852_v34 = vmul.u32 %v9225_v1, %v9224_v33  ;;  %v2986_v9 = vsub.s32 4, %v7049_v63  ;;  %v1845_v28 = vadd.s32 %v1843_v20, %v1841_v14  ;;  %v3024_v55 = vpack.c.bf16 %v2861_v39, %v2551_v4 }
 0x32c   : > { %v2973_v37 = vshll.u32 %v7056_v44, %v2971_v19  ;;  %v2974_v42 = vshrl.u32 %v2956_v10, %v2972_v58  ;;  %v2977_v26 = vadd.s32 127, %v2976_v41  ;;  %v2682_v36 = vadd.f32 0.041655596, %v2681_v57 }
 0x32d   : > { %v2690_v48 = vmul.f32 %v2689_v45, %v7082_v16  ;;  %v1858_v43 = vshll.u32 %v1854_v18, 16  ;;  %vm1860_vm5 = vc.u32 %v1852_v34, %v1856_v23  ;;  %3073 = vmatpush.bf16.msrb.mxu0 %v3024_v55  ;;  %v1862_v5 = vadd.s32 %v1856_v23, %v1852_v34  ;;  %v9232_v45 = vld [vmem:[#allocation40_spill] sm:$0xff]  ;;  %v9235_v34 = vld [vmem:[#allocation22_spill] sm:$0xff]  ;;  %v9240_v55 = vld [vmem:[#allocation7_spill] sm:$0xff] }
 0x32e   : > { %v2975_v22 = vor.u32 %v2974_v42, %v2973_v37  ;;  %v2978_v17 = vshll.u32 %v2977_v26, 23  ;;  %v1861_v2 = vsel %vm1860_vm5, 1, %v9035_v12  ;;  %vm2864_vm7 = vcmp.lt.s32.totalorder %v9226_v21, 0 }
 0x32f   : > { %v2696_v25 = vadd.s32 3, %v2679_v3  ;;  %v1846_v46 = vadd.s32 %v1845_v28, %v1835_v40  ;;  %v1863_v53 = vadd.s32 %v1861_v2, %v9227_v32  ;;  %v9228_v44 = vand.u32 2147483647, %v9226_v21 }
 0x330   : > { %v2979_v50 = vor.u32 4788187, %v2978_v17  ;;  %v2987_v49 = vsel %vm2864_vm7, %v2986_v9, %v7049_v63  ;;  %vm1864_vm4 = vc.u32 %v1862_v5, %v1858_v43  ;;  %v2683_v10 = vmul.f32 %v2682_v36, %v7082_v16  ;;  %v9231_v63 = vld [vmem:[#allocation19_spill] sm:$0xff] }
 0x331   : > { %vm7133_vm6 = vcmp.le.f32.partialorder %v9228_v44, 0.7853982  ;;  %v2691_v60 = vadd.f32 -0.16666654, %v2690_v48  ;;  %v1837_v3 = vshrl.u32 %v7061_v56, 16  ;;  %v1865_v40 = vsel %vm1864_vm4, 1, %v9035_v12 }
 0x332   : > { %v2980_v13 = vand.u32 2147483647, %v2979_v50  ;;  %v2982_v38 = vcvt.s32.f32 %v2975_v22  ;;  %v1857_v6 = vshrl.u32 %v9223_v0, 16  ;;  %v1867_v14 = vadd.s32 %v1865_v40, %v1863_v53  ;;  %v9243_v17 = vld [vmem:[#allocation15_spill] sm:$0xff] }
 0x333   : > { %v7144_v20 = vand.u32 3, %v2696_v25  ;;  %v2989_v30 = vsel %vm7133_vm6, 0, %v2987_v49  ;;  %v7148_v57 = vadd.s32 %v1846_v46, %v1837_v3  ;;  %v9233_v35 = vand.u32 65535, %v9232_v45  ;;  %v9246_v49 = vld [vmem:[#allocation45_spill] sm:$0xff] }
 0x334   : > { %v2983_v62 = vmul.f32 %v2982_v38, %v2980_v13  ;;  %v1859_v56 = vshrl.u32 %v1854_v18, 16  ;;  %v1868_v19 = vadd.s32 %v1867_v14, %v1857_v6  ;;  %v2149_v27 = vsel %vm7108_vm2, 1, %v9035_v12  ;;  %v9237_v18 = vld [vmem:[#allocation49_spill] sm:$0xff]  ;;  %v9249_v13 = vld [vmem:[#allocation28_spill] sm:$0xff] }
 0x335   : > { %v2142_v31 = vmul.u32 %v9233_v35, %v9231_v63  ;;  %v2684_v7 = vadd.f32 -0.4999988, %v2683_v10  ;;  %v7156_v0 = vadd.s32 %v1862_v5, %v1858_v43  ;;  %v2151_v58 = vadd.s32 %v2149_v27, %v9234_v24  ;;  %v9241_v43 = vld [vmem:[#allocation14_spill] sm:$0xff]  ;;  %v9247_v10 = vld [vmem:[#allocation41_spill] sm:$0xff] }
 0x336   : > { %v2692_v41 = vmul.f32 %v2691_v60, %v7082_v16  ;;  %v2984_v33 = vxor.u32 2147483648, %v2983_v62  ;;  %v1869_v1 = vadd.s32 %v1868_v19, %v1859_v56  ;;  %v9236_v4 = vand.u32 65535, %v9235_v34 }
 0x337   : > { %v2146_v23 = vshll.u32 %v2142_v31, 16  ;;  %vm1872_vm12 = vc.u32 %v7148_v57, %v7156_v0  ;;  %v2166_v37 = vshll.u32 %v9240_v55, 16  ;;  %v2145_v36 = vshrl.u32 %v9216_v59, 16 }
 0x338   : > { %v2164_v39 = vmul.u32 %v9236_v4, %v9231_v63  ;;  %v9239_v9 = vmov %v9236_v4  ;;  %v2985_v42 = vsel %vm2864_vm7, %v2984_v33, %v2983_v62  ;;  %v1873_v26 = vadd.s32 1, %v1869_v1  ;;  %v9251_v33 = vld [vmem:[#allocation30_spill] sm:$0xff] }
 0x339   : > { %vm2152_vm11 = vc.u32 %v9237_v18, %v2146_v23  ;;  %v2162_v28 = vmul.u32 %v9239_v9, %v9238_v47  ;;  %v9242_v22 = vshll.u32 %v9241_v43, 16  ;;  %v7184_v5 = vsel %vm7133_vm6, %v9226_v21, %v2985_v42 }
 0x33a   : > { %v2153_v48 = vsel %vm2152_vm11, 1, %v9035_v12  ;;  %v2168_v46 = vshll.u32 %v2164_v39, 16  ;;  %v2990_v59 = vmul.f32 %v7184_v5, %v7184_v5  ;;  %v1874_v32 = vsel %vm1872_vm12, %v1873_v26, %v1869_v1 }
 0x33b   : > { %vm7177_vm10 = vc.u32 %v9243_v17, %v9242_v22  ;;  %v2155_v25 = vadd.s32 %v2153_v48, %v2151_v58  ;;  %vm2170_vm13 = vc.u32 %v2162_v28, %v2166_v37  ;;  %v2172_v44 = vadd.s32 %v2166_v37, %v2162_v28 }
 0x33c   : > { %v2171_v53 = vsel %vm2170_vm13, 1, %v9035_v12  ;;  %v2693_v50 = vadd.f32 1.0, %v2692_v41  ;;  %v9248_v60 = vmul.u32 %v9246_v49, %v9247_v10  ;;  %v2991_v38 = vmul.f32 -0.001358992, %v2990_v59  ;;  %v9254_v49 = vld [vmem:[#allocation38_spill] sm:$0xff]  ;;  %v9255_v10 = vld [vmem:[#allocation5_spill] sm:$0xff] }
 0x33d   : > { %v2156_v40 = vadd.s32 %v2155_v25, %v2145_v36  ;;  %v2173_v52 = vadd.s32 %v2171_v53, %v9249_v13  ;;  %v2998_v6 = vmul.f32 -0.00019511016, %v2990_v59  ;;  %v3006_v14 = vadd.s32 3, %v2989_v30  ;;  %v9250_v30 = vld [vmem:[#allocation32_spill] sm:$0xff] }
 0x33e   : > { %v1875_v3 = vadd.s32 %v1874_v32, %v9248_v60  ;;  %vm2174_vm14 = vc.u32 %v2172_v44, %v2168_v46  ;;  %v2685_v63 = vmul.f32 %v2684_v7, %v7082_v16  ;;  %v2147_v35 = vshrl.u32 %v2142_v31, 16  ;;  %v9253_v32 = vld [vmem:[#allocation35_spill] sm:$0xff] }
 0x33f   : > { %v2175_v62 = vsel %vm2174_vm14, 1, %v9035_v12  ;;  %vm2699_vm3 = vcmp.eq.s32.totalorder %v7144_v20, 0  ;;  %v2992_v56 = vadd.f32 0.041655596, %v2991_v38  ;;  %v2999_v19 = vadd.f32 0.008332121, %v2998_v6 }
 0x340   : > { %v1876_v45 = vadd.s32 536870912, %v1875_v3  ;;  %v2167_v27 = vshrl.u32 %v9240_v55, 16  ;;  %v2177_v23 = vadd.s32 %v2175_v62, %v2173_v52  ;;  %v2694_v24 = vmul.f32 %v2693_v50, %v7076_v29 }
 0x341   : > { %v7200_v41 = vadd.s32 %v2156_v40, %v2147_v35  ;;  %v9252_v16 = vand.u32 65535, %v9251_v33  ;;  %v2993_v31 = vmul.f32 %v2992_v56, %v2990_v59  ;;  %v3000_v1 = vmul.f32 %v2999_v19, %v2990_v59  ;;  %v9257_v40 = vld [vmem:[#allocation20_spill] sm:$0xff]  ;;  %v9258_v33 = vld [vmem:[#allocation29_spill] sm:$0xff] }
 0x342   : > { %v7198_v58 = vshrl.u32 %v1876_v45, 30  ;;  %v2169_v34 = vshrl.u32 %v2164_v39, 16  ;;  %v2178_v4 = vadd.s32 %v2177_v23, %v2167_v27  ;;  %v2686_v18 = vadd.f32 1.0, %v2685_v63 }
 0x343   : > { %v7205_v7 = vmul.u32 %v9252_v16, %v9250_v30  ;;  %vm2698_vm1 = vcmp.lt.s32.totalorder %v7144_v20, 2  ;;  %vm2702_vm2 = vcmp.eq.s32.totalorder %v7144_v20, 2  ;;  %v7210_v47 = vadd.s32 %v2172_v44, %v2168_v46 }
 0x344   : > { %v1878_v29 = vshll.u32 %v7198_v58, 30  ;;  %v2994_v9 = vadd.f32 -0.4999988, %v2993_v31  ;;  %v3001_v28 = vadd.f32 -0.16666654, %v3000_v1  ;;  %v3007_v55 = vand.u32 3, %v3006_v14 }
 0x345   : > { %v2179_v37 = vadd.s32 %v2178_v4, %v2169_v34  ;;  %v2700_v42 = vxor.u32 2147483648, %v2694_v24  ;;  %vm2182_vm5 = vc.u32 %v7200_v41, %v7210_v47  ;;  %v1991_v39 = vshll.u32 %v7205_v7, 16  ;;  %v9259_v1 = vld [vmem:[#allocation26_spill] sm:$0xff]  ;;  %v9260_v34 = vld [vmem:[#allocation25_spill] sm:$0xff] }
 0x346   : > { %v7212_v26 = vsub.s32 %v1875_v3, %v1878_v29  ;;  %v2995_v36 = vmul.f32 %v2994_v9, %v2990_v59  ;;  %v3002_v48 = vmul.f32 %v3001_v28, %v2990_v59  ;;  %v1994_v17 = vsel %vm7177_vm10, 1, %v9035_v12 }
 0x347   : > { %v2183_v22 = vadd.s32 1, %v2179_v37  ;;  %vm2695_vm7 = vweird.f32 %v9201_v15  ;;  %v2703_v25 = vxor.u32 2147483648, %v2686_v18  ;;  %vm3005_vm6 = vweird.f32 %v9226_v21 }
 0x348   : > { %vm1880_vm4 = vcmp.lt.s32.totalorder %v7212_v26, 0  ;;  %v1881_v46 = vsub.s32 0, %v7212_v26  ;;  %vm1997_vm12 = vc.u32 %v9253_v32, %v1991_v39  ;;  %v2996_v53 = vadd.f32 1.0, %v2995_v36 }
 0x349   : > { %v3003_v44 = vadd.f32 1.0, %v3002_v48  ;;  %vm3008_vm11 = vcmp.lt.s32.totalorder %v3007_v55, 2  ;;  %v2184_v59 = vsel %vm2182_vm5, %v2183_v22, %v2179_v37  ;;  %v2701_v50 = vsel %vm2699_vm3, %v2686_v18, %v2700_v42 }
 0x34a   : > { %v1882_v2 = vsel %vm1880_vm4, %v1881_v46, %v7212_v26  ;;  %v9256_v60 = vmul.u32 %v9254_v49, %v9255_v10  ;;  %v1996_v13 = vadd.s32 %v1994_v17, %v9257_v40  ;;  %v3013_v38 = vxor.u32 2147483648, %v2996_v53  ;;  %v9263_v46 = vld [vmem:[#allocation52_spill] sm:$0xff]  ;;  %v9267_v49 = vld [vmem:[#allocation51_spill] sm:$0xff] }
 0x34b   : > { %v3004_v52 = vmul.f32 %v3003_v44, %v7184_v5  ;;  %v1883_v6 = vclz %v1882_v2  ;;  %v1998_v14 = vsel %vm1997_vm12, 1, %v9035_v12  ;;  %v2704_v63 = vsel %vm2702_vm2, %v2703_v25, %v2694_v24 }
 0x34c   : > { %v2185_v3 = vadd.s32 %v2184_v59, %v9256_v60  ;;  %vm3009_vm10 = vcmp.eq.s32.totalorder %v3007_v55, 0  ;;  %vm3012_vm13 = vcmp.eq.s32.totalorder %v3007_v55, 2  ;;  %v2705_v35 = vsel %vm2698_vm1, %v2701_v50, %v2704_v63  ;;  %v9265_v50 = vld [vmem:[#allocation9_spill] sm:$0xff] }
 0x34d   : > { %v3010_v62 = vxor.u32 2147483648, %v3004_v52  ;;  %v1871_v56 = vadd.s32 %v7156_v0, %v7148_v57  ;;  %v4565_v19 = vadd.s32 4294967294, %v1883_v6  ;;  %v1990_v5 = vshrl.u32 %v9241_v43, 16 }
 0x34e   : > { %v2186_v45 = vadd.s32 536870912, %v2185_v3  ;;  %v2000_v23 = vadd.s32 %v1998_v14, %v1996_v13  ;;  %v2011_v16 = vshll.u32 %v9258_v33, 16  ;;  %v3014_v24 = vsel %vm3012_vm13, %v3013_v38, %v3004_v52 }
 0x34f   : > { %v3011_v31 = vsel %vm3009_vm10, %v2996_v53, %v3010_v62  ;;  %vm4566_vm14 = vcmp.lt.s32.totalorder %v4565_v19, 0  ;;  %v9261_v4 = vand.u32 65535, %v9260_v34  ;;  %v2706_v43 = vsel %vm2695_vm7, nan, %v2705_v35 }
 0x350   : > { %v7240_v27 = vshrl.u32 %v2186_v45, 30  ;;  %v3015_v18 = vsel %vm3008_vm11, %v3011_v31, %v3014_v24  ;;  %v1886_v29 = vsel %vm4566_vm14, 0, %v4565_v19  ;;  %v2001_v55 = vadd.s32 %v2000_v23, %v1990_v5 }
 0x351   : > { %v2007_v20 = vmul.u32 %v9261_v4, %v9259_v1  ;;  %v9262_v0 = vmov %v9261_v4  ;;  %v3016_v28 = vsel %vm3005_vm6, nan, %v3015_v18  ;;  %v1887_v37 = vsub.s32 32, %v1886_v29 }
 0x352   : > { %v2188_v57 = vshll.u32 %v7240_v27, 30  ;;  %v2009_v9 = vmul.u32 %v9262_v0, %v9250_v30  ;;  %v1891_v42 = vsub.s32 4294967266, %v1886_v29  ;;  %v3025_v39 = vpack.c.bf16 %v3016_v28, %v2706_v43 }
 0x353   : > { %vm2015_vm3 = vc.u32 %v2007_v20, %v2011_v16  ;;  %v1888_v48 = vshll.u32 %v7212_v26, %v1886_v29  ;;  %v1889_v22 = vshrl.u32 %v1871_v56, %v1887_v37  ;;  %v2017_v30 = vadd.s32 %v2011_v16, %v2007_v20  ;;  %v9266_v26 = vld [vmem:[#allocation11_spill] sm:$0xff] }
 0x354   : > { %v7256_v36 = vsub.s32 %v2185_v3, %v2188_v57  ;;  %v1892_v17 = vadd.s32 127, %v1891_v42  ;;  %v2016_v25 = vsel %vm2015_vm3, 1, %v9035_v12  ;;  %3092 = vmatpush.bf16.msrb.mxu1 %v3025_v39  ;;  %v2013_v21 = vshll.u32 %v2009_v9, 16 }
 0x355   : > { %v9264_v32 = vshrl.u32 %v6516_v8, 16  ;;  %v1890_v44 = vor.u32 %v1889_v22, %v1888_v48  ;;  %v2018_v2 = vadd.s32 %v2016_v25, %v9265_v50  ;;  %vm1779_vm2 = vcmp.lt.s32.totalorder %v9266_v26, 0 }
 0x356   : > { %vm2190_vm1 = vcmp.lt.s32.totalorder %v7256_v36, 0  ;;  %v2191_v15 = vsub.s32 0, %v7256_v36  ;;  %v1893_v59 = vshll.u32 %v1892_v17, 23  ;;  %v9268_v10 = vshrl.u32 %v9267_v49, 16 }
 0x357   : > { %v2298_v53 = vmul.u32 %v9264_v32, %v9263_v46  ;;  %v1992_v40 = vshrl.u32 %v7205_v7, 16  ;;  %vm2019_vm5 = vc.u32 %v2017_v30, %v2013_v21  ;;  %vm2303_vm7 = vc.u32 %v7041_v11, %v2299_v61 }
 0x358   : > { %v7270_v60 = vmul.u32 %v9268_v10, %v6453_v54  ;;  %v2192_v3 = vsel %vm2190_vm1, %v2191_v15, %v7256_v36  ;;  %v1894_v13 = vor.u32 4788187, %v1893_v59  ;;  %v2020_v38 = vsel %vm2019_vm5, 1, %v9035_v12  ;;  %v9275_v15 = vld [vmem:[#allocation13_spill] sm:$0xff] }
 0x359   : > { %v2193_v52 = vclz %v2192_v3  ;;  %v2305_v6 = vadd.s32 %v2299_v61, %v7041_v11  ;;  %v7281_v14 = vadd.s32 %v2001_v55, %v1992_v40  ;;  %v2012_v63 = vshrl.u32 %v9258_v33, 16 }
 0x35a   : > { %v2022_v45 = vadd.s32 %v2020_v38, %v2018_v2  ;;  %v1895_v35 = vand.u32 2147483647, %v1894_v13  ;;  %v1897_v7 = vcvt.s32.f32 %v1890_v44  ;;  %v2014_v56 = vshrl.u32 %v2009_v9, 16 }
 0x35b   : > { %v4571_v62 = vadd.s32 4294967294, %v2193_v52  ;;  %v7284_v19 = vadd.s32 %v2017_v30, %v2013_v21  ;;  %v9269_v23 = vand.u32 65535, %v6516_v8  ;;  %v2304_v31 = vsel %vm2303_vm7, 1, %v9035_v12  ;;  %v9276_v21 = vld [vmem:[#allocation27_spill] sm:$0xff] }
 0x35c   : > { %v2023_v5 = vadd.s32 %v2022_v45, %v2012_v63  ;;  %v9270_v61 = vand.u32 2147483647, %v9266_v26  ;;  %v1898_v33 = vmul.f32 %v1897_v7, %v1895_v35  ;;  %v2181_v24 = vadd.s32 %v7210_v47, %v7200_v41  ;;  %v9280_v35 = vld [vmem:[#allocation48_spill] sm:$0xff] }
 0x35d   : > { %v7289_v16 = vmul.u32 %v9269_v23, %v9263_v46  ;;  %vm4572_vm4 = vcmp.lt.s32.totalorder %v4571_v62, 0  ;;  %vm2027_vm12 = vc.u32 %v7281_v14, %v7284_v19  ;;  %v2306_v29 = vadd.s32 %v2304_v31, %v2298_v53  ;;  %v9278_v53 = vld [vmem:[#allocation16_spill] sm:$0xff] }
 0x35e   : > { %vm7294_vm6 = vcmp.le.f32.partialorder %v9270_v61, 0.7853982  ;;  %v2196_v1 = vsel %vm4572_vm4, 0, %v4571_v62  ;;  %v2024_v34 = vadd.s32 %v2023_v5, %v2014_v56  ;;  %v1899_v4 = vxor.u32 2147483648, %v1898_v33 }
 0x35f   : > { %v2301_v8 = vshll.u32 %v7289_v16, 16  ;;  %v2197_v20 = vsub.s32 32, %v2196_v1  ;;  %v2201_v18 = vsub.s32 4294967266, %v2196_v1  ;;  %v9273_v0 = vand.u32 65535, %v9267_v49 }
 0x360   : > { %v2028_v57 = vadd.s32 1, %v2024_v34  ;;  %v2321_v41 = vshll.u32 %v7270_v60, 16  ;;  %v1900_v47 = vsel %vm1779_vm2, %v1899_v4, %v1898_v33  ;;  %v2198_v43 = vshll.u32 %v7256_v36, %v2196_v1 }
 0x361   : > { %vm2307_vm11 = vc.u32 %v2305_v6, %v2301_v8  ;;  %v7306_v9 = vmul.u32 %v9273_v0, %v9263_v46  ;;  %v2199_v28 = vshrl.u32 %v2181_v24, %v2197_v20  ;;  %v2202_v37 = vadd.s32 127, %v2201_v18 }
 0x362   : > { %v7315_v42 = vsel %vm7294_vm6, %v9266_v26, %v1900_v47  ;;  %v2029_v39 = vsel %vm2027_vm12, %v2028_v57, %v2024_v34  ;;  %v2308_v55 = vsel %vm2307_vm11, 1, %v9035_v12  ;;  %v9274_v48 = vmov %v9273_v0 }
 0x363   : > { %v2317_v22 = vmul.u32 %v9274_v48, %v6453_v54  ;;  %v7323_v17 = vmul.f32 %v7315_v42, %v7315_v42  ;;  %v2200_v25 = vor.u32 %v2199_v28, %v2198_v43  ;;  %v2203_v36 = vshll.u32 %v2202_v37, 23 }
 0x364   : > { %v9277_v30 = vmul.u32 %v9275_v15, %v9276_v21  ;;  %vm2089_vm10 = vcmp.lt.s32.totalorder %v9278_v53, 0  ;;  %v9279_v44 = vmov %v9268_v10  ;;  %v1901_v50 = vsub.s32 4, %v7198_v58 }
 0x365   : > { %v2320_v59 = vmul.u32 %v9279_v44, %v9263_v46  ;;  %v2323_v54 = vshll.u32 %v7306_v9, 16  ;;  %vm2325_vm13 = vc.u32 %v2317_v22, %v2321_v41  ;;  %v1906_v2 = vmul.f32 -0.001358992, %v7323_v17 }
 0x366   : > { %v2030_v32 = vadd.s32 %v2029_v39, %v9277_v30  ;;  %v1913_v10 = vmul.f32 -0.00019511016, %v7323_v17  ;;  %v2204_v3 = vor.u32 4788187, %v2203_v36  ;;  %v2310_v40 = vadd.s32 %v2308_v55, %v2306_v29  ;;  %v9282_v29 = vld [vmem:[#allocation47_spill] sm:$0xff] }
 0x367   : > { %v2207_v13 = vcvt.s32.f32 %v2200_v25  ;;  %v2326_v38 = vsel %vm2325_vm13, 1, %v9035_v12  ;;  %v2327_v6 = vadd.s32 %v2321_v41, %v2317_v22  ;;  %v1907_v63 = vadd.f32 0.041655596, %v1906_v2 }
 0x368   : > { %v2031_v52 = vadd.s32 536870912, %v2030_v32  ;;  %v1914_v45 = vadd.f32 0.008332121, %v1913_v10  ;;  %v2205_v49 = vand.u32 2147483647, %v2204_v3  ;;  %v2328_v46 = vadd.s32 %v2326_v38, %v2320_v59  ;;  %v9286_v59 = vld [vmem:[#allocation50_spill] sm:$0xff] }
 0x369   : > { %v2279_v62 = vsel %vm2277_vm0, %v9280_v35, 2102212464  ;;  %v1902_v56 = vsel %vm1779_vm2, %v1901_v50, %v7198_v58  ;;  %vm2329_vm14 = vc.u32 %v2327_v6, %v2323_v54  ;;  %v2300_v61 = vshrl.u32 %v6936_v51, 16 }
 0x36a   : > { %v7343_v5 = vshrl.u32 %v2031_v52, 30  ;;  %v1915_v23 = vmul.f32 %v1914_v45, %v7323_v17  ;;  %v2208_v31 = vmul.f32 %v2207_v13, %v2205_v49  ;;  %v2330_v33 = vsel %vm2329_vm14, 1, %v9035_v12 }
 0x36b   : > { %v2211_v24 = vsub.s32 4, %v7240_v27  ;;  %v2322_v34 = vshrl.u32 %v7270_v60, 16  ;;  %v2332_v8 = vadd.s32 %v2330_v33, %v2328_v46  ;;  %v1908_v4 = vmul.f32 %v1907_v63, %v7323_v17 }
 0x36c   : > { %v2033_v1 = vshll.u32 %v7343_v5, 30  ;;  %v1916_v58 = vadd.f32 -0.16666654, %v1915_v23  ;;  %v2209_v20 = vxor.u32 2147483648, %v2208_v31  ;;  %v2311_v18 = vadd.s32 %v2310_v40, %v2300_v61 }
 0x36d   : > { %v2280_v57 = vsel %vm2276_vm8, %v9282_v29, %v2279_v62  ;;  %v9283_v51 = vand.u32 2147483647, %v9278_v53  ;;  %v2333_v47 = vadd.s32 %v2332_v8, %v2322_v34  ;;  %v1904_v60 = vsel %vm7294_vm6, 0, %v1902_v56 }
 0x36e   : > { %v2034_v41 = vsub.s32 %v2030_v32, %v2033_v1  ;;  %v1917_v43 = vmul.f32 %v1916_v58, %v7323_v17  ;;  %v2210_v28 = vsel %vm2089_vm10, %v2209_v20, %v2208_v31  ;;  %v2302_v37 = vshrl.u32 %v7289_v16, 16 }
 0x36f   : > { %vm7357_vm0 = vcmp.le.f32.partialorder %v9283_v51, 0.7853982  ;;  %v2324_v48 = vshrl.u32 %v7306_v9, 16  ;;  %v1909_v22 = vadd.f32 -0.4999988, %v1908_v4  ;;  %v2212_v11 = vsel %vm2089_vm10, %v2211_v24, %v7240_v27 }
 0x370   : > { %v2213_v39 = vsel %vm7357_vm0, %v9278_v53, %v2210_v28  ;;  %vm2035_vm8 = vcmp.lt.s32.totalorder %v2034_v41, 0  ;;  %v2036_v55 = vsub.s32 0, %v2034_v41  ;;  %v7374_v36 = vadd.s32 %v2311_v18, %v2302_v37 }
 0x371   : > { %v2215_v25 = vmul.f32 %v2213_v39, %v2213_v39  ;;  %v2334_v21 = vadd.s32 %v2333_v47, %v2324_v48  ;;  %v1918_v30 = vadd.f32 1.0, %v1917_v43  ;;  %v7376_v44 = vadd.s32 %v2327_v6, %v2323_v54  ;;  %v9287_v54 = vld [vmem:[#allocation18_spill] sm:$0xff] }
 0x372   : > { %v2037_v15 = vsel %vm2035_vm8, %v2036_v55, %v2034_v41  ;;  %v2281_v50 = vsel %vm2275_vm15, %v9286_v59, %v2280_v57  ;;  %v1921_v9 = vadd.s32 3, %v1904_v60  ;;  %v2214_v2 = vsel %vm7357_vm0, 0, %v2212_v11 }
 0x373   : > { %v2216_v16 = vmul.f32 -0.001358992, %v2215_v25  ;;  %v2223_v32 = vmul.f32 -0.00019511016, %v2215_v25  ;;  %v2038_v10 = vclz %v2037_v15  ;;  %v1910_v27 = vmul.f32 %v1909_v22, %v7323_v17 }
 0x374   : > { %vm2337_vm3 = vc.u32 %v7374_v36, %v7376_v44  ;;  %v2338_v52 = vadd.s32 1, %v2334_v21  ;;  %v2335_v38 = vmul.u32 %v9287_v54, %v2281_v50  ;;  %v1919_v6 = vmul.f32 %v1918_v30, %v7315_v42 }
 0x375   : > { %v2217_v3 = vadd.f32 0.041655596, %v2216_v16  ;;  %v2224_v40 = vadd.f32 0.008332121, %v2223_v32  ;;  %v4568_v13 = vadd.s32 4294967294, %v2038_v10  ;;  %v1922_v49 = vand.u32 3, %v1921_v9 }
 0x376   : > { %v2231_v46 = vadd.s32 3, %v2214_v2  ;;  %v2339_v35 = vsel %vm2337_vm3, %v2338_v52, %v2334_v21  ;;  %v1911_v7 = vadd.f32 1.0, %v1910_v27  ;;  %v2026_v23 = vadd.s32 %v7284_v19, %v7281_v14  ;;  %v9288_v2 = vld [vmem:[#allocation17_spill] sm:$0xff] }
 0x377   : > { %v2218_v63 = vmul.f32 %v2217_v3, %v2215_v25  ;;  %v2225_v45 = vmul.f32 %v2224_v40, %v2215_v25  ;;  %vm4569_vm15 = vcmp.lt.s32.totalorder %v4568_v13, 0  ;;  %v2340_v33 = vadd.s32 %v2339_v35, %v2335_v38 }
 0x378   : > { %v2041_v56 = vsel %vm4569_vm15, 0, %v4568_v13  ;;  %v1925_v24 = vxor.u32 2147483648, %v1919_v6  ;;  %v1928_v20 = vxor.u32 2147483648, %v1911_v7  ;;  %v2232_v57 = vand.u32 3, %v2231_v46 }
 0x379   : > { %v2219_v62 = vadd.f32 -0.4999988, %v2218_v63  ;;  %v2226_v17 = vadd.f32 -0.16666654, %v2225_v45  ;;  %v2042_v31 = vsub.s32 32, %v2041_v56  ;;  %v2046_v61 = vsub.s32 4294967266, %v2041_v56 }
 0x37a   : > { %v2043_v42 = vshll.u32 %v2034_v41, %v2041_v56  ;;  %v2341_v58 = vadd.s32 536870912, %v2340_v33  ;;  %vm1924_vm1 = vcmp.eq.s32.totalorder %v1922_v49, 0  ;;  %vm1920_vm2 = vweird.f32 %v9266_v26 }
 0x37b   : > { %v2220_v1 = vmul.f32 %v2219_v62, %v2215_v25  ;;  %v2227_v34 = vmul.f32 %v2226_v17, %v2215_v25  ;;  %v2044_v8 = vshrl.u32 %v2026_v23, %v2042_v31  ;;  %v2047_v4 = vadd.s32 127, %v2046_v61  ;;  %v7414_v31 = vld [vmem:[%s8767_s3 + $0x10] sm:$0xff] }
 0x37c   : > { %v7390_v47 = vshrl.u32 %v2341_v58, 30  ;;  %v1926_v14 = vsel %vm1924_vm1, %v1911_v7, %v1925_v24  ;;  %vm1923_vm5 = vcmp.lt.s32.totalorder %v1922_v49, 2  ;;  %vm1927_vm7 = vcmp.eq.s32.totalorder %v1922_v49, 2 }
 0x37d   : > { %v2221_v18 = vadd.f32 1.0, %v2220_v1  ;;  %v2228_v29 = vadd.f32 1.0, %v2227_v34  ;;  %v2045_v51 = vor.u32 %v2044_v8, %v2043_v42  ;;  %v2048_v0 = vshll.u32 %v2047_v4, 23  ;;  %v9292_v8 = vld [vmem:[#allocation34_spill] sm:$0xff] }
 0x37e   : > { %v2343_v43 = vshll.u32 %v7390_v47, 30  ;;  %v1929_v28 = vsel %vm1927_vm7, %v1928_v20, %v1919_v6  ;;  %vm2234_vm6 = vcmp.eq.s32.totalorder %v2232_v57, 0  ;;  %vm2237_vm4 = vcmp.eq.s32.totalorder %v2232_v57, 2 }
 0x37f   : > { %v2229_v19 = vmul.f32 %v2228_v29, %v2213_v39  ;;  %v2238_v60 = vxor.u32 2147483648, %v2221_v18  ;;  %v2049_v41 = vor.u32 4788187, %v2048_v0  ;;  %v1930_v55 = vsel %vm1923_vm5, %v1926_v14, %v1929_v28 }
 0x380   : > { %v2052_v22 = vcvt.s32.f32 %v2045_v51  ;;  %v2344_v11 = vsub.s32 %v2340_v33, %v2343_v43  ;;  %vm2230_vm12 = vweird.f32 %v9278_v53  ;;  %vm2233_vm11 = vcmp.lt.s32.totalorder %v2232_v57, 2 }
 0x381   : > { %v2235_v37 = vxor.u32 2147483648, %v2229_v19  ;;  %v2050_v48 = vand.u32 2147483647, %v2049_v41  ;;  %v2239_v15 = vsel %vm2237_vm4, %v2238_v60, %v2229_v19  ;;  %v1931_v16 = vsel %vm1920_vm2, nan, %v1930_v55 }
 0x382   : > { %vm2345_vm10 = vcmp.lt.s32.totalorder %v2344_v11, 0  ;;  %v2346_v30 = vsub.s32 0, %v2344_v11  ;;  %vm1934_vm13 = vcmp.lt.s32.totalorder %v9288_v2, 0  ;;  %v9289_v53 = vand.u32 2147483647, %v9288_v2 }
 0x383   : > { %v2236_v25 = vsel %vm2234_vm6, %v2221_v18, %v2235_v37  ;;  %v2053_v21 = vmul.f32 %v2052_v22, %v2050_v48  ;;  %v2336_v38 = vadd.s32 %v7376_v44, %v7374_v36  ;;  %v2056_v1 = vsub.s32 4, %v7343_v5  ;;  %v4645_v22 = vld [vmem:[%s8767_s3 + $0x18] sm:$0xff] }
 0x384   : > { %v2240_v39 = vsel %vm2233_vm11, %v2236_v25, %v2239_v15  ;;  %v2347_v9 = vsel %vm2345_vm10, %v2346_v30, %v2344_v11  ;;  %vm7400_vm14 = vcmp.le.f32.partialorder %v9289_v53, 0.7853982  ;;  %vm2244_vm8 = vcmp.lt.s32.totalorder %v9292_v8, 0 }
 0x385   : > { %v2241_v32 = vsel %vm2230_vm12, nan, %v2240_v39  ;;  %v2054_v50 = vxor.u32 2147483648, %v2053_v21  ;;  %v2348_v10 = vclz %v2347_v9  ;;  %v9293_v58 = vand.u32 2147483647, %v9292_v8 }
 0x386   : > { %v3022_v59 = vpack.c.bf16 %v2241_v32, %v1931_v16  ;;  %v2057_v29 = vsel %vm1934_vm13, %v2056_v1, %v7343_v5  ;;  %v2366_v57 = vsub.s32 4, %v7390_v47  ;;  %vm2075_vm4 = vweird.f32 %v9288_v2 }
 0x387   : > { %v2055_v3 = vsel %vm1934_vm13, %v2054_v50, %v2053_v21  ;;  %v4574_v40 = vadd.s32 4294967294, %v2348_v10  ;;  %vm7422_vm3 = vcmp.le.f32.partialorder %v9293_v58, 0.7853982  ;;  %v2059_v19 = vsel %vm7400_vm14, 0, %v2057_v29 }
 0x388   : > { %3074 = vmatpush.bf16.msrb.mxu0 %v3022_v59  ;;  %v2058_v26 = vsel %vm7400_vm14, %v9288_v2, %v2055_v3  ;;  %v2367_v28 = vsel %vm2244_vm8, %v2366_v57, %v7390_v47  ;;  %v2076_v5 = vadd.s32 3, %v2059_v19  ;;  %vm2385_vm12 = vweird.f32 %v9292_v8 }
 0x389   : > { %v2060_v13 = vmul.f32 %v2058_v26, %v2058_v26  ;;  %vm4575_vm0 = vcmp.lt.s32.totalorder %v4574_v40, 0  ;;  %v2369_v25 = vsel %vm7422_vm3, 0, %v2367_v28  ;;  %v9299_v58 = vmov 2131351028  }
 0x38a   : > { %v2351_v54 = vsel %vm4575_vm0, 0, %v4574_v40  ;;  %v2077_v32 = vand.u32 3, %v2076_v5  ;;  %v2386_v59 = vadd.s32 3, %v2369_v25 }
 0x38b   : > { %v2068_v52 = vmul.f32 -0.00019511016, %v2060_v13  ;;  %v2352_v6 = vsub.s32 32, %v2351_v54  ;;  %v2356_v63 = vsub.s32 4294967266, %v2351_v54  ;;  %v2353_v49 = vshll.u32 %v2344_v11, %v2351_v54  ;;  %4604 = vmatmul.msk.bf16.vlgmr.msrb.gmra.mxu0 %vm1732_vm9, %v7414_v31 }
 0x38c   : > { %v2061_v7 = vmul.f32 -0.001358992, %v2060_v13  ;;  %vm2079_vm15 = vcmp.eq.s32.totalorder %v2077_v32, 0  ;;  %v2387_v3 = vand.u32 3, %v2386_v59  ;;  %vm2082_vm1 = vcmp.eq.s32.totalorder %v2077_v32, 2 }
 0x38d   : > { %v2069_v45 = vadd.f32 0.008332121, %v2068_v52  ;;  %v2354_v46 = vshrl.u32 %v2336_v38, %v2352_v6  ;;  %v2357_v35 = vadd.s32 127, %v2356_v63  ;;  %vm2078_vm2 = vcmp.lt.s32.totalorder %v2077_v32, 2 }
 0x38e   : > { %v2062_v61 = vadd.f32 0.041655596, %v2061_v7  ;;  %vm2389_vm5 = vcmp.eq.s32.totalorder %v2387_v3, 0  ;;  %vm2392_vm7 = vcmp.eq.s32.totalorder %v2387_v3, 2  ;;  %vm2388_vm6 = vcmp.lt.s32.totalorder %v2387_v3, 2  ;;  %v3034_v7 = vpop.permute.xlu1 %3033 }
 0x38f   : > { %v2355_v62 = vor.u32 %v2354_v46, %v2353_v49  ;;  %v2358_v17 = vshll.u32 %v2357_v35, 23  ;;  %v2070_v56 = vmul.f32 %v2069_v45, %v2060_v13 }
 0x390   : > { %v2063_v34 = vmul.f32 %v2062_v61, %v2060_v13 }
 0x391   : > { %v2359_v23 = vor.u32 4788187, %v2358_v17  ;;  %v2362_v24 = vcvt.s32.f32 %v2355_v62  ;;  %v2071_v36 = vadd.f32 -0.16666654, %v2070_v56 }
 0x392   : > { %v2064_v0 = vadd.f32 -0.4999988, %v2063_v34 }
 0x393   : > { %v2360_v33 = vand.u32 2147483647, %v2359_v23  ;;  %v2072_v4 = vmul.f32 %v2071_v36, %v2060_v13  ;;  %v7450_v36 = vpop.permute.xlu2 %3043 }
 0x394   : > { %v2065_v37 = vmul.f32 %v2064_v0, %v2060_v13 }
 0x395   : > { %v2363_v44 = vmul.f32 %v2362_v24, %v2360_v33  ;;  %v2073_v60 = vadd.f32 1.0, %v2072_v4 }
 0x396   : > { %v2066_v21 = vadd.f32 1.0, %v2065_v37 }
 0x397   : > { %v2364_v42 = vxor.u32 2147483648, %v2363_v44  ;;  %v2074_v11 = vmul.f32 %v2073_v60, %v2058_v26  ;;  %v9301_v60 = vmov 2475754826  }
 0x398   : > { %v2083_v10 = vxor.u32 2147483648, %v2066_v21 }
 0x399   : > { %v2365_v18 = vsel %vm2244_vm8, %v2364_v42, %v2363_v44  ;;  %v2080_v47 = vxor.u32 2147483648, %v2074_v11 }
 0x39a   : > { %v2368_v51 = vsel %vm7422_vm3, %v9292_v8, %v2365_v18  ;;  %v2084_v52 = vsel %vm2082_vm1, %v2083_v10, %v2074_v11  ;;  %v9298_v8 = vmov 920167782   ;;  %v9300_v18 = vmov 2102212464  }
 0x39b   : > { %v2370_v14 = vmul.f32 %v2368_v51, %v2368_v51  ;;  %4605 = vmatmul.msk.bf16.gmra.mxu0 %vm1732_vm9, %v4645_v22  ;;  %v2081_v26 = vsel %vm2079_vm15, %v2066_v21, %v2080_v47 }
 0x39c   : > { %v2085_v38 = vsel %vm2078_vm2, %v2081_v26, %v2084_v52 }
 0x39d   : > { %v2371_v41 = vmul.f32 -0.001358992, %v2370_v14  ;;  %v2378_v43 = vmul.f32 -0.00019511016, %v2370_v14  ;;  %v2086_v49 = vsel %vm2075_vm4, nan, %v2085_v38 }
 0x39f   : > { %v2372_v55 = vadd.f32 0.041655596, %v2371_v41  ;;  %v2379_v48 = vadd.f32 0.008332121, %v2378_v43 }
 0x3a1   : > { %v2373_v15 = vmul.f32 %v2372_v55, %v2370_v14  ;;  %v2380_v39 = vmul.f32 %v2379_v48, %v2370_v14 }
 0x3a3   : > { %v2374_v30 = vadd.f32 -0.4999988, %v2373_v15  ;;  %v2381_v16 = vadd.f32 -0.16666654, %v2380_v39 }
 0x3a5   : > { %v2375_v50 = vmul.f32 %v2374_v30, %v2370_v14  ;;  %v2382_v9 = vmul.f32 %v2381_v16, %v2370_v14 }
 0x3a7   : > { %v2376_v53 = vadd.f32 1.0, %v2375_v50  ;;  %v2383_v27 = vadd.f32 1.0, %v2382_v9  ;;  %v9304_v9 = vmov 683565275  }
 0x3a9   : > { %v2384_v40 = vmul.f32 %v2383_v27, %v2368_v51  ;;  %v2393_v13 = vxor.u32 2147483648, %v2376_v53  ;;  %v7458_v51 = vpop.permute.xlu2 %3038 }
 0x3ab   : > { %v2390_v54 = vxor.u32 2147483648, %v2384_v40  ;;  %v2394_v63 = vsel %vm2392_vm7, %v2393_v13, %v2384_v40 }
 0x3ad   : > { %v2391_v6 = vsel %vm2389_vm5, %v2376_v53, %v2390_v54 }
 0x3ae   : > { %v2395_v45 = vsel %vm2388_vm6, %v2391_v6, %v2394_v63 }
 0x3af   : > { %v2396_v46 = vsel %vm2385_vm12, nan, %v2395_v45 }
 0x3b0   : > { %v3023_v35 = vpack.c.bf16 %v2396_v46, %v2086_v49 }
 0x3b2   : > { %3093 = vmatpush.bf16.msrb.mxu1 %v3023_v35 }
 0x3b5   : > { %4606 = vmatmul.msk.bf16.vlgmr.msrb.gmra.mxu1 %vm1732_vm9, %v7414_v31  ;;  %v9297_v31 = vmov 1326507024  }
 0x3c5   : > { %4607 = vmatmul.msk.bf16.gmra.mxu1 %vm1732_vm9, %v4645_v22 }
 0x408   : > { %v3076_v62 = vpop.f32.mrf.mxu0 }
 0x409   : > { %v7447_v17 = vadd.f32 %v3076_v62, %v3034_v7 }
 0x40b   : > { %9296 = vst [vmem:[#allocation12_spill] sm:$0xff] %v7447_v17  ;;  %v3108_v56 = vand.u32 2139095040, %v7447_v17  ;;  %v8921_v1 = vand.u32 2147483647, %v7447_v17 }
 0x40d   : > { %v3109_v23 = vshrl.u32 %v3108_v56, 23  ;;  %v3112_v0 = vand.u32 8388607, %v8921_v1 }
 0x40f   : > { %v4608_v2 = vadd.s32 4294967169, %v3109_v23  ;;  %v3113_v21 = vor.u32 8388608, %v3112_v0 }
 0x410   : > { %v3078_v19 = vpop.f32.mrf.mxu0 }
 0x411   : > { %v3115_v61 = vadd.s32 1, %v4608_v2  ;;  %v7466_v55 = vadd.f32 %v3078_v19, %v7458_v51  ;;  %v7477_v27 = vshll.u32 %v3113_v21, 8 }
 0x413   : > { %vm3116_vm11 = vcmp.gt.s32.totalorder %v3115_v61, 0  ;;  %9302 = vst [vmem:[#allocation42_spill] sm:$0xff] %v7466_v55  ;;  %v3418_v25 = vand.u32 2139095040, %v7466_v55  ;;  %v7486_v6 = vand.u32 65535, %v7477_v27  ;;  %v8920_v23 = vand.u32 2147483647, %v7466_v55 }
 0x414   : > { %v3117_v33 = vsel %vm3116_vm11, %v3115_v61, 0  ;;  %9305 = vst [vmem:[#allocation43_spill] sm:$0xff] %v7477_v27 }
 0x415   : > { %v3119_v24 = vand.u32 31, %v3117_v33  ;;  %v3118_v42 = vshrl.u32 %v3117_v33, 5  ;;  %v3419_v30 = vshrl.u32 %v3418_v25, 23  ;;  %9307 = vst [vmem:[#allocation39_spill] sm:$0xff] %v7486_v6 }
 0x417   : > { %v3120_v44 = vsub.s32 32, %v3119_v24  ;;  %v3134_v4 = vshll.u32 %v9298_v8, %v3119_v24  ;;  %v3125_v41 = vshll.u32 %v9301_v60, %v3119_v24  ;;  %v3128_v43 = vshll.u32 %v9299_v58, %v3119_v24 }
 0x418   : > { %v3131_v28 = vshll.u32 %v9300_v18, %v3119_v24  ;;  %vm3140_vm10 = vcmp.lt.s32.totalorder %v3118_v42, 4  ;;  %vm3137_vm13 = vcmp.lt.s32.totalorder %v3118_v42, 1  ;;  %vm3139_vm14 = vcmp.lt.s32.totalorder %v3118_v42, 3 }
 0x419   : > { %v3135_v34 = vshrl.u32 %v9297_v31, %v3120_v44  ;;  %v3126_v20 = vshrl.u32 %v9299_v58, %v3120_v44  ;;  %v3129_v29 = vshrl.u32 %v9300_v18, %v3120_v44  ;;  %v3132_v57 = vshrl.u32 %v9298_v8, %v3120_v44 }
 0x41a   : > { %v3123_v16 = vshrl.u32 %v9301_v60, %v3120_v44  ;;  %v4614_v50 = vadd.s32 4294967169, %v3419_v30  ;;  %v3122_v10 = vshll.u32 %v9304_v9, %v3119_v24  ;;  %vm3138_vm0 = vcmp.lt.s32.totalorder %v3118_v42, 2 }
 0x41b   : > { %v3136_v14 = vor.u32 %v3135_v34, %v3134_v4  ;;  %v3127_v5 = vor.u32 %v3126_v20, %v3125_v41  ;;  %v3130_v22 = vor.u32 %v3129_v29, %v3128_v43  ;;  %v3133_v11 = vor.u32 %v3132_v57, %v3131_v28 }
 0x41c   : > { %v3124_v3 = vor.u32 %v3123_v16, %v3122_v10  ;;  %v3425_v54 = vadd.s32 1, %v4614_v50  ;;  %v3121_v38 = vshrl.u32 %v9304_v9, %v3120_v44  ;;  %v3422_v20 = vand.u32 8388607, %v8920_v23 }
 0x41d   : > { %v3150_v15 = vsel %vm3140_vm10, %v3136_v14, 1326507024  ;;  %v3149_v59 = vsel %vm3137_vm13, %v3127_v5, %v3130_v22  ;;  %v3142_v13 = vsel %vm3140_vm10, %v3130_v22, 2102212464  ;;  %v3146_v52 = vsel %vm3140_vm10, %v3133_v11, 920167782 }
 0x41e   : > { %v3151_v47 = vsel %vm3139_vm14, %v3133_v11, %v3150_v15  ;;  %v3141_v49 = vsel %vm3137_vm13, %v3121_v38, %v3124_v3  ;;  %v3143_v46 = vsel %vm3139_vm14, %v3127_v5, %v3142_v13  ;;  %v3145_v35 = vsel %vm3137_vm13, %v3124_v3, %v3127_v5 }
 0x41f   : > { %v7480_v26 = vsel %vm3138_vm0, %v3149_v59, %v3151_v47  ;;  %vm3426_vm3 = vcmp.gt.s32.totalorder %v3425_v54, 0  ;;  %v7502_v33 = vsel %vm3138_vm0, %v3141_v49, %v3143_v46  ;;  %v7514_v42 = vshrl.u32 %v7477_v27, 16 }
 0x420   : > { %9306 = vst [vmem:[#allocation44_spill] sm:$0xff] %v7480_v26  ;;  %v3157_v63 = vshrl.u32 %v7480_v26, 16  ;;  %v3427_v24 = vsel %vm3426_vm3, %v3425_v54, 0  ;;  %v8924_v44 = vand.u32 65535, %v7480_v26 }
 0x421   : > { %9310 = vst [vmem:[#allocation6_spill] sm:$0xff] %v7502_v33  ;;  %v3429_v0 = vand.u32 31, %v3427_v24  ;;  %v7556_v10 = vshrl.u32 %v3427_v24, 5 }
 0x422   : > { %v7499_v61 = vmul.u32 %v3157_v63, %v7486_v6  ;;  %9311 = vst [vmem:[#allocation31_spill] sm:$0xff] %v7514_v42  ;;  %v7521_v41 = vmul.u32 %v8924_v44, %v7486_v6  ;;  %v7526_v5 = vmul.u32 %v3157_v63, %v7514_v42 }
 0x423   : > { %v7544_v30 = vsub.s32 32, %v3429_v0  ;;  %v3432_v63 = vshll.u32 %v9304_v9, %v3429_v0  ;;  %vm3450_vm7 = vcmp.lt.s32.totalorder %v7556_v10, 4  ;;  %vm3447_vm6 = vcmp.lt.s32.totalorder %v7556_v10, 1 }
 0x424   : > { %9309 = vst [vmem:[#allocation23_spill] sm:$0xff] %v7499_v61  ;;  %v8925_v57 = vshll.u32 %v7499_v61, 16  ;;  %vm3449_vm4 = vcmp.lt.s32.totalorder %v7556_v10, 3  ;;  %vm3448_vm11 = vcmp.lt.s32.totalorder %v7556_v10, 2 }
 0x425   : > { %9312 = vst [vmem:[#allocation36_spill] sm:$0xff] %v7521_v41  ;;  %v3436_v24 = vshrl.u32 %v9299_v58, %v7544_v30 }
 0x426   : > { %9313 = vst [vmem:[#allocation37_spill] sm:$0xff] %v7526_v5  ;;  %v7538_v15 = vadd.s32 %v8925_v57, %v7521_v41 }
 0x428   : > { %9316 = vst [vmem:[#allocation19_spill] sm:$0xff] %v7538_v15 }
 0x432   : > { %v3095_v37 = vpop.f32.mrf.mxu1 }
 0x433   : > { %v7468_v48 = vadd.f32 %v3095_v37, %v3034_v7  ;;  %v3147_v7 = vsel %vm3139_vm14, %v3130_v22, %v3146_v52  ;;  %v3423_v37 = vor.u32 8388608, %v3422_v20  ;;  %v3435_v20 = vshll.u32 %v9301_v60, %v3429_v0 }
 0x434   : > { %v7496_v2 = vsel %vm3138_vm0, %v3145_v35, %v3147_v7 }
 0x435   : > { %9303 = vst [vmem:[#allocation33_spill] sm:$0xff] %v7468_v48  ;;  %v3263_v39 = vand.u32 2139095040, %v7468_v48  ;;  %v8919_v62 = vand.u32 2147483647, %v7468_v48  ;;  %v3179_v29 = vshrl.u32 %v7496_v2, 16 }
 0x436   : > { %9308 = vst [vmem:[#allocation24_spill] sm:$0xff] %v7496_v2 }
 0x437   : > { %v3264_v32 = vshrl.u32 %v3263_v39, 23  ;;  %v3267_v34 = vand.u32 8388607, %v8919_v62  ;;  %v7530_v11 = vmul.u32 %v3179_v29, %v7486_v6  ;;  %v7541_v39 = vmul.u32 %v3179_v29, %v7514_v42 }
 0x438   : > { %v3438_v29 = vshll.u32 %v9299_v58, %v3429_v0 }
 0x439   : > { %v4611_v53 = vadd.s32 4294967169, %v3264_v32  ;;  %v3268_v43 = vor.u32 8388608, %v3267_v34  ;;  %9314 = vst [vmem:[#allocation53_spill] sm:$0xff] %v7530_v11  ;;  %v3444_v34 = vshll.u32 %v9298_v8, %v3429_v0 }
 0x43a   : > { %v3097_v14 = vpop.f32.mrf.mxu1  ;;  %9317 = vst [vmem:[#allocation40_spill] sm:$0xff] %v7541_v39 }
 0x43b   : > { %v3270_v40 = vadd.s32 1, %v4611_v53  ;;  %v7533_v25 = vadd.f32 %v3097_v14, %v7458_v51  ;;  %v7554_v50 = vshll.u32 %v3268_v43, 8  ;;  %v7558_v53 = vshll.u32 %v3423_v37, 8 }
 0x43c   : > { %v3442_v14 = vshrl.u32 %v9298_v8, %v7544_v30 }
 0x43d   : > { %vm3271_vm8 = vcmp.gt.s32.totalorder %v3270_v40, 0  ;;  %9315 = vst [vmem:[#allocation8_spill] sm:$0xff] %v7533_v25  ;;  %v3573_v52 = vand.u32 2139095040, %v7533_v25 }
 0x43e   : > { %v3272_v45 = vsel %vm3271_vm8, %v3270_v40, 0  ;;  %9318 = vst [vmem:[#allocation10_spill] sm:$0xff] %v7554_v50 }
 0x43f   : > { %v3274_v56 = vand.u32 31, %v3272_v45  ;;  %v7546_v16 = vshrl.u32 %v3272_v45, 5  ;;  %9319 = vst [vmem:[#allocation22_spill] sm:$0xff] %v7558_v53  ;;  %v3445_v45 = vshrl.u32 %v9297_v31, %v7544_v30 }
 0x441   : > { %v7507_v4 = vsub.s32 32, %v3274_v56  ;;  %v3289_v21 = vshll.u32 %v9298_v8, %v3274_v56  ;;  %v3280_v3 = vshll.u32 %v9301_v60, %v3274_v56  ;;  %v3283_v40 = vshll.u32 %v9299_v58, %v3274_v56 }
 0x442   : > { %v3286_v13 = vshll.u32 %v9300_v18, %v3274_v56  ;;  %v3277_v54 = vshll.u32 %v9304_v9, %v3274_v56  ;;  %vm3295_vm15 = vcmp.lt.s32.totalorder %v7546_v16, 4  ;;  %v3439_v56 = vshrl.u32 %v9300_v18, %v7544_v30 }
 0x443   : > { %v3290_v28 = vshrl.u32 %v9297_v31, %v7507_v4  ;;  %v3281_v32 = vshrl.u32 %v9299_v58, %v7507_v4  ;;  %v3284_v51 = vshrl.u32 %v9300_v18, %v7507_v4  ;;  %v3287_v59 = vshrl.u32 %v9298_v8, %v7507_v4 }
 0x444   : > { %v3278_v38 = vshrl.u32 %v9301_v60, %v7507_v4  ;;  %vm3292_vm1 = vcmp.lt.s32.totalorder %v7546_v16, 1  ;;  %vm3294_vm2 = vcmp.lt.s32.totalorder %v7546_v16, 3  ;;  %v3446_v37 = vor.u32 %v3445_v45, %v3444_v34 }
 0x445   : > { %v3291_v47 = vor.u32 %v3290_v28, %v3289_v21  ;;  %v3282_v49 = vor.u32 %v3281_v32, %v3280_v3  ;;  %v3285_v46 = vor.u32 %v3284_v51, %v3283_v40  ;;  %v3288_v35 = vor.u32 %v3287_v59, %v3286_v13  ;;  %v3081_v21 = vpop.f32.mrf.mxu0 }
 0x446   : > { %v3279_v43 = vor.u32 %v3278_v38, %v3277_v54  ;;  %v3433_v28 = vshrl.u32 %v9301_v60, %v7544_v30  ;;  %v3441_v59 = vshll.u32 %v9300_v18, %v3429_v0  ;;  %vm3293_vm5 = vcmp.lt.s32.totalorder %v7546_v16, 2 }
 0x447   : > { %v3305_v7 = vsel %vm3295_vm15, %v3291_v47, 1326507024  ;;  %v3304_v32 = vsel %vm3292_vm1, %v3282_v49, %v3285_v46  ;;  %v3574_v47 = vshrl.u32 %v3573_v52, 23  ;;  %v3301_v3 = vsel %vm3295_vm15, %v3288_v35, 920167782 }
 0x448   : > { %v3306_v51 = vsel %vm3294_vm2, %v3288_v35, %v3305_v7  ;;  %v3437_v40 = vor.u32 %v3436_v24, %v3435_v20  ;;  %v3440_v13 = vor.u32 %v3439_v56, %v3438_v29  ;;  %v3443_v54 = vor.u32 %v3442_v14, %v3441_v59 }
 0x449   : > { %v4617_v38 = vadd.s32 4294967169, %v3574_v47  ;;  %v7596_v45 = vadd.f32 %v3081_v21, %v7450_v36  ;;  %v3276_v7 = vshrl.u32 %v9304_v9, %v7507_v4  ;;  %v7602_v0 = vsel %vm3293_vm5, %v3304_v32, %v3306_v51 }
 0x44a   : > { %9320 = vst [vmem:[#allocation49_spill] sm:$0xff] %v7602_v0  ;;  %v3460_v52 = vsel %vm3450_vm7, %v3446_v37, 1326507024  ;;  %v8918_v35 = vand.u32 2147483647, %v7533_v25  ;;  %v3300_v56 = vsel %vm3292_vm1, %v3279_v43, %v3282_v49  ;;  %v3434_v34 = vor.u32 %v3433_v28, %v3432_v63 }
 0x44b   : > { %v3297_v24 = vsel %vm3295_vm15, %v3285_v46, 2102212464  ;;  %v3580_v20 = vadd.s32 1, %v4617_v38  ;;  %v3302_v4 = vsel %vm3294_vm2, %v3285_v46, %v3301_v3  ;;  %v3728_v29 = vand.u32 2139095040, %v7596_v45 }
 0x44c   : > { %v3312_v14 = vshrl.u32 %v7602_v0, 16  ;;  %v3456_v37 = vsel %vm3450_vm7, %v3443_v54, 920167782  ;;  %v3459_v21 = vsel %vm3447_vm6, %v3437_v40, %v3440_v13  ;;  %v3461_v63 = vsel %vm3449_vm4, %v3443_v54, %v3460_v52 }
 0x44d   : > { %v7624_v28 = vand.u32 65535, %v7554_v50  ;;  %v7627_v46 = vand.u32 65535, %v7558_v53  ;;  %vm3581_vm12 = vcmp.gt.s32.totalorder %v3580_v20, 0  ;;  %v3729_v32 = vshrl.u32 %v3728_v29, 23 }
 0x44e   : > { %v3296_v51 = vsel %vm3292_vm1, %v3276_v7, %v3279_v43  ;;  %v3298_v59 = vsel %vm3294_vm2, %v3282_v49, %v3297_v24  ;;  %v7635_v47 = vsel %vm3293_vm5, %v3300_v56, %v3302_v4  ;;  %v3455_v3 = vsel %vm3447_vm6, %v3434_v34, %v3437_v40 }
 0x44f   : > { %9321 = vst [vmem:[#allocation21_spill] sm:$0xff] %v7624_v28  ;;  %v3457_v54 = vsel %vm3449_vm4, %v3440_v13, %v3456_v37  ;;  %v7644_v38 = vsel %vm3448_vm11, %v3459_v21, %v3461_v63  ;;  %v3577_v43 = vand.u32 8388607, %v8918_v35  ;;  %v7649_v49 = vmul.u32 %v3312_v14, %v7624_v28  ;;  %v3100_v21 = vpop.f32.mrf.mxu1 }
 0x450   : > { %9322 = vst [vmem:[#allocation7_spill] sm:$0xff] %v7627_v46  ;;  %v3452_v7 = vsel %vm3450_vm7, %v3440_v13, 2102212464  ;;  %v7654_v52 = vshrl.u32 %v7558_v53, 16  ;;  %v3582_v24 = vsel %vm3581_vm12, %v3580_v20, 0  ;;  %v7658_v56 = vsel %vm3293_vm5, %v3296_v51, %v3298_v59 }
 0x451   : > { %9323 = vst [vmem:[#allocation14_spill] sm:$0xff] %v7635_v47  ;;  %v8922_v4 = vand.u32 65535, %v7602_v0  ;;  %v3431_v29 = vshrl.u32 %v9304_v9, %v7544_v30  ;;  %v4620_v37 = vadd.s32 4294967169, %v3729_v32  ;;  %v7664_v63 = vshrl.u32 %v7554_v50, 16 }
 0x452   : > { %9324 = vst [vmem:[#allocation15_spill] sm:$0xff] %v7644_v38  ;;  %v3334_v13 = vshrl.u32 %v7635_v47, 16  ;;  %v7669_v35 = vsel %vm3448_vm11, %v3455_v3, %v3457_v54  ;;  %v3467_v16 = vshrl.u32 %v7644_v38, 16  ;;  %v3453_v51 = vsel %vm3449_vm4, %v3437_v40, %v3452_v7 }
 0x453   : > { %9325 = vst [vmem:[#allocation45_spill] sm:$0xff] %v7649_v49  ;;  %v3451_v20 = vsel %vm3447_vm6, %v3431_v29, %v3434_v34  ;;  %v3578_v30 = vor.u32 8388608, %v3577_v43  ;;  %v3584_v32 = vand.u32 31, %v3582_v24  ;;  %v8923_v59 = vshll.u32 %v7649_v49, 16 }
 0x454   : > { %9326 = vst [vmem:[#allocation41_spill] sm:$0xff] %v7654_v52  ;;  %v7681_v3 = vadd.f32 %v3100_v21, %v7450_v36  ;;  %v7686_v54 = vmul.u32 %v8922_v4, %v7624_v28  ;;  %v7689_v34 = vmul.u32 %v3312_v14, %v7664_v63  ;;  %v3489_v40 = vshrl.u32 %v7669_v35, 16 }
 0x455   : > { %9327 = vst [vmem:[#allocation28_spill] sm:$0xff] %v7658_v56  ;;  %v3735_v43 = vadd.s32 1, %v4620_v37  ;;  %v7693_v7 = vmul.u32 %v3334_v13, %v7624_v28  ;;  %v7697_v29 = vsel %vm3448_vm11, %v3451_v20, %v3453_v51  ;;  %v8926_v36 = vand.u32 65535, %v7644_v38 }
 0x456   : > { %9328 = vst [vmem:[#allocation32_spill] sm:$0xff] %v7664_v63  ;;  %v7701_v21 = vmul.u32 %v3467_v16, %v7627_v46  ;;  %v7704_v23 = vmul.u32 %v3334_v13, %v7664_v63  ;;  %v3585_v14 = vsub.s32 32, %v3584_v32  ;;  %v7706_v1 = vshll.u32 %v3578_v30, 8 }
 0x457   : > { %9329 = vst [vmem:[#allocation30_spill] sm:$0xff] %v7669_v35  ;;  %vm3736_vm10 = vcmp.gt.s32.totalorder %v3735_v43, 0  ;;  %v7711_v37 = vadd.s32 %v8923_v59, %v7686_v54  ;;  %v8935_v10 = vand.u32 2147483647, %v7596_v45  ;;  %v8938_v51 = vand.u32 2147483647, %v7681_v3 }
 0x458   : > { %9330 = vst [vmem:[#allocation35_spill] sm:$0xff] %v7681_v3  ;;  %v3737_v20 = vsel %vm3736_vm10, %v3735_v43, 0  ;;  %v7717_v4 = vmul.u32 %v3489_v40, %v7627_v46  ;;  %v7720_v13 = vmul.u32 %v3489_v40, %v7654_v52  ;;  %v7727_v19 = vmul.u32 %v8926_v36, %v7627_v46 }
 0x459   : > { %9331 = vst [vmem:[#allocation38_spill] sm:$0xff] %v7686_v54  ;;  %v7730_v43 = vmul.u32 %v3467_v16, %v7654_v52  ;;  %v7733_v62 = vshrl.u32 %v3582_v24, 5  ;;  %v3597_v22 = vshrl.u32 %v9298_v8, %v3585_v14  ;;  %v3600_v40 = vshrl.u32 %v9297_v31, %v3585_v14 }
 0x45a   : > { %9332 = vst [vmem:[#allocation5_spill] sm:$0xff] %v7689_v34  ;;  %v7738_v44 = vand.u32 65535, %v7706_v1  ;;  %v3739_v30 = vand.u32 31, %v3737_v20  ;;  %v3587_v57 = vshll.u32 %v9304_v9, %v3584_v32  ;;  %v7743_v36 = vand.u32 8388607, %v8935_v10 }
 0x45b   : > { %9333 = vst [vmem:[#allocation20_spill] sm:$0xff] %v7693_v7  ;;  %v3883_v16 = vand.u32 2139095040, %v7681_v3  ;;  %v7748_v24 = vand.u32 8388607, %v8938_v51  ;;  %v3590_v59 = vshll.u32 %v9301_v60, %v3584_v32  ;;  %v3596_v25 = vshll.u32 %v9300_v18, %v3584_v32 }
 0x45c   : > { %9334 = vst [vmem:[#allocation29_spill] sm:$0xff] %v7697_v29  ;;  %v3599_v48 = vshll.u32 %v9298_v8, %v3584_v32  ;;  %v3740_v55 = vsub.s32 32, %v3739_v30  ;;  %v3588_v56 = vshrl.u32 %v9301_v60, %v3585_v14  ;;  %v3591_v50 = vshrl.u32 %v9299_v58, %v3585_v14 }
 0x45d   : > { %9335 = vst [vmem:[#allocation26_spill] sm:$0xff] %v7701_v21  ;;  %v3593_v10 = vshll.u32 %v9299_v58, %v3584_v32  ;;  %vm3602_vm13 = vcmp.lt.s32.totalorder %v7733_v62, 1  ;;  %v3586_v17 = vshrl.u32 %v9304_v9, %v3585_v14  ;;  %v3594_v51 = vshrl.u32 %v9300_v18, %v3585_v14 }
 0x45e   : > { %9336 = vst [vmem:[#allocation25_spill] sm:$0xff] %v7704_v23  ;;  %v3598_v23 = vor.u32 %v3597_v22, %v3596_v25  ;;  %v3601_v47 = vor.u32 %v3600_v40, %v3599_v48  ;;  %v3749_v28 = vshrl.u32 %v9300_v18, %v3740_v55  ;;  %v3754_v7 = vshll.u32 %v9298_v8, %v3739_v30 }
 0x45f   : > { %9337 = vst [vmem:[#allocation52_spill] sm:$0xff] %v7706_v1  ;;  %v3755_v34 = vshrl.u32 %v9297_v31, %v3740_v55  ;;  %v3884_v29 = vshrl.u32 %v3883_v16, 23  ;;  %vm3603_vm14 = vcmp.lt.s32.totalorder %v7733_v62, 2  ;;  %vm3605_vm0 = vcmp.lt.s32.totalorder %v7733_v62, 4 }
 0x460   : > { %9338 = vst [vmem:[#allocation9_spill] sm:$0xff] %v7711_v37  ;;  %v3738_v32 = vshrl.u32 %v3737_v20, 5  ;;  %v3746_v53 = vshrl.u32 %v9299_v58, %v3740_v55  ;;  %v3752_v37 = vshrl.u32 %v9298_v8, %v3740_v55  ;;  %v3589_v0 = vor.u32 %v3588_v56, %v3587_v57 }
 0x461   : > { %9339 = vst [vmem:[#allocation11_spill] sm:$0xff] %v7717_v4  ;;  %v7766_v14 = vor.u32 %v3591_v50, %v3590_v59  ;;  %v3748_v48 = vshll.u32 %v9299_v58, %v3739_v30  ;;  %v3756_v22 = vor.u32 %v3755_v34, %v3754_v7  ;;  %v7769_v25 = vor.u32 %v3594_v51, %v3593_v10 }
 0x462   : > { %9340 = vst [vmem:[#allocation51_spill] sm:$0xff] %v7720_v13  ;;  %v3743_v40 = vshrl.u32 %v9301_v60, %v3740_v55  ;;  %v3745_v16 = vshll.u32 %v9301_v60, %v3739_v30  ;;  %v3751_v63 = vshll.u32 %v9300_v18, %v3739_v30  ;;  %v3611_v20 = vsel %vm3605_vm0, %v3598_v23, 920167782 }
 0x463   : > { %9341 = vst [vmem:[#allocation13_spill] sm:$0xff] %v7727_v19  ;;  %v3615_v13 = vsel %vm3605_vm0, %v3601_v47, 1326507024  ;;  %v3750_v57 = vor.u32 %v3749_v28, %v3748_v48  ;;  %v4623_v50 = vadd.s32 4294967169, %v3884_v29  ;;  %v3742_v56 = vshll.u32 %v9304_v9, %v3739_v30  ;;  %v3083_v29 = vpop.f32.mrf.mxu0  ;;  %v3049_v30 = vpop.permute.xlu0 %3048 }
 0x464   : > { %9342 = vst [vmem:[#allocation27_spill] sm:$0xff] %v7730_v43  ;;  %v3747_v59 = vor.u32 %v3746_v53, %v3745_v16  ;;  %v3753_v34 = vor.u32 %v3752_v37, %v3751_v63  ;;  %vm3760_vm8 = vcmp.lt.s32.totalorder %v3738_v32, 4  ;;  %vm3604_vm3 = vcmp.lt.s32.totalorder %v7733_v62, 3 }
 0x465   : > { %9343 = vst [vmem:[#allocation16_spill] sm:$0xff] %v7733_v62  ;;  %v3610_v7 = vsel %vm3602_vm13, %v3589_v0, %v7766_v14  ;;  %v3733_v10 = vor.u32 8388608, %v7743_v36  ;;  %v3770_v51 = vsel %vm3760_vm8, %v3756_v22, 1326507024  ;;  %v3612_v28 = vsel %vm3604_vm3, %v7769_v25, %v3611_v20 }
 0x466   : > { %9344 = vst [vmem:[#allocation48_spill] sm:$0xff] %v7766_v14  ;;  %v3614_v53 = vsel %vm3602_vm13, %v7766_v14, %v7769_v25  ;;  %v3616_v47 = vsel %vm3604_vm3, %v3598_v23, %v3615_v13  ;;  %v3744_v63 = vor.u32 %v3743_v40, %v3742_v56  ;;  %vm3757_vm15 = vcmp.lt.s32.totalorder %v3738_v32, 1 }
 0x467   : > { %9345 = vst [vmem:[#allocation46_spill] sm:$0xff] %v7769_v25  ;;  %vm3759_vm1 = vcmp.lt.s32.totalorder %v3738_v32, 3  ;;  %v3762_v36 = vsel %vm3760_vm8, %v3750_v57, 2102212464  ;;  %v3890_v37 = vadd.s32 1, %v4623_v50  ;;  %v3741_v48 = vshrl.u32 %v9304_v9, %v3740_v55 }
 0x468   : > { %v3766_v22 = vsel %vm3760_vm8, %v3753_v34, 920167782  ;;  %v3769_v16 = vsel %vm3757_vm15, %v3747_v59, %v3750_v57  ;;  %v3771_v20 = vsel %vm3759_vm1, %v3753_v34, %v3770_v51  ;;  %v7801_v14 = vsel %vm3603_vm14, %v3614_v53, %v3616_v47 }
 0x469   : > { %vm3758_vm2 = vcmp.lt.s32.totalorder %v3738_v32, 2  ;;  %vm3891_vm5 = vcmp.gt.s32.totalorder %v3890_v37, 0  ;;  %v7803_v23 = vadd.f32 %v3083_v29, %v3049_v30  ;;  %v3761_v13 = vsel %vm3757_vm15, %v3741_v48, %v3744_v63  ;;  %v3102_v48 = vpop.f32.mrf.mxu1 }
 0x46a   : > { %v3763_v40 = vsel %vm3759_vm1, %v3747_v59, %v3762_v36  ;;  %v7807_v50 = vshll.u32 %v3733_v10, 8  ;;  %v3892_v55 = vsel %vm3891_vm5, %v3890_v37, 0  ;;  %v3765_v56 = vsel %vm3757_vm15, %v3744_v63, %v3747_v59 }
 0x46b   : > { %v3767_v25 = vsel %vm3759_vm1, %v3750_v57, %v3766_v22  ;;  %v7812_v34 = vsel %vm3758_vm2, %v3769_v16, %v3771_v20  ;;  %v3894_v51 = vand.u32 31, %v3892_v55  ;;  %v9346_v53 = vshll.u32 %v7701_v21, 16 }
 0x46c   : > { %v7821_v29 = vsel %vm3602_vm13, %v3586_v17, %v3589_v0  ;;  %v7825_v10 = vsel %vm3603_vm14, %v3610_v7, %v3612_v28  ;;  %v7828_v59 = vshrl.u32 %v7706_v1, 16  ;;  %v7831_v57 = vsel %vm3758_vm2, %v3761_v13, %v3763_v40 }
 0x46d   : > { %v7817_v47 = vadd.s32 %v9346_v53, %v7727_v19  ;;  %9348 = vst [vmem:[#allocation50_spill] sm:$0xff] %v7821_v29  ;;  %v3888_v63 = vor.u32 8388608, %v7748_v24  ;;  %v3895_v36 = vsub.s32 32, %v3894_v51  ;;  %v4038_v37 = vand.u32 2139095040, %v7803_v23 }
 0x46e   : > { %9349 = vst [vmem:[#allocation18_spill] sm:$0xff] %v7825_v10  ;;  %v7837_v17 = vsel %vm3758_vm2, %v3765_v56, %v3767_v25  ;;  %v8951_v0 = vand.u32 65535, %v7812_v34  ;;  %v3777_v7 = vshrl.u32 %v7812_v34, 16  ;;  %v7845_v24 = vand.u32 65535, %v7807_v50 }
 0x46f   : > { %9347 = vst [vmem:[#allocation47_spill] sm:$0xff] %v7817_v47  ;;  %v7848_v13 = vshrl.u32 %v7807_v50, 16  ;;  %v3910_v25 = vshrl.u32 %v9297_v31, %v3895_v36  ;;  %v7853_v40 = vadd.f32 %v3102_v48, %v3049_v30  ;;  %v3799_v53 = vshrl.u32 %v7837_v17, 16 }
 0x470   : > { %9350 = vst [vmem:[#allocation17_spill] sm:$0xff] %v7828_v59  ;;  %v7857_v16 = vshll.u32 %v3888_v63, 8  ;;  %v4039_v20 = vshrl.u32 %v4038_v37, 23  ;;  %v7862_v22 = vmul.u32 %v8951_v0, %v7845_v24  ;;  %v7865_v28 = vmul.u32 %v3777_v7, %v7845_v24 }
 0x471   : > { %9351 = vst [vmem:[#allocation34_spill] sm:$0xff] %v7853_v40  ;;  %v7868_v32 = vmul.u32 %v3777_v7, %v7848_v13  ;;  %v3909_v30 = vshll.u32 %v9298_v8, %v3894_v51  ;;  %v7871_v48 = vshrl.u32 %v3892_v55, 5  ;;  %v3901_v56 = vshrl.u32 %v9299_v58, %v3895_v36 }
 0x472   : > { %v3904_v63 = vshrl.u32 %v9300_v18, %v3895_v36  ;;  %v3907_v37 = vshrl.u32 %v9298_v8, %v3895_v36  ;;  %v4626_v29 = vadd.s32 4294967169, %v4039_v20  ;;  %v4193_v62 = vand.u32 2139095040, %v7853_v40 }
 0x473   : > { %v3911_v1 = vor.u32 %v3910_v25, %v3909_v30  ;;  %v3898_v10 = vshrl.u32 %v9301_v60, %v3895_v36  ;;  %v3900_v7 = vshll.u32 %v9301_v60, %v3894_v51  ;;  %v3903_v59 = vshll.u32 %v9299_v58, %v3894_v51 }
 0x474   : > { %v3906_v55 = vshll.u32 %v9300_v18, %v3894_v51  ;;  %v7884_v27 = vmul.u32 %v3799_v53, %v7845_v24  ;;  %v3897_v25 = vshll.u32 %v9304_v9, %v3894_v51  ;;  %v4045_v30 = vadd.s32 1, %v4626_v29 }
 0x475   : > { %v7887_v0 = vor.u32 %v3901_v56, %v3900_v7  ;;  %v3905_v20 = vor.u32 %v3904_v63, %v3903_v59  ;;  %vm3915_vm7 = vcmp.lt.s32.totalorder %v7871_v48, 4  ;;  %v9352_v4 = vand.u32 2147483647, %v7803_v23 }
 0x476   : > { %v3908_v54 = vor.u32 %v3907_v37, %v3906_v55  ;;  %v3925_v49 = vsel %vm3915_vm7, %v3911_v1, 1326507024  ;;  %vm4046_vm6 = vcmp.gt.s32.totalorder %v4045_v30, 0  ;;  %v4194_v33 = vshrl.u32 %v4193_v62, 23 }
 0x477   : > { %v4042_v46 = vand.u32 8388607, %v9352_v4  ;;  %v7895_v47 = vmul.u32 %v3799_v53, %v7848_v13  ;;  %v3899_v35 = vor.u32 %v3898_v10, %v3897_v25  ;;  %v7898_v51 = vand.u32 65535, %v7857_v16 }
 0x478   : > { %v7901_v29 = vshrl.u32 %v7857_v16, 16  ;;  %vm3912_vm4 = vcmp.lt.s32.totalorder %v7871_v48, 1  ;;  %vm3914_vm12 = vcmp.lt.s32.totalorder %v7871_v48, 3  ;;  %v4047_v1 = vsel %vm4046_vm6, %v4045_v30, 0 }
 0x479   : > { %v4629_v59 = vadd.s32 4294967169, %v4194_v33  ;;  %v3896_v4 = vshrl.u32 %v9304_v9, %v3895_v36  ;;  %v3924_v62 = vsel %vm3912_vm4, %v7887_v0, %v3905_v20  ;;  %v3926_v56 = vsel %vm3914_vm12, %v3908_v54, %v3925_v49 }
 0x47a   : > { %v4049_v10 = vand.u32 31, %v4047_v1  ;;  %v9353_v53 = vshll.u32 %v7865_v28, 16  ;;  %vm3913_vm11 = vcmp.lt.s32.totalorder %v7871_v48, 2  ;;  %v4043_v37 = vor.u32 8388608, %v4042_v46 }
 0x47b   : > { %v7916_v55 = vsel %vm3912_vm4, %v3896_v4, %v3899_v35  ;;  %v3917_v33 = vsel %vm3915_vm7, %v3905_v20, 2102212464  ;;  %v3920_v36 = vsel %vm3912_vm4, %v3899_v35, %v7887_v0  ;;  %v3921_v49 = vsel %vm3915_vm7, %v3908_v54, 920167782 }
 0x47c   : > { %v7912_v63 = vadd.s32 %v9353_v53, %v7862_v22  ;;  %v4050_v25 = vsub.s32 32, %v4049_v10  ;;  %v7925_v30 = vsel %vm3913_vm11, %v3924_v62, %v3926_v56  ;;  %v4048_v53 = vshrl.u32 %v4047_v1, 5 }
 0x47d   : > { %v4200_v43 = vadd.s32 1, %v4629_v59  ;;  %v4055_v46 = vshll.u32 %v9301_v60, %v4049_v10  ;;  %v4058_v7 = vshll.u32 %v9299_v58, %v4049_v10  ;;  %v4061_v35 = vshll.u32 %v9300_v18, %v4049_v10 }
 0x47e   : > { %v4056_v4 = vshrl.u32 %v9299_v58, %v4050_v25  ;;  %v4059_v38 = vshrl.u32 %v9300_v18, %v4050_v25  ;;  %v4062_v52 = vshrl.u32 %v9298_v8, %v4050_v25  ;;  %v4064_v54 = vshll.u32 %v9298_v8, %v4049_v10 }
 0x47f   : > { %v4065_v39 = vshrl.u32 %v9297_v31, %v4050_v25  ;;  %v3922_v1 = vsel %vm3914_vm12, %v3905_v20, %v3921_v49  ;;  %v4053_v59 = vshrl.u32 %v9301_v60, %v4050_v25  ;;  %vm4067_vm10 = vcmp.lt.s32.totalorder %v4048_v53, 1 }
 0x480   : > { %v4057_v62 = vor.u32 %v4056_v4, %v4055_v46  ;;  %v4060_v56 = vor.u32 %v4059_v38, %v4058_v7  ;;  %v4063_v6 = vor.u32 %v4062_v52, %v4061_v35  ;;  %vm4201_vm13 = vcmp.gt.s32.totalorder %v4200_v43, 0 }
 0x481   : > { %v4066_v11 = vor.u32 %v4065_v39, %v4064_v54  ;;  %v3932_v2 = vshrl.u32 %v7925_v30, 16  ;;  %v4052_v19 = vshll.u32 %v9304_v9, %v4049_v10  ;;  %vm4070_vm8 = vcmp.lt.s32.totalorder %v4048_v53, 4 }
 0x482   : > { %v4079_v21 = vsel %vm4067_vm10, %v4057_v62, %v4060_v56  ;;  %v7943_v5 = vsel %vm3913_vm11, %v3920_v36, %v3922_v1  ;;  %vm4069_vm15 = vcmp.lt.s32.totalorder %v4048_v53, 3  ;;  %v4202_v49 = vsel %vm4201_vm13, %v4200_v43, 0 }
 0x483   : > { %v4080_v20 = vsel %vm4070_vm8, %v4066_v11, 1326507024  ;;  %v4054_v38 = vor.u32 %v4053_v59, %v4052_v19  ;;  %vm4068_vm1 = vcmp.lt.s32.totalorder %v4048_v53, 2  ;;  %v7947_v52 = vshll.u32 %v4043_v37, 8 }
 0x484   : > { %v4081_v39 = vsel %vm4069_vm15, %v4063_v6, %v4080_v20  ;;  %v8978_v7 = vand.u32 65535, %v7925_v30  ;;  %v4076_v10 = vsel %vm4070_vm8, %v4063_v6, 920167782  ;;  %v4204_v4 = vand.u32 31, %v4202_v49 }
 0x485   : > { %v7952_v46 = vsel %vm4068_vm1, %v4079_v21, %v4081_v39  ;;  %v7957_v36 = vsel %vm3914_vm12, %v7887_v0, %v3917_v33  ;;  %v7960_v19 = vmul.u32 %v3932_v2, %v7898_v51  ;;  %v3954_v11 = vshrl.u32 %v7943_v5, 16 }
 0x486   : > { %v4072_v43 = vsel %vm4070_vm8, %v4060_v56, 2102212464  ;;  %v4051_v6 = vshrl.u32 %v9304_v9, %v4050_v25  ;;  %v9354_v21 = vand.u32 2147483647, %v7853_v40  ;;  %v4205_v54 = vsub.s32 32, %v4204_v4 }
 0x487   : > { %v4075_v1 = vsel %vm4067_vm10, %v4054_v38, %v4057_v62  ;;  %v4077_v0 = vsel %vm4069_vm15, %v4060_v56, %v4076_v10  ;;  %v7973_v33 = vand.u32 65535, %v7947_v52  ;;  %v4087_v59 = vshrl.u32 %v7952_v46, 16 }
 0x488   : > { %v7968_v35 = vand.u32 8388607, %v9354_v21  ;;  %v9355_v20 = vshll.u32 %v7865_v28, 16  ;;  %v7986_v25 = vmul.u32 %v8978_v7, %v7898_v51  ;;  %v4071_v21 = vsel %vm4067_vm10, %v4051_v6, %v4054_v38 }
 0x489   : > { %v4073_v56 = vsel %vm4069_vm15, %v4057_v62, %v4072_v43  ;;  %v7991_v10 = vshrl.u32 %v7947_v52, 16  ;;  %v7994_v37 = vmul.u32 %v3932_v2, %v7901_v29  ;;  %v8001_v40 = vmul.u32 %v3954_v11, %v7901_v29 }
 0x48a   : > { %vm7979_vm2 = vc.u32 %v7862_v22, %v9355_v20  ;;  %v3937_v22 = vshll.u32 %v7960_v19, 16  ;;  %v7998_v20 = vmul.u32 %v3954_v11, %v7898_v51  ;;  %v8004_v7 = vsel %vm4068_vm1, %v4075_v1, %v4077_v0 }
 0x48b   : > { %v4198_v38 = vor.u32 8388608, %v7968_v35  ;;  %v4220_v62 = vshrl.u32 %v9297_v31, %v4205_v54  ;;  %v9358_v43 = vand.u32 65535, %v7812_v34  ;;  %v8014_v6 = vsel %vm4068_vm1, %v4071_v21, %v4073_v56 }
 0x48c   : > { %v8017_v15 = vmul.u32 %v4087_v59, %v7973_v33  ;;  %v4219_v11 = vshll.u32 %v9298_v8, %v4204_v4  ;;  %v3783_v1 = vshrl.u32 %v7865_v28, 16  ;;  %v8021_v0 = vshrl.u32 %v4202_v49, 5 }
 0x48d   : > { %v8011_v2 = vmul.u32 %v9358_v43, %v7848_v13  ;;  %v4211_v35 = vshrl.u32 %v9299_v58, %v4205_v54  ;;  %v4214_v31 = vshrl.u32 %v9300_v18, %v4205_v54  ;;  %v4217_v34 = vshrl.u32 %v9298_v8, %v4205_v54 }
 0x48e   : > { %v8027_v43 = vadd.s32 %v3937_v22, %v7986_v25  ;;  %v4086_v53 = vand.u32 65535, %v7952_v46  ;;  %v4109_v21 = vshrl.u32 %v8004_v7, 16  ;;  %v4221_v56 = vor.u32 %v4220_v62, %v4219_v11 }
 0x48f   : > { %v4208_v26 = vshrl.u32 %v9301_v60, %v4205_v54  ;;  %v4210_v28 = vshll.u32 %v9301_v60, %v4204_v4  ;;  %v4213_v49 = vshll.u32 %v9299_v58, %v4204_v4  ;;  %v4216_v42 = vshll.u32 %v9300_v18, %v4204_v4 }
 0x490   : > { %v4092_v41 = vshll.u32 %v8017_v15, 16  ;;  %v4108_v8 = vand.u32 65535, %v8004_v7  ;;  %v4207_v46 = vshll.u32 %v9304_v9, %v4204_v4  ;;  %vm4225_vm5 = vcmp.lt.s32.totalorder %v8021_v0, 4 }
 0x491   : > { %v8040_v3 = vor.u32 %v4211_v35, %v4210_v28  ;;  %v4215_v62 = vor.u32 %v4214_v31, %v4213_v49  ;;  %v4218_v11 = vor.u32 %v4217_v34, %v4216_v42  ;;  %v4088_v60 = vmul.u32 %v4086_v53, %v7973_v33 }
 0x492   : > { %v4091_v58 = vmul.u32 %v4087_v59, %v7991_v10  ;;  %v8046_v18 = vmul.u32 %v4109_v21, %v7973_v33  ;;  %v4235_v7 = vsel %vm4225_vm5, %v4221_v56, 1326507024  ;;  %v8051_v61 = vmul.u32 %v4109_v21, %v7991_v10 }
 0x493   : > { %v4206_v4 = vshrl.u32 %v9304_v9, %v4205_v54  ;;  %v4209_v35 = vor.u32 %v4208_v26, %v4207_v46  ;;  %v3784_v42 = vshll.u32 %v8011_v2, 16  ;;  %vm8055_vm7 = vc.u32 %v4088_v60, %v4092_v41 }
 0x494   : > { %vm4222_vm6 = vcmp.lt.s32.totalorder %v8021_v0, 1  ;;  %vm4224_vm4 = vcmp.lt.s32.totalorder %v8021_v0, 3  ;;  %v3787_v59 = vsel %vm7979_vm2, 1, %v9035_v12  ;;  %v4098_v54 = vadd.s32 %v4092_v41, %v4088_v60 }
 0x495   : > { %v4234_v34 = vsel %vm4222_vm6, %v8040_v3, %v4215_v62  ;;  %v4236_v9 = vsel %vm4224_vm4, %v4218_v11, %v4235_v7  ;;  %v3789_v26 = vadd.s32 %v3787_v59, %v7868_v32  ;;  %vm3790_vm12 = vc.u32 %v7912_v63, %v3784_v42 }
 0x496   : > { %v3791_v21 = vsel %vm3790_vm12, 1, %v9035_v12  ;;  %v9361_v56 = vand.u32 65535, %v7837_v17  ;;  %v3804_v39 = vshll.u32 %v7884_v27, 16  ;;  %vm4223_vm10 = vcmp.lt.s32.totalorder %v8021_v0, 2 }
 0x497   : > { %v4231_v49 = vsel %vm4225_vm5, %v4218_v11, 920167782  ;;  %v3793_v46 = vadd.s32 %v3791_v21, %v3789_v26  ;;  %v8084_v41 = vsel %vm4222_vm6, %v4206_v4, %v4209_v35  ;;  %v8088_v63 = vsel %vm4225_vm5, %v4215_v62, 2102212464 }
 0x498   : > { %v3802_v28 = vmul.u32 %v9361_v56, %v7848_v13  ;;  %v9362_v32 = vmov %v9361_v56  ;;  %v8093_v13 = vsel %vm4222_vm6, %v4209_v35, %v8040_v3  ;;  %v8097_v11 = vsel %vm4223_vm10, %v4234_v34, %v4236_v9 }
 0x499   : > { %v3800_v7 = vmul.u32 %v9362_v32, %v7845_v24  ;;  %vm8100_vm13 = vc.u32 %v7986_v25, %v3937_v22  ;;  %v4090_v4 = vmul.u32 %v4086_v53, %v7991_v10  ;;  %v8107_v42 = vsel %vm4224_vm4, %v4215_v62, %v4231_v49 }
 0x49a   : > { %v3806_v24 = vshll.u32 %v3802_v28, 16  ;;  %v8109_v35 = vshll.u32 %v4198_v38, 8  ;;  %v3794_v59 = vadd.s32 %v3793_v46, %v3783_v1  ;;  %v4242_v9 = vshrl.u32 %v8097_v11, 16 }
 0x49b   : > { %vm3808_vm8 = vc.u32 %v3800_v7, %v3804_v39  ;;  %v3810_v60 = vadd.s32 %v3804_v39, %v3800_v7  ;;  %v3785_v25 = vshrl.u32 %v8011_v2, 16  ;;  %v4094_v21 = vshll.u32 %v4090_v4, 16 }
 0x49c   : > { %v3809_v34 = vsel %vm3808_vm8, 1, %v9035_v12  ;;  %v4097_v53 = vsel %vm8055_vm7, 1, %v9035_v12  ;;  %v4112_v38 = vmul.u32 %v4108_v8, %v7991_v10  ;;  %v3805_v1 = vshrl.u32 %v7884_v27, 16 }
 0x49d   : > { %v3811_v22 = vadd.s32 %v3809_v34, %v7895_v47  ;;  %vm3812_vm15 = vc.u32 %v3810_v60, %v3806_v24  ;;  %v3807_v62 = vshrl.u32 %v3802_v28, 16  ;;  %v4099_v39 = vadd.s32 %v4097_v53, %v4091_v58 }
 0x49e   : > { %v3813_v26 = vsel %vm3812_vm15, 1, %v9035_v12  ;;  %v8121_v49 = vadd.s32 %v3794_v59, %v3785_v25  ;;  %vm4100_vm1 = vc.u32 %v4098_v54, %v4094_v21  ;;  %v4110_v47 = vmul.u32 %v4108_v8, %v7973_v33 }
 0x49f   : > { %v3815_v56 = vadd.s32 %v3813_v26, %v3811_v22  ;;  %v4114_v2 = vshll.u32 %v8046_v18, 16  ;;  %v8125_v46 = vadd.s32 %v3810_v60, %v3806_v24  ;;  %v4093_v31 = vshrl.u32 %v8017_v15, 16 }
 0x4a0   : > { %v4101_v7 = vsel %vm4100_vm1, 1, %v9035_v12  ;;  %v4116_v34 = vshll.u32 %v4112_v38, 16  ;;  %v4095_v58 = vshrl.u32 %v4090_v4, 16  ;;  %v9365_v33 = vand.u32 65535, %v7925_v30 }
 0x4a1   : > { %v3816_v32 = vadd.s32 %v3815_v56, %v3805_v1  ;;  %v4103_v10 = vadd.s32 %v4101_v7, %v4099_v39  ;;  %vm4118_vm2 = vc.u32 %v4110_v47, %v4114_v2  ;;  %v4120_v27 = vadd.s32 %v4114_v2, %v4110_v47 }
 0x4a2   : > { %v4119_v59 = vsel %vm4118_vm2, 1, %v9035_v12  ;;  %v3935_v8 = vmul.u32 %v9365_v33, %v7901_v29  ;;  %vm3820_vm5 = vc.u32 %v8121_v49, %v8125_v46  ;;  %v8137_v24 = vand.u32 65535, %v8109_v35 }
 0x4a3   : > { %v3817_v28 = vadd.s32 %v3816_v32, %v3807_v62  ;;  %v4104_v54 = vadd.s32 %v4103_v10, %v4093_v31  ;;  %v4121_v15 = vadd.s32 %v4119_v59, %v8051_v61  ;;  %vm4122_vm7 = vc.u32 %v4120_v27, %v4116_v34 }
 0x4a4   : > { %v4123_v25 = vsel %vm4122_vm7, 1, %v9035_v12  ;;  %v3939_v4 = vshll.u32 %v3935_v8, 16  ;;  %v4115_v26 = vshrl.u32 %v8046_v18, 16  ;;  %v3942_v21 = vsel %vm8100_vm13, 1, %v9035_v12 }
 0x4a5   : > { %v3821_v60 = vadd.s32 1, %v3817_v28  ;;  %v8140_v22 = vadd.s32 %v4104_v54, %v4095_v58  ;;  %v4125_v30 = vadd.s32 %v4123_v25, %v4121_v15  ;;  %v3944_v61 = vadd.s32 %v3942_v21, %v7994_v37 }
 0x4a6   : > { %vm3945_vm6 = vc.u32 %v8027_v43, %v3939_v4  ;;  %v9366_v1 = vand.u32 65535, %v7943_v5  ;;  %v8154_v56 = vmul.u32 %v4242_v9, %v8137_v24  ;;  %v9367_v18 = vmul.u32 %v7807_v50, %v7831_v57 }
 0x4a7   : > { %v3822_v53 = vsel %vm3820_vm5, %v3821_v60, %v3817_v28  ;;  %v4117_v17 = vshrl.u32 %v4112_v38, 16  ;;  %v4126_v47 = vadd.s32 %v4125_v30, %v4115_v26  ;;  %v8159_v2 = vadd.s32 %v4120_v27, %v4116_v34 }
 0x4a8   : > { %v3957_v62 = vmul.u32 %v9366_v1, %v7901_v29  ;;  %v3823_v39 = vadd.s32 %v3822_v53, %v9367_v18  ;;  %v3946_v37 = vsel %vm3945_vm6, 1, %v9035_v12  ;;  %v9368_v43 = vmov %v9366_v1 }
 0x4a9   : > { %v3955_v32 = vmul.u32 %v9368_v43, %v7898_v51  ;;  %v3959_v29 = vshll.u32 %v7998_v20, 16  ;;  %v4127_v7 = vadd.s32 %v4126_v47, %v4117_v17  ;;  %v3938_v10 = vshrl.u32 %v7960_v19, 16 }
 0x4aa   : > { %v3824_v31 = vadd.s32 536870912, %v3823_v39  ;;  %v3948_v28 = vadd.s32 %v3946_v37, %v3944_v61  ;;  %vm4130_vm12 = vc.u32 %v8140_v22, %v8159_v2  ;;  %v3961_v50 = vshll.u32 %v3957_v62, 16 }
 0x4ab   : > { %vm3963_vm13 = vc.u32 %v3955_v32, %v3959_v29  ;;  %v3965_v57 = vadd.s32 %v3959_v29, %v3955_v32  ;;  %v8173_v38 = vsel %vm4223_vm10, %v8093_v13, %v8107_v42  ;;  %v4131_v51 = vadd.s32 1, %v4127_v7 }
 0x4ac   : > { %v8175_v5 = vshrl.u32 %v3824_v31, 30  ;;  %v3964_v34 = vsel %vm3963_vm13, 1, %v9035_v12  ;;  %v4241_v19 = vand.u32 65535, %v8097_v11  ;;  %v3949_v27 = vadd.s32 %v3948_v28, %v3938_v10 }
 0x4ad   : > { %v3966_v58 = vadd.s32 %v3964_v34, %v8001_v40  ;;  %vm3967_vm8 = vc.u32 %v3965_v57, %v3961_v50  ;;  %v4228_v59 = vsel %vm4224_vm4, %v8040_v3, %v8088_v63  ;;  %v8185_v33 = vshrl.u32 %v8109_v35, 16 }
 0x4ae   : > { %v3826_v13 = vshll.u32 %v8175_v5, 30  ;;  %v4132_v42 = vsel %vm4130_vm12, %v4131_v51, %v4127_v7  ;;  %v4247_v54 = vshll.u32 %v8154_v56, 16  ;;  %v9369_v15 = vmul.u32 %v7947_v52, %v8014_v6 }
 0x4af   : > { %v3940_v25 = vshrl.u32 %v3935_v8, 16  ;;  %v3968_v40 = vsel %vm3967_vm8, 1, %v9035_v12  ;;  %v4264_v4 = vshrl.u32 %v8173_v38, 16  ;;  %v3960_v3 = vshrl.u32 %v7998_v20, 16 }
 0x4b0   : > { %v4133_v60 = vadd.s32 %v4132_v42, %v9369_v15  ;;  %v3827_v26 = vsub.s32 %v3823_v39, %v3826_v13  ;;  %v3970_v63 = vadd.s32 %v3968_v40, %v3966_v58  ;;  %v4243_v30 = vmul.u32 %v4241_v19, %v8137_v24 }
 0x4b1   : > { %v8196_v53 = vadd.s32 %v3949_v27, %v3940_v25  ;;  %v8199_v61 = vmul.u32 %v4241_v19, %v8185_v33  ;;  %v3962_v6 = vshrl.u32 %v3957_v62, 16  ;;  %v3919_v1 = vsel %vm3913_vm11, %v7916_v55, %v7957_v36 }
 0x4b2   : > { %v4134_v21 = vadd.s32 536870912, %v4133_v60  ;;  %vm3828_vm4 = vcmp.lt.s32.totalorder %v3827_v26, 0  ;;  %v3829_v52 = vsub.s32 0, %v3827_v26  ;;  %v3971_v8 = vadd.s32 %v3970_v63, %v3960_v3 }
 0x4b3   : > { %v4253_v18 = vadd.s32 %v4247_v54, %v4243_v30  ;;  %v8207_v39 = vadd.s32 %v3965_v57, %v3961_v50  ;;  %v8212_v17 = vsel %vm4223_vm10, %v8084_v41, %v4228_v59  ;;  %vm4251_vm15 = vc.u32 %v4243_v30, %v4247_v54 }
 0x4b4   : > { %v8205_v20 = vshrl.u32 %v4134_v21, 30  ;;  %v3830_v47 = vsel %vm3828_vm4, %v3829_v52, %v3827_v26  ;;  %v3972_v37 = vadd.s32 %v3971_v8, %v3962_v6  ;;  %v4249_v48 = vshll.u32 %v8199_v61, 16 }
 0x4b5   : > { %v3831_v62 = vclz %v3830_v47  ;;  %vm3975_vm1 = vc.u32 %v8196_v53, %v8207_v39  ;;  %v9370_v55 = vshrl.u32 %v7801_v14, 16  ;;  %v3973_v0 = vmul.u32 %v7857_v16, %v3919_v1 }
 0x4b6   : > { %v4136_v43 = vshll.u32 %v8205_v20, 30  ;;  %v8225_v41 = vmul.u32 %v4264_v4, %v8137_v24  ;;  %v3976_v32 = vadd.s32 1, %v3972_v37  ;;  %v4252_v7 = vsel %vm4251_vm15, 1, %v9035_v12 }
 0x4b7   : > { %v8221_v36 = vmul.u32 %v9370_v55, %v7738_v44  ;;  %v4621_v29 = vadd.s32 4294967294, %v3831_v62  ;;  %vm4255_vm11 = vc.u32 %v4253_v18, %v4249_v48  ;;  %v4246_v10 = vmul.u32 %v4242_v9, %v8185_v33 }
 0x4b8   : > { %v8227_v31 = vsub.s32 %v4133_v60, %v4136_v43  ;;  %v4263_v28 = vand.u32 65535, %v8173_v38  ;;  %v4283_v50 = vmul.u32 %v8109_v35, %v8212_v17  ;;  %v3977_v16 = vsel %vm3975_vm1, %v3976_v32, %v3972_v37 }
 0x4b9   : > { %v3819_v57 = vadd.s32 %v8125_v46, %v8121_v49  ;;  %vm4622_vm10 = vcmp.lt.s32.totalorder %v4621_v29, 0  ;;  %v3978_v19 = vadd.s32 %v3977_v16, %v3973_v0  ;;  %v4254_v27 = vadd.s32 %v4252_v7, %v4246_v10 }
 0x4ba   : > { %vm4138_vm2 = vcmp.lt.s32.totalorder %v8227_v31, 0  ;;  %v4139_v51 = vsub.s32 0, %v8227_v31  ;;  %v3834_v34 = vsel %vm4622_vm10, 0, %v4621_v29  ;;  %v4256_v11 = vsel %vm4255_vm11, 1, %v9035_v12 }
 0x4bb   : > { %v3835_v9 = vsub.s32 32, %v3834_v34  ;;  %v3839_v58 = vsub.s32 4294967266, %v3834_v34  ;;  %v4269_v59 = vshll.u32 %v8225_v41, 16  ;;  %vm3727_vm5 = vcmp.lt.s32.totalorder %v7596_v45, 0 }
 0x4bc   : > { %v4140_v38 = vsel %vm4138_vm2, %v4139_v51, %v8227_v31  ;;  %v4268_v49 = vmul.u32 %v4264_v4, %v8185_v33  ;;  %v3979_v13 = vadd.s32 536870912, %v3978_v19  ;;  %v4265_v42 = vmul.u32 %v4263_v28, %v8137_v24 }
 0x4bd   : > { %v4141_v46 = vclz %v4140_v38  ;;  %v3836_v54 = vshll.u32 %v3827_v26, %v3834_v34  ;;  %v3837_v15 = vshrl.u32 %v3819_v57, %v3835_v9  ;;  %v3840_v60 = vadd.s32 127, %v3839_v58 }
 0x4be   : > { %v4267_v25 = vmul.u32 %v4263_v28, %v8185_v33  ;;  %v3849_v40 = vsub.s32 4, %v8175_v5  ;;  %v4129_v3 = vadd.s32 %v8159_v2, %v8140_v22  ;;  %v4258_v30 = vadd.s32 %v4256_v11, %v4254_v27 }
 0x4bf   : > { %v4627_v63 = vadd.s32 4294967294, %v4141_v46  ;;  %v9371_v21 = vand.u32 2147483647, %v7596_v45  ;;  %v3838_v52 = vor.u32 %v3837_v15, %v3836_v54  ;;  %v3841_v24 = vshll.u32 %v3840_v60, 23 }
 0x4c0   : > { %v8256_v26 = vshrl.u32 %v3979_v13, 30  ;;  %vm4273_vm6 = vc.u32 %v4265_v42, %v4269_v59  ;;  %v4248_v33 = vshrl.u32 %v8154_v56, 16  ;;  %v4275_v8 = vadd.s32 %v4269_v59, %v4265_v42 }
 0x4c1   : > { %vm8252_vm7 = vcmp.le.f32.partialorder %v9371_v21, 0.7853982  ;;  %vm4628_vm12 = vcmp.lt.s32.totalorder %v4627_v63, 0  ;;  %v4274_v6 = vsel %vm4273_vm6, 1, %v9035_v12  ;;  %v3842_v22 = vor.u32 4788187, %v3841_v24 }
 0x4c2   : > { %v4144_v2 = vsel %vm4628_vm12, 0, %v4627_v63  ;;  %v3981_v1 = vshll.u32 %v8256_v26, 30  ;;  %v4271_v18 = vshll.u32 %v4267_v25, 16  ;;  %vm4037_vm13 = vcmp.lt.s32.totalorder %v7803_v23, 0 }
 0x4c3   : > { %v3845_v47 = vcvt.s32.f32 %v3838_v52  ;;  %v4145_v37 = vsub.s32 32, %v4144_v2  ;;  %v4149_v62 = vsub.s32 4294967266, %v4144_v2  ;;  %v4259_v43 = vadd.s32 %v4258_v30, %v4248_v33 }
 0x4c4   : > { %v3843_v48 = vand.u32 2147483647, %v3842_v22  ;;  %v3982_v55 = vsub.s32 %v3978_v19, %v3981_v1  ;;  %v4276_v0 = vadd.s32 %v4274_v6, %v4268_v49  ;;  %vm4277_vm8 = vc.u32 %v4275_v8, %v4271_v18 }
 0x4c5   : > { %v4146_v56 = vshll.u32 %v8227_v31, %v4144_v2  ;;  %v4147_v32 = vshrl.u32 %v4129_v3, %v4145_v37  ;;  %v4150_v29 = vadd.s32 127, %v4149_v62  ;;  %v4278_v7 = vsel %vm4277_vm8, 1, %v9035_v12 }
 0x4c6   : > { %v3846_v10 = vmul.f32 %v3845_v47, %v3843_v48  ;;  %v3850_v28 = vsel %vm3727_vm5, %v3849_v40, %v8175_v5  ;;  %v9374_v16 = vand.u32 2147483647, %v7803_v23  ;;  %vm3983_vm15 = vcmp.lt.s32.totalorder %v3982_v55, 0 }
 0x4c7   : > { %v3984_v51 = vsub.s32 0, %v3982_v55  ;;  %v4148_v34 = vor.u32 %v4147_v32, %v4146_v56  ;;  %v4151_v19 = vshll.u32 %v4150_v29, 23  ;;  %v4159_v31 = vsub.s32 4, %v8205_v20 }
 0x4c8   : > { %vm8269_vm4 = vcmp.le.f32.partialorder %v9374_v16, 0.7853982  ;;  %v4250_v27 = vshrl.u32 %v8199_v61, 16  ;;  %v3847_v11 = vxor.u32 2147483648, %v3846_v10  ;;  %v4270_v58 = vshrl.u32 %v8225_v41, 16 }
 0x4c9   : > { %v3985_v9 = vsel %vm3983_vm15, %v3984_v51, %v3982_v55  ;;  %v4280_v38 = vadd.s32 %v4278_v7, %v4276_v0  ;;  %v3852_v5 = vsel %vm8252_vm7, 0, %v3850_v28  ;;  %v4152_v59 = vor.u32 4788187, %v4151_v19  ;;  %v9377_v28 = vld [vmem:[#allocation35_spill] sm:$0xff]  ;;  %v9380_v19 = vld [vmem:[#allocation36_spill] sm:$0xff] }
 0x4ca   : > { %v3986_v49 = vclz %v3985_v9  ;;  %v8278_v46 = vadd.s32 %v4259_v43, %v4250_v27  ;;  %v3848_v13 = vsel %vm3727_vm5, %v3847_v11, %v3846_v10  ;;  %v4272_v42 = vshrl.u32 %v4267_v25, 16  ;;  %v9378_v51 = vld [vmem:[#allocation23_spill] sm:$0xff] }
 0x4cb   : > { %v8282_v54 = vadd.s32 %v4275_v8, %v4271_v18  ;;  %v4281_v15 = vadd.s32 %v4280_v38, %v4270_v58  ;;  %v8287_v61 = vsel %vm8252_vm7, %v7596_v45, %v3848_v13  ;;  %v4153_v41 = vand.u32 2147483647, %v4152_v59 }
 0x4cc   : > { %v4155_v60 = vcvt.s32.f32 %v4148_v34  ;;  %v4624_v40 = vadd.s32 4294967294, %v3986_v49  ;;  %v3853_v3 = vmul.f32 %v8287_v61, %v8287_v61  ;;  %v4160_v63 = vsel %vm4037_vm13, %v4159_v31, %v8205_v20 }
 0x4cd   : > { %v3974_v25 = vadd.s32 %v8207_v39, %v8196_v53  ;;  %v4282_v30 = vadd.s32 %v4281_v15, %v4272_v42  ;;  %v3869_v21 = vadd.s32 3, %v3852_v5  ;;  %vm4285_vm11 = vc.u32 %v8278_v46, %v8282_v54 }
 0x4ce   : > { %v4156_v52 = vmul.f32 %v4155_v60, %v4153_v41  ;;  %vm4625_vm1 = vcmp.lt.s32.totalorder %v4624_v40, 0  ;;  %v3854_v4 = vmul.f32 -0.001358992, %v3853_v3  ;;  %v3861_v24 = vmul.f32 -0.00019511016, %v3853_v3 }
 0x4cf   : > { %v3989_v33 = vsel %vm4625_vm1, 0, %v4624_v40  ;;  %v4286_v6 = vadd.s32 1, %v4282_v30  ;;  %v4162_v22 = vsel %vm8269_vm4, 0, %v4160_v63  ;;  %v3627_v48 = vshll.u32 %v8221_v36, 16 }
 0x4d0   : > { %v4157_v8 = vxor.u32 2147483648, %v4156_v52  ;;  %v3990_v2 = vsub.s32 32, %v3989_v33  ;;  %v3994_v20 = vsub.s32 4294967266, %v3989_v33  ;;  %v3855_v1 = vadd.f32 0.041655596, %v3854_v4 }
 0x4d1   : > { %v3862_v18 = vadd.f32 0.008332121, %v3861_v24  ;;  %v3991_v53 = vshll.u32 %v3982_v55, %v3989_v33  ;;  %v4287_v39 = vsel %vm4285_vm11, %v4286_v6, %v4282_v30  ;;  %vm3882_vm10 = vcmp.lt.s32.totalorder %v9377_v28, 0  ;;  %v9387_v6 = vld [vmem:[#allocation31_spill] sm:$0xff] }
 0x4d2   : > { %v4158_v47 = vsel %vm4037_vm13, %v4157_v8, %v4156_v52  ;;  %v3992_v37 = vshrl.u32 %v3974_v25, %v3990_v2  ;;  %v3995_v62 = vadd.s32 127, %v3994_v20  ;;  %v4288_v43 = vadd.s32 %v4287_v39, %v4283_v50  ;;  %v9388_v8 = vld [vmem:[#allocation44_spill] sm:$0xff] }
 0x4d3   : > { %v3856_v0 = vmul.f32 %v3855_v1, %v3853_v3  ;;  %v3863_v56 = vmul.f32 %v3862_v18, %v3853_v3  ;;  %v8309_v32 = vsel %vm8269_vm4, %v7803_v23, %v4158_v47  ;;  %v8314_v17 = vand.u32 3, %v3869_v21 }
 0x4d4   : > { %v4163_v55 = vmul.f32 %v8309_v32, %v8309_v32  ;;  %v3993_v29 = vor.u32 %v3992_v37, %v3991_v53  ;;  %v3996_v7 = vshll.u32 %v3995_v62, 23  ;;  %v4289_v10 = vadd.s32 536870912, %v4288_v43 }
 0x4d5   : > { %v3857_v16 = vadd.f32 -0.4999988, %v3856_v0  ;;  %v3864_v35 = vadd.f32 -0.16666654, %v3863_v56  ;;  %v4179_v50 = vadd.s32 3, %v4162_v22  ;;  %v9379_v34 = vshll.u32 %v9378_v51, 16 }
 0x4d6   : > { %v9383_v31 = vand.u32 65535, %v7801_v14  ;;  %v4164_v11 = vmul.f32 -0.001358992, %v4163_v55  ;;  %v4171_v9 = vmul.f32 -0.00019511016, %v4163_v55  ;;  %v8334_v13 = vshrl.u32 %v4289_v10, 30 }
 0x4d7   : > { %vm8319_vm2 = vc.u32 %v9380_v19, %v9379_v34  ;;  %v3997_v58 = vor.u32 4788187, %v3996_v7  ;;  %v3858_v38 = vmul.f32 %v3857_v16, %v3853_v3  ;;  %v3865_v5 = vmul.f32 %v3864_v35, %v3853_v3 }
 0x4d8   : > { %v8326_v27 = vmul.u32 %v9383_v31, %v7738_v44  ;;  %v9384_v59 = vand.u32 2147483647, %v9377_v28  ;;  %v4165_v42 = vadd.f32 0.041655596, %v4164_v11  ;;  %v4172_v15 = vadd.f32 0.008332121, %v4171_v9 }
 0x4d9   : > { %v3998_v41 = vand.u32 2147483647, %v3997_v58  ;;  %v4000_v60 = vcvt.s32.f32 %v3993_v29  ;;  %v3866_v40 = vadd.f32 1.0, %v3865_v5  ;;  %vm3872_vm7 = vcmp.eq.s32.totalorder %v8314_v17, 0 }
 0x4da   : > { %vm8330_vm5 = vcmp.le.f32.partialorder %v9384_v59, 0.7853982  ;;  %v4180_v63 = vand.u32 3, %v4179_v50  ;;  %v4291_v25 = vshll.u32 %v8334_v13, 30  ;;  %v4166_v30 = vmul.f32 %v4165_v42, %v4163_v55  ;;  %v9390_v50 = vld [vmem:[#allocation19_spill] sm:$0xff] }
 0x4db   : > { %v4173_v3 = vmul.f32 %v4172_v15, %v4163_v55  ;;  %v4001_v21 = vmul.f32 %v4000_v60, %v3998_v41  ;;  %v4004_v52 = vsub.s32 4, %v8256_v26  ;;  %v3859_v4 = vadd.f32 1.0, %v3858_v38 }
 0x4dc   : > { %v3867_v24 = vmul.f32 %v3866_v40, %v8287_v61  ;;  %vm3871_vm6 = vcmp.lt.s32.totalorder %v8314_v17, 2  ;;  %v8341_v33 = vsub.s32 %v4288_v43, %v4291_v25  ;;  %v9389_v22 = vand.u32 65535, %v9388_v8  ;;  %v9392_v40 = vld [vmem:[#allocation26_spill] sm:$0xff] }
 0x4dd   : > { %vm3875_vm12 = vcmp.eq.s32.totalorder %v8314_v17, 2  ;;  %v4167_v20 = vadd.f32 -0.4999988, %v4166_v30  ;;  %v4174_v1 = vadd.f32 -0.16666654, %v4173_v3  ;;  %v4002_v18 = vxor.u32 2147483648, %v4001_v21 }
 0x4de   : > { %v8346_v2 = vmul.u32 %v9389_v22, %v9387_v6  ;;  %v3873_v53 = vxor.u32 2147483648, %v3867_v24  ;;  %vm4182_vm13 = vcmp.eq.s32.totalorder %v4180_v63, 0  ;;  %vm4293_vm8 = vcmp.lt.s32.totalorder %v8341_v33, 0  ;;  %v9397_v30 = vld [vmem:[#allocation24_spill] sm:$0xff] }
 0x4df   : > { %v4294_v61 = vsub.s32 0, %v8341_v33  ;;  %v4168_v39 = vmul.f32 %v4167_v20, %v4163_v55  ;;  %v4175_v47 = vmul.f32 %v4174_v1, %v4163_v55  ;;  %vm4181_vm4 = vcmp.lt.s32.totalorder %v4180_v63, 2  ;;  %v9400_v20 = vld [vmem:[#allocation39_spill] sm:$0xff] }
 0x4e0   : > { %v4003_v37 = vsel %vm3882_vm10, %v4002_v18, %v4001_v21  ;;  %v4005_v62 = vsel %vm3882_vm10, %v4004_v52, %v8256_v26  ;;  %vm3868_vm15 = vweird.f32 %v7596_v45  ;;  %v3876_v43 = vxor.u32 2147483648, %v3859_v4  ;;  %v9399_v52 = vld [vmem:[#allocation53_spill] sm:$0xff] }
 0x4e1   : > { %vm4178_vm1 = vweird.f32 %v7803_v23  ;;  %v8361_v0 = vsel %vm8330_vm5, %v9377_v28, %v4003_v37  ;;  %v4295_v56 = vsel %vm4293_vm8, %v4294_v61, %v8341_v33  ;;  %v3164_v55 = vshll.u32 %v8346_v2, 16 }
 0x4e2   : > { %v4169_v29 = vadd.f32 1.0, %v4168_v39  ;;  %v4176_v7 = vadd.f32 1.0, %v4175_v47  ;;  %vm4185_vm11 = vcmp.eq.s32.totalorder %v4180_v63, 2  ;;  %v8367_v26 = vmul.f32 %v8361_v0, %v8361_v0 }
 0x4e3   : > { %v3874_v10 = vsel %vm3872_vm7, %v3859_v4, %v3873_v53  ;;  %v4296_v16 = vclz %v4295_v56  ;;  %v3167_v35 = vsel %vm8319_vm2, 1, %v9035_v12  ;;  %vm3170_vm10 = vc.u32 %v9390_v50, %v3164_v55  ;;  %v9403_v50 = vld [vmem:[#allocation40_spill] sm:$0xff] }
 0x4e4   : > { %v4177_v34 = vmul.f32 %v4176_v7, %v8309_v32  ;;  %v4186_v19 = vxor.u32 2147483648, %v4169_v29  ;;  %v4007_v31 = vsel %vm8330_vm5, 0, %v4005_v62  ;;  %v4016_v11 = vmul.f32 -0.00019511016, %v8367_v26  ;;  %v9391_v32 = vld [vmem:[#allocation37_spill] sm:$0xff] }
 0x4e5   : > { %v3877_v9 = vsel %vm3875_vm12, %v3876_v43, %v3867_v24  ;;  %v4284_v58 = vadd.s32 %v8282_v54, %v8278_v46  ;;  %v4630_v38 = vadd.s32 4294967294, %v4296_v16  ;;  %v3163_v57 = vshrl.u32 %v9378_v51, 16  ;;  %v9394_v46 = vld [vmem:[#allocation13_spill] sm:$0xff]  ;;  %v9414_v54 = vld [vmem:[#allocation7_spill] sm:$0xff] }
 0x4e6   : > { %v3878_v5 = vsel %vm3871_vm6, %v3874_v10, %v3877_v9  ;;  %v4183_v59 = vxor.u32 2147483648, %v4177_v34  ;;  %v3169_v42 = vadd.s32 %v3167_v35, %v9391_v32  ;;  %v3171_v49 = vsel %vm3170_vm10, 1, %v9035_v12  ;;  %v9402_v10 = vld [vmem:[#allocation34_spill] sm:$0xff] }
 0x4e7   : > { %v4187_v15 = vsel %vm4185_vm11, %v4186_v19, %v4177_v34  ;;  %v4009_v41 = vmul.f32 -0.001358992, %v8367_v26  ;;  %v4017_v60 = vadd.f32 0.008332121, %v4016_v11  ;;  %vm4631_vm2 = vcmp.lt.s32.totalorder %v4630_v38, 0 }
 0x4e8   : > { %v9393_v25 = vshll.u32 %v9392_v40, 16  ;;  %v4184_v17 = vsel %vm4182_vm13, %v4169_v29, %v4183_v59  ;;  %v4299_v51 = vsel %vm4631_vm2, 0, %v4630_v38  ;;  %v9398_v3 = vand.u32 65535, %v9397_v30 }
 0x4e9   : > { %v3184_v4 = vshll.u32 %v9399_v52, 16  ;;  %v4188_v24 = vsel %vm4181_vm4, %v4184_v17, %v4187_v15  ;;  %v4300_v8 = vsub.s32 32, %v4299_v51  ;;  %v4304_v22 = vsub.s32 4294967266, %v4299_v51 }
 0x4ea   : > { %vm8393_vm5 = vc.u32 %v9394_v46, %v9393_v25  ;;  %v3182_v21 = vmul.u32 %v9398_v3, %v9387_v6  ;;  %v9401_v1 = vmov %v9398_v3  ;;  %v3879_v53 = vsel %vm3868_vm15, nan, %v3878_v5 }
 0x4eb   : > { %v3180_v18 = vmul.u32 %v9401_v1, %v9400_v20  ;;  %v4189_v61 = vsel %vm4178_vm1, nan, %v4188_v24  ;;  %v4314_v39 = vsub.s32 4, %v8334_v13  ;;  %v3173_v47 = vadd.s32 %v3171_v49, %v3169_v42  ;;  %v9410_v24 = vld [vmem:[#allocation27_spill] sm:$0xff] }
 0x4ec   : > { %v4348_v6 = vpack.c.bf16 %v4189_v61, %v3879_v53  ;;  %v4301_v37 = vshll.u32 %v8341_v33, %v4299_v51  ;;  %v4302_v63 = vshrl.u32 %v4284_v58, %v4300_v8  ;;  %v4305_v62 = vadd.s32 127, %v4304_v22 }
 0x4ed   : > { %v4010_v43 = vadd.f32 0.041655596, %v4009_v41  ;;  %v4018_v56 = vmul.f32 %v4017_v60, %v8367_v26  ;;  %v3186_v55 = vshll.u32 %v3182_v21, 16  ;;  %vm3188_vm7 = vc.u32 %v3180_v18, %v3184_v4  ;;  %v9408_v60 = vld [vmem:[#allocation15_spill] sm:$0xff] }
 0x4ee   : > { %4365 = vmatpush.bf16.msrb.mxu2 %v4348_v6  ;;  %v4303_v29 = vor.u32 %v4302_v63, %v4301_v37  ;;  %v4306_v45 = vshll.u32 %v4305_v62, 23  ;;  %v3189_v7 = vsel %vm3188_vm7, 1, %v9035_v12  ;;  %v3190_v23 = vadd.s32 %v3184_v4, %v3180_v18  ;;  %v9411_v18 = vld [vmem:[#allocation30_spill] sm:$0xff]  ;;  %v9416_v6 = vld [vmem:[#allocation11_spill] sm:$0xff] }
 0x4ef   : > { %vm4192_vm6 = vcmp.lt.s32.totalorder %v9402_v10, 0  ;;  %v4024_v16 = vadd.s32 3, %v4007_v31  ;;  %v3174_v35 = vadd.s32 %v3173_v47, %v3163_v57  ;;  %v3191_v34 = vadd.s32 %v3189_v7, %v9403_v50 }
 0x4f0   : > { %v9404_v33 = vand.u32 2147483647, %v9402_v10  ;;  %v4307_v11 = vor.u32 4788187, %v4306_v45  ;;  %v4315_v9 = vsel %vm4192_vm6, %v4314_v39, %v8334_v13  ;;  %vm3192_vm13 = vc.u32 %v3190_v23, %v3186_v55  ;;  %v9407_v13 = vld [vmem:[#allocation41_spill] sm:$0xff]  ;;  %v9419_v45 = vld [vmem:[#allocation38_spill] sm:$0xff] }
 0x4f1   : > { %v4011_v58 = vmul.f32 %v4010_v43, %v8367_v26  ;;  %v4019_v38 = vadd.f32 -0.16666654, %v4018_v56  ;;  %v3165_v31 = vshrl.u32 %v8346_v2, 16  ;;  %v3193_v57 = vsel %vm3192_vm13, 1, %v9035_v12 }
 0x4f2   : > { %vm8418_vm12 = vcmp.le.f32.partialorder %v9404_v33, 0.7853982  ;;  %v4308_v5 = vand.u32 2147483647, %v4307_v11  ;;  %v4310_v59 = vcvt.s32.f32 %v4303_v29  ;;  %v3185_v32 = vshrl.u32 %v9399_v52, 16 }
 0x4f3   : > { %v3195_v42 = vadd.s32 %v3193_v57, %v3191_v34  ;;  %v8429_v49 = vand.u32 3, %v4024_v16  ;;  %v4317_v15 = vsel %vm8418_vm12, 0, %v4315_v9  ;;  %v8433_v41 = vadd.s32 %v3174_v35, %v3165_v31  ;;  %v9422_v9 = vld [vmem:[#allocation43_spill] sm:$0xff] }
 0x4f4   : > { %v9409_v25 = vand.u32 65535, %v9408_v60  ;;  %v4311_v17 = vmul.f32 %v4310_v59, %v4308_v5  ;;  %v3187_v2 = vshrl.u32 %v3182_v21, 16  ;;  %v3477_v30 = vsel %vm8393_vm5, 1, %v9035_v12  ;;  %v9413_v21 = vld [vmem:[#allocation47_spill] sm:$0xff] }
 0x4f5   : > { %v3196_v51 = vadd.s32 %v3195_v42, %v3185_v32  ;;  %v4012_v3 = vadd.f32 -0.4999988, %v4011_v58  ;;  %v8441_v52 = vadd.s32 %v3190_v23, %v3186_v55  ;;  %v3479_v8 = vadd.s32 %v3477_v30, %v9410_v24  ;;  %v9417_v55 = vld [vmem:[#allocation45_spill] sm:$0xff]  ;;  %v9423_v58 = vld [vmem:[#allocation6_spill] sm:$0xff]  ;;  %v9425_v5 = vld [vmem:[#allocation51_spill] sm:$0xff] }
 0x4f6   : > { %v3470_v46 = vmul.u32 %v9409_v25, %v9407_v13  ;;  %v4020_v22 = vmul.f32 %v4019_v38, %v8367_v26  ;;  %v4312_v20 = vxor.u32 2147483648, %v4311_v17  ;;  %v9412_v53 = vand.u32 65535, %v9411_v18 }
 0x4f7   : > { %v3197_v1 = vadd.s32 %v3196_v51, %v3187_v2  ;;  %vm3200_vm8 = vc.u32 %v8433_v41, %v8441_v52  ;;  %v3494_v37 = vshll.u32 %v9416_v6, 16  ;;  %v3473_v43 = vshrl.u32 %v9392_v40, 16 }
 0x4f8   : > { %v3474_v4 = vshll.u32 %v3470_v46, 16  ;;  %v3492_v61 = vmul.u32 %v9412_v53, %v9407_v13  ;;  %v9415_v39 = vmov %v9412_v53  ;;  %v4313_v63 = vsel %vm4192_vm6, %v4312_v20, %v4311_v17  ;;  %v9427_v20 = vld [vmem:[#allocation49_spill] sm:$0xff] }
 0x4f9   : > { %v3490_v47 = vmul.u32 %v9415_v39, %v9414_v54  ;;  %v3201_v62 = vadd.s32 1, %v3197_v1  ;;  %v9418_v29 = vshll.u32 %v9417_v55, 16  ;;  %v8469_v23 = vsel %vm8418_vm12, %v9402_v10, %v4313_v63 }
 0x4fa   : > { %vm3480_vm4 = vc.u32 %v9413_v21, %v3474_v4  ;;  %v3496_v35 = vshll.u32 %v3492_v61, 16  ;;  %v4318_v40 = vmul.f32 %v8469_v23, %v8469_v23  ;;  %v4021_v11 = vadd.f32 1.0, %v4020_v22 }
 0x4fb   : > { %v3481_v56 = vsel %vm3480_vm4, 1, %v9035_v12  ;;  %vm8462_vm15 = vc.u32 %v9419_v45, %v9418_v29  ;;  %vm3498_vm1 = vc.u32 %v3490_v47, %v3494_v37  ;;  %v3202_v50 = vsel %vm3200_vm8, %v3201_v62, %v3197_v1 }
 0x4fc   : > { %v3483_v16 = vadd.s32 %v3481_v56, %v3479_v8  ;;  %v3499_v34 = vsel %vm3498_vm1, 1, %v9035_v12  ;;  %v3500_v33 = vadd.s32 %v3494_v37, %v3490_v47  ;;  %v9424_v38 = vmul.u32 %v9422_v9, %v9423_v58  ;;  %v9430_v9 = vld [vmem:[#allocation22_spill] sm:$0xff]  ;;  %v9431_v58 = vld [vmem:[#allocation29_spill] sm:$0xff] }
 0x4fd   : > { %v3501_v19 = vadd.s32 %v3499_v34, %v9425_v5  ;;  %v4319_v59 = vmul.f32 -0.001358992, %v4318_v40  ;;  %v4326_v32 = vmul.f32 -0.00019511016, %v4318_v40  ;;  %v4334_v42 = vadd.s32 3, %v4317_v15  ;;  %v9426_v15 = vld [vmem:[#allocation32_spill] sm:$0xff] }
 0x4fe   : > { %v3203_v31 = vadd.s32 %v3202_v50, %v9424_v38  ;;  %v3484_v57 = vadd.s32 %v3483_v16, %v3473_v43  ;;  %vm3502_vm11 = vc.u32 %v3500_v33, %v3496_v35  ;;  %v4013_v13 = vmul.f32 %v4012_v3, %v8367_v26  ;;  %v9429_v50 = vld [vmem:[#allocation9_spill] sm:$0xff] }
 0x4ff   : > { %v3475_v25 = vshrl.u32 %v3470_v46, 16  ;;  %v3503_v17 = vsel %vm3502_vm11, 1, %v9035_v12  ;;  %vm4027_vm10 = vcmp.eq.s32.totalorder %v8429_v49, 0  ;;  %v4320_v2 = vadd.f32 0.041655596, %v4319_v59 }
 0x500   : > { %v3204_v60 = vadd.s32 536870912, %v3203_v31  ;;  %v4327_v51 = vadd.f32 0.008332121, %v4326_v32  ;;  %v3495_v30 = vshrl.u32 %v9416_v6, 16  ;;  %v3505_v4 = vadd.s32 %v3503_v17, %v3501_v19 }
 0x501   : > { %v4022_v24 = vmul.f32 %v4021_v11, %v8361_v0  ;;  %v8485_v22 = vadd.s32 %v3484_v57, %v3475_v25  ;;  %v9428_v26 = vand.u32 65535, %v9427_v20  ;;  %v4321_v46 = vmul.f32 %v4320_v2, %v4318_v40  ;;  %v9433_v57 = vld [vmem:[#allocation5_spill] sm:$0xff]  ;;  %v9434_v20 = vld [vmem:[#allocation20_spill] sm:$0xff] }
 0x502   : > { %v8483_v8 = vshrl.u32 %v3204_v60, 30  ;;  %v4328_v1 = vmul.f32 %v4327_v51, %v4318_v40  ;;  %v3497_v18 = vshrl.u32 %v3492_v61, 16  ;;  %v3506_v53 = vadd.s32 %v3505_v4, %v3495_v30 }
 0x503   : > { %v8490_v3 = vmul.u32 %v9428_v26, %v9426_v15  ;;  %v4014_v21 = vadd.f32 1.0, %v4013_v13  ;;  %vm4026_vm2 = vcmp.lt.s32.totalorder %v8429_v49, 2  ;;  %vm4030_vm5 = vcmp.eq.s32.totalorder %v8429_v49, 2 }
 0x504   : > { %v3206_v0 = vshll.u32 %v8483_v8, 30  ;;  %v8495_v54 = vadd.s32 %v3500_v33, %v3496_v35  ;;  %v4322_v39 = vadd.f32 -0.4999988, %v4321_v46  ;;  %v4329_v47 = vadd.f32 -0.16666654, %v4328_v1  ;;  %v9435_v1 = vld [vmem:[#allocation21_spill] sm:$0xff] }
 0x505   : > { %v4335_v6 = vand.u32 3, %v4334_v42  ;;  %v3507_v37 = vadd.s32 %v3506_v53, %v3497_v18  ;;  %v4028_v63 = vxor.u32 2147483648, %v4022_v24  ;;  %v3319_v61 = vshll.u32 %v8490_v3, 16  ;;  %v9436_v18 = vld [vmem:[#allocation14_spill] sm:$0xff] }
 0x506   : > { %v8497_v62 = vsub.s32 %v3203_v31, %v3206_v0  ;;  %vm3510_vm7 = vc.u32 %v8485_v22, %v8495_v54  ;;  %v4323_v43 = vmul.f32 %v4322_v39, %v4318_v40  ;;  %v4330_v56 = vmul.f32 %v4329_v47, %v4318_v40 }
 0x507   : > { %v3511_v29 = vadd.s32 1, %v3507_v37  ;;  %v3322_v45 = vsel %vm8462_vm15, 1, %v9035_v12  ;;  %vm4023_vm6 = vweird.f32 %v9377_v28  ;;  %v4031_v16 = vxor.u32 2147483648, %v4014_v21 }
 0x508   : > { %vm4333_vm12 = vweird.f32 %v9402_v10  ;;  %vm3208_vm13 = vcmp.lt.s32.totalorder %v8497_v62, 0  ;;  %v3209_v35 = vsub.s32 0, %v8497_v62  ;;  %vm3325_vm8 = vc.u32 %v9429_v50, %v3319_v61 }
 0x509   : > { %v4324_v34 = vadd.f32 1.0, %v4323_v43  ;;  %v4331_v33 = vadd.f32 1.0, %v4330_v56  ;;  %vm4336_vm4 = vcmp.lt.s32.totalorder %v4335_v6, 2  ;;  %v3512_v40 = vsel %vm3510_vm7, %v3511_v29, %v3507_v37 }
 0x50a   : > { %v4029_v11 = vsel %vm4027_vm10, %v4014_v21, %v4028_v63  ;;  %v3210_v7 = vsel %vm3208_vm13, %v3209_v35, %v8497_v62  ;;  %v9432_v38 = vmul.u32 %v9430_v9, %v9431_v58  ;;  %v3324_v5 = vadd.s32 %v3322_v45, %v9433_v57  ;;  %v9439_v35 = vld [vmem:[#allocation17_spill] sm:$0xff]  ;;  %v9443_v9 = vld [vmem:[#allocation18_spill] sm:$0xff] }
 0x50b   : > { %v4332_v19 = vmul.f32 %v4331_v33, %v8469_v23  ;;  %v4341_v59 = vxor.u32 2147483648, %v4324_v34  ;;  %v3211_v32 = vclz %v3210_v7  ;;  %v3326_v42 = vsel %vm3325_vm8, 1, %v9035_v12 }
 0x50c   : > { %v3513_v31 = vadd.s32 %v3512_v40, %v9432_v38  ;;  %v4032_v13 = vsel %vm4030_vm5, %v4031_v16, %v4022_v24  ;;  %vm4337_vm15 = vcmp.eq.s32.totalorder %v4335_v6, 0  ;;  %vm4340_vm1 = vcmp.eq.s32.totalorder %v4335_v6, 2 }
 0x50d   : > { %v4033_v25 = vsel %vm4026_vm2, %v4029_v11, %v4032_v13  ;;  %v4338_v17 = vxor.u32 2147483648, %v4332_v19  ;;  %v3199_v2 = vadd.s32 %v8441_v52, %v8433_v41  ;;  %v4609_v51 = vadd.s32 4294967294, %v3211_v32  ;;  %v9441_v11 = vld [vmem:[#allocation25_spill] sm:$0xff] }
 0x50e   : > { %v3514_v60 = vadd.s32 536870912, %v3513_v31  ;;  %v3318_v23 = vshrl.u32 %v9417_v55, 16  ;;  %v3328_v4 = vadd.s32 %v3326_v42, %v3324_v5  ;;  %v3339_v26 = vshll.u32 %v9434_v20, 16 }
 0x50f   : > { %v4339_v46 = vsel %vm4337_vm15, %v4324_v34, %v4338_v17  ;;  %v4342_v24 = vsel %vm4340_vm1, %v4341_v59, %v4332_v19  ;;  %vm4610_vm11 = vcmp.lt.s32.totalorder %v4609_v51, 0  ;;  %v9437_v53 = vand.u32 65535, %v9436_v18 }
 0x510   : > { %v8525_v30 = vshrl.u32 %v3514_v60, 30  ;;  %v4343_v21 = vsel %vm4336_vm4, %v4339_v46, %v4342_v24  ;;  %v3214_v0 = vsel %vm4610_vm11, 0, %v4609_v51  ;;  %v4034_v55 = vsel %vm4023_vm6, nan, %v4033_v25 }
 0x511   : > { %v3335_v49 = vmul.u32 %v9437_v53, %v9435_v1  ;;  %v9438_v52 = vmov %v9437_v53  ;;  %v4344_v47 = vsel %vm4333_vm12, nan, %v4343_v21  ;;  %v3215_v37 = vsub.s32 32, %v3214_v0 }
 0x512   : > { %v3516_v41 = vshll.u32 %v8525_v30, 30  ;;  %v3337_v39 = vmul.u32 %v9438_v52, %v9426_v15  ;;  %v3219_v63 = vsub.s32 4294967266, %v3214_v0  ;;  %v4349_v61 = vpack.c.bf16 %v4344_v47, %v4034_v55 }
 0x513   : > { %v3329_v6 = vadd.s32 %v3328_v4, %v3318_v23  ;;  %vm3343_vm10 = vc.u32 %v3335_v49, %v3339_v26  ;;  %v3216_v56 = vshll.u32 %v8497_v62, %v3214_v0  ;;  %v3217_v29 = vshrl.u32 %v3199_v2, %v3215_v37  ;;  %v9442_v62 = vld [vmem:[#allocation12_spill] sm:$0xff] }
 0x514   : > { %v8541_v43 = vsub.s32 %v3513_v31, %v3516_v41  ;;  %v3220_v45 = vadd.s32 127, %v3219_v63  ;;  %v3344_v16 = vsel %vm3343_vm10, 1, %v9035_v12  ;;  %4378 = vmatpush.bf16.msrb.mxu3 %v4349_v61  ;;  %v3341_v10 = vshll.u32 %v3337_v39, 16 }
 0x515   : > { %v3345_v15 = vadd.s32 %v3339_v26, %v3335_v49  ;;  %v9440_v50 = vshrl.u32 %v7801_v14, 16  ;;  %v3218_v33 = vor.u32 %v3217_v29, %v3216_v56  ;;  %v3346_v7 = vadd.s32 %v3344_v16, %v9441_v11 }
 0x516   : > { %vm3518_vm2 = vcmp.lt.s32.totalorder %v8541_v43, 0  ;;  %v3519_v28 = vsub.s32 0, %v8541_v43  ;;  %v3221_v40 = vshll.u32 %v3220_v45, 23  ;;  %vm3107_vm5 = vcmp.lt.s32.totalorder %v9442_v62, 0 }
 0x517   : > { %v3626_v34 = vmul.u32 %v9440_v50, %v9439_v35  ;;  %v9444_v58 = vshrl.u32 %v9443_v9, 16  ;;  %v3320_v57 = vshrl.u32 %v8490_v3, 16  ;;  %vm3347_vm7 = vc.u32 %v3345_v15, %v3341_v10 }
 0x518   : > { %v3520_v31 = vsel %vm3518_vm2, %v3519_v28, %v8541_v43  ;;  %vm3631_vm6 = vc.u32 %v8326_v27, %v3627_v48  ;;  %v3222_v5 = vor.u32 4788187, %v3221_v40  ;;  %v3348_v59 = vsel %vm3347_vm7, 1, %v9035_v12  ;;  %v9451_v28 = vld [vmem:[#allocation10_spill] sm:$0xff] }
 0x519   : > { %v8555_v38 = vmul.u32 %v9444_v58, %v7738_v44  ;;  %v3521_v19 = vclz %v3520_v31  ;;  %v3633_v32 = vadd.s32 %v3627_v48, %v8326_v27  ;;  %v8566_v42 = vadd.s32 %v3329_v6, %v3320_v57 }
 0x51a   : > { %v3340_v13 = vshrl.u32 %v9434_v20, 16  ;;  %v3350_v60 = vadd.s32 %v3348_v59, %v3346_v7  ;;  %v3223_v25 = vand.u32 2147483647, %v3222_v5  ;;  %v3225_v3 = vcvt.s32.f32 %v3218_v33 }
 0x51b   : > { %v4615_v17 = vadd.s32 4294967294, %v3521_v19  ;;  %v3342_v2 = vshrl.u32 %v3337_v39, 16  ;;  %v8569_v51 = vadd.s32 %v3345_v15, %v3341_v10  ;;  %v9445_v4 = vand.u32 65535, %v7801_v14  ;;  %v9452_v10 = vld [vmem:[#allocation28_spill] sm:$0xff] }
 0x51c   : > { %v3351_v23 = vadd.s32 %v3350_v60, %v3340_v13  ;;  %v3632_v46 = vsel %vm3631_vm6, 1, %v9035_v12  ;;  %v9446_v48 = vand.u32 2147483647, %v9442_v62  ;;  %v3226_v20 = vmul.f32 %v3225_v3, %v3223_v25  ;;  %v9456_v25 = vld [vmem:[#allocation46_spill] sm:$0xff] }
 0x51d   : > { %v8574_v26 = vmul.u32 %v9445_v4, %v9439_v35  ;;  %v3509_v24 = vadd.s32 %v8495_v54, %v8485_v22  ;;  %vm4616_vm13 = vcmp.lt.s32.totalorder %v4615_v17, 0  ;;  %vm3355_vm8 = vc.u32 %v8566_v42, %v8569_v51 }
 0x51e   : > { %vm8579_vm12 = vcmp.le.f32.partialorder %v9446_v48, 0.7853982  ;;  %v3524_v1 = vsel %vm4616_vm13, 0, %v4615_v17  ;;  %v3352_v18 = vadd.s32 %v3351_v23, %v3342_v2  ;;  %v3227_v53 = vxor.u32 2147483648, %v3226_v20 }
 0x51f   : > { %v3629_v14 = vshll.u32 %v8574_v26, 16  ;;  %v3525_v49 = vsub.s32 32, %v3524_v1  ;;  %v3529_v21 = vsub.s32 4294967266, %v3524_v1  ;;  %v3634_v0 = vadd.s32 %v3632_v46, %v3626_v34  ;;  %v9454_v34 = vld [vmem:[#allocation42_spill] sm:$0xff] }
 0x520   : > { %v3356_v41 = vadd.s32 1, %v3352_v18  ;;  %v9449_v52 = vand.u32 65535, %v9443_v9  ;;  %v3649_v22 = vshll.u32 %v8555_v38, 16  ;;  %v3228_v54 = vsel %vm3107_vm5, %v3227_v53, %v3226_v20 }
 0x521   : > { %vm3635_vm4 = vc.u32 %v3633_v32, %v3629_v14  ;;  %v3526_v55 = vshll.u32 %v8541_v43, %v3524_v1  ;;  %v3527_v47 = vshrl.u32 %v3509_v24, %v3525_v49  ;;  %v3530_v37 = vadd.s32 127, %v3529_v21 }
 0x522   : > { %v8591_v39 = vmul.u32 %v9449_v52, %v9439_v35  ;;  %v8600_v63 = vsel %vm8579_vm12, %v9442_v62, %v3228_v54  ;;  %v3357_v61 = vsel %vm3355_vm8, %v3356_v41, %v3352_v18  ;;  %v3636_v6 = vsel %vm3635_vm4, 1, %v9035_v12 }
 0x523   : > { %v9450_v56 = vmov %v9449_v52  ;;  %v8608_v45 = vmul.f32 %v8600_v63, %v8600_v63  ;;  %v3528_v16 = vor.u32 %v3527_v47, %v3526_v55  ;;  %v3531_v43 = vshll.u32 %v3530_v37, 23 }
 0x524   : > { %v3645_v29 = vmul.u32 %v9450_v56, %v7738_v44  ;;  %v9453_v15 = vmul.u32 %v9451_v28, %v9452_v10  ;;  %vm3417_vm15 = vcmp.lt.s32.totalorder %v9454_v34, 0  ;;  %v9455_v33 = vmov %v9444_v58 }
 0x525   : > { %v3648_v40 = vmul.u32 %v9455_v33, %v9439_v35  ;;  %v3229_v11 = vsub.s32 4, %v8483_v8  ;;  %v3651_v44 = vshll.u32 %v8591_v39, 16  ;;  %v3234_v7 = vmul.f32 -0.001358992, %v8608_v45  ;;  %v9462_v33 = vld [vmem:[#allocation50_spill] sm:$0xff] }
 0x526   : > { %v3358_v50 = vadd.s32 %v3357_v61, %v9453_v15  ;;  %vm3653_vm1 = vc.u32 %v3645_v29, %v3649_v22  ;;  %v3241_v58 = vmul.f32 -0.00019511016, %v8608_v45  ;;  %v3532_v31 = vor.u32 4788187, %v3531_v43 }
 0x527   : > { %v3638_v57 = vadd.s32 %v3636_v6, %v3634_v0  ;;  %v3535_v5 = vcvt.s32.f32 %v3528_v16  ;;  %v3654_v59 = vsel %vm3653_vm1, 1, %v9035_v12  ;;  %v3655_v32 = vadd.s32 %v3649_v22, %v3645_v29  ;;  %v9458_v0 = vld [vmem:[#allocation48_spill] sm:$0xff] }
 0x528   : > { %v3359_v19 = vadd.s32 536870912, %v3358_v50  ;;  %v3235_v13 = vadd.f32 0.041655596, %v3234_v7  ;;  %v3242_v60 = vadd.f32 0.008332121, %v3241_v58  ;;  %v3656_v35 = vadd.s32 %v3654_v59, %v3648_v40 }
 0x529   : > { %v3533_v9 = vand.u32 2147483647, %v3532_v31  ;;  %v3607_v17 = vsel %vm3605_vm0, %v9456_v25, 2102212464  ;;  %v3230_v2 = vsel %vm3107_vm5, %v3229_v11, %v8483_v8  ;;  %vm3657_vm11 = vc.u32 %v3655_v32, %v3651_v44 }
 0x52a   : > { %v8628_v23 = vshrl.u32 %v3359_v19, 30  ;;  %v3243_v4 = vmul.f32 %v3242_v60, %v8608_v45  ;;  %v3628_v48 = vshrl.u32 %v8221_v36, 16  ;;  %v3658_v20 = vsel %vm3657_vm11, 1, %v9035_v12 }
 0x52b   : > { %v3536_v46 = vmul.f32 %v3535_v5, %v3533_v9  ;;  %v3539_v24 = vsub.s32 4, %v8525_v30  ;;  %v3650_v18 = vshrl.u32 %v8555_v38, 16  ;;  %v3660_v14 = vadd.s32 %v3658_v20, %v3656_v35 }
 0x52c   : > { %v3361_v1 = vshll.u32 %v8628_v23, 30  ;;  %v3236_v53 = vmul.f32 %v3235_v13, %v8608_v45  ;;  %v3244_v8 = vadd.f32 -0.16666654, %v3243_v4  ;;  %v3639_v21 = vadd.s32 %v3638_v57, %v3628_v48 }
 0x52d   : > { %v3537_v49 = vxor.u32 2147483648, %v3536_v46  ;;  %v3608_v41 = vsel %vm3604_vm3, %v9458_v0, %v3607_v17  ;;  %v9459_v36 = vand.u32 2147483647, %v9454_v34  ;;  %v3661_v22 = vadd.s32 %v3660_v14, %v3650_v18 }
 0x52e   : > { %v3362_v52 = vsub.s32 %v3358_v50, %v3361_v1  ;;  %v3232_v38 = vsel %vm8579_vm12, 0, %v3230_v2  ;;  %v3245_v54 = vmul.f32 %v3244_v8, %v8608_v45  ;;  %v3630_v47 = vshrl.u32 %v8574_v26, 16 }
 0x52f   : > { %vm8642_vm0 = vcmp.le.f32.partialorder %v9459_v36, 0.7853982  ;;  %v3538_v55 = vsel %vm3417_vm15, %v3537_v49, %v3536_v46  ;;  %v3652_v6 = vshrl.u32 %v8591_v39, 16  ;;  %v3237_v56 = vadd.f32 -0.4999988, %v3236_v53 }
 0x530   : > { %v3541_v37 = vsel %vm8642_vm0, %v9454_v34, %v3538_v55  ;;  %vm3363_vm3 = vcmp.lt.s32.totalorder %v3362_v52, 0  ;;  %v3364_v61 = vsub.s32 0, %v3362_v52  ;;  %v3540_v27 = vsel %vm3417_vm15, %v3539_v24, %v8525_v30 }
 0x531   : > { %v3543_v29 = vmul.f32 %v3541_v37, %v3541_v37  ;;  %v8659_v16 = vadd.s32 %v3639_v21, %v3630_v47  ;;  %v3662_v28 = vadd.s32 %v3661_v22, %v3652_v6  ;;  %v3246_v10 = vadd.f32 1.0, %v3245_v54 }
 0x532   : > { %v3365_v43 = vsel %vm3363_vm3, %v3364_v61, %v3362_v52  ;;  %v8661_v50 = vadd.s32 %v3655_v32, %v3651_v44  ;;  %v3609_v40 = vsel %vm3603_vm14, %v9462_v33, %v3608_v41  ;;  %v3249_v39 = vadd.s32 3, %v3232_v38  ;;  %v9463_v44 = vld [vmem:[#allocation52_spill] sm:$0xff] }
 0x533   : > { %v3544_v26 = vmul.f32 -0.001358992, %v3543_v29  ;;  %v3551_v15 = vmul.f32 -0.00019511016, %v3543_v29  ;;  %v3542_v11 = vsel %vm8642_vm0, 0, %v3540_v27  ;;  %v3366_v7 = vclz %v3365_v43 }
 0x534   : > { %v3238_v30 = vmul.f32 %v3237_v56, %v8608_v45  ;;  %vm3665_vm10 = vc.u32 %v8659_v16, %v8661_v50  ;;  %v3666_v5 = vadd.s32 1, %v3662_v28  ;;  %v3663_v19 = vmul.u32 %v9463_v44, %v3609_v40 }
 0x535   : > { %v3545_v58 = vadd.f32 0.041655596, %v3544_v26  ;;  %v3552_v31 = vadd.f32 0.008332121, %v3551_v15  ;;  %v4612_v57 = vadd.s32 4294967294, %v3366_v7  ;;  %v3247_v59 = vmul.f32 %v3246_v10, %v8600_v63 }
 0x536   : > { %v3250_v60 = vand.u32 3, %v3249_v39  ;;  %v3559_v9 = vadd.s32 3, %v3542_v11  ;;  %v3667_v35 = vsel %vm3665_vm10, %v3666_v5, %v3662_v28  ;;  %v3239_v25 = vadd.f32 1.0, %v3238_v30  ;;  %v9464_v39 = vld [vmem:[#allocation33_spill] sm:$0xff] }
 0x537   : > { %v3546_v32 = vmul.f32 %v3545_v58, %v3543_v29  ;;  %v3553_v13 = vmul.f32 %v3552_v31, %v3543_v29  ;;  %vm4613_vm14 = vcmp.lt.s32.totalorder %v4612_v57, 0  ;;  %v3354_v2 = vadd.s32 %v8569_v51, %v8566_v42 }
 0x538   : > { %v3369_v17 = vsel %vm4613_vm14, 0, %v4612_v57  ;;  %v3668_v48 = vadd.s32 %v3667_v35, %v3663_v19  ;;  %v3253_v20 = vxor.u32 2147483648, %v3247_v59  ;;  %v3256_v8 = vxor.u32 2147483648, %v3239_v25 }
 0x539   : > { %v3547_v3 = vadd.f32 -0.4999988, %v3546_v32  ;;  %v3554_v45 = vadd.f32 -0.16666654, %v3553_v13  ;;  %v3370_v4 = vsub.s32 32, %v3369_v17  ;;  %v3374_v46 = vsub.s32 4294967266, %v3369_v17 }
 0x53a   : > { %v3371_v63 = vshll.u32 %v3362_v52, %v3369_v17  ;;  %v3669_v53 = vadd.s32 536870912, %v3668_v48  ;;  %v3560_v0 = vand.u32 3, %v3559_v9  ;;  %vm3252_vm2 = vcmp.eq.s32.totalorder %v3250_v60, 0 }
 0x53b   : > { %v3548_v24 = vmul.f32 %v3547_v3, %v3543_v29  ;;  %v3555_v1 = vmul.f32 %v3554_v45, %v3543_v29  ;;  %v3372_v18 = vshrl.u32 %v3354_v2, %v3370_v4  ;;  %v3375_v14 = vadd.s32 127, %v3374_v46  ;;  %v8699_v2 = vld [vmem:[%s8769_s5] sm:$0xf] }
 0x53c   : > { %v8675_v12 = vshrl.u32 %v3669_v53, 30  ;;  %vm3248_vm5 = vweird.f32 %v9442_v62  ;;  %v3254_v42 = vsel %vm3252_vm2, %v3239_v25, %v3253_v20  ;;  %vm3251_vm7 = vcmp.lt.s32.totalorder %v3250_v60, 2 }
 0x53d   : > { %v3549_v49 = vadd.f32 1.0, %v3548_v24  ;;  %v3556_v21 = vadd.f32 1.0, %v3555_v1  ;;  %v3373_v41 = vor.u32 %v3372_v18, %v3371_v63  ;;  %v3376_v36 = vshll.u32 %v3375_v14, 23  ;;  %v9468_v63 = vld [vmem:[#allocation8_spill] sm:$0xff] }
 0x53e   : > { %vm3255_vm6 = vcmp.eq.s32.totalorder %v3250_v60, 2  ;;  %v3671_v38 = vshll.u32 %v8675_v12, 30  ;;  %vm3562_vm12 = vcmp.eq.s32.totalorder %v3560_v0, 0  ;;  %vm3565_vm13 = vcmp.eq.s32.totalorder %v3560_v0, 2 }
 0x53f   : > { %v3557_v51 = vmul.f32 %v3556_v21, %v3541_v37  ;;  %v3566_v22 = vxor.u32 2147483648, %v3549_v49  ;;  %v3377_v52 = vor.u32 4788187, %v3376_v36  ;;  %v3257_v54 = vsel %vm3255_vm6, %v3256_v8, %v3247_v59 }
 0x540   : > { %v3258_v47 = vsel %vm3251_vm7, %v3254_v42, %v3257_v54  ;;  %v3380_v6 = vcvt.s32.f32 %v3373_v41  ;;  %v3672_v56 = vsub.s32 %v3668_v48, %v3671_v38  ;;  %vm3558_vm8 = vweird.f32 %v9454_v34 }
 0x541   : > { %v3563_v55 = vxor.u32 2147483648, %v3557_v51  ;;  %v3378_v61 = vand.u32 2147483647, %v3377_v52  ;;  %vm3561_vm4 = vcmp.lt.s32.totalorder %v3560_v0, 2  ;;  %v3567_v29 = vsel %vm3565_vm13, %v3566_v22, %v3557_v51 }
 0x542   : > { %vm3673_vm15 = vcmp.lt.s32.totalorder %v3672_v56, 0  ;;  %v3674_v28 = vsub.s32 0, %v3672_v56  ;;  %v3259_v10 = vsel %vm3248_vm5, nan, %v3258_v47  ;;  %vm3262_vm1 = vcmp.lt.s32.totalorder %v9464_v39, 0 }
 0x543   : > { %v3564_v27 = vsel %vm3562_vm12, %v3549_v49, %v3563_v55  ;;  %v3381_v43 = vmul.f32 %v3380_v6, %v3378_v61  ;;  %v9465_v34 = vand.u32 2147483647, %v9464_v39  ;;  %v3664_v44 = vadd.s32 %v8661_v50, %v8659_v16 }
 0x544   : > { %v3568_v37 = vsel %vm3561_vm4, %v3564_v27, %v3567_v29  ;;  %v3675_v40 = vsel %vm3673_vm15, %v3674_v28, %v3672_v56  ;;  %v3384_v20 = vsub.s32 4, %v8628_v23  ;;  %vm3572_vm3 = vcmp.lt.s32.totalorder %v9468_v63, 0 }
 0x545   : > { %v3569_v26 = vsel %vm3558_vm8, nan, %v3568_v37  ;;  %v3382_v33 = vxor.u32 2147483648, %v3381_v43  ;;  %v3676_v11 = vclz %v3675_v40  ;;  %vm8685_vm11 = vcmp.le.f32.partialorder %v9465_v34, 0.7853982 }
 0x546   : > { %v4346_v15 = vpack.c.bf16 %v3569_v26, %v3259_v10  ;;  %v9469_v14 = vand.u32 2147483647, %v9468_v63  ;;  %v3385_v49 = vsel %vm3262_vm1, %v3384_v20, %v8628_v23  ;;  %v3694_v21 = vsub.s32 4, %v8675_v12 }
 0x547   : > { %v3383_v30 = vsel %vm3262_vm1, %v3382_v33, %v3381_v43  ;;  %v4618_v58 = vadd.s32 4294967294, %v3676_v11  ;;  %v3387_v42 = vsel %vm8685_vm11, 0, %v3385_v49  ;;  %vm3403_vm13 = vweird.f32 %v9464_v39 }
 0x548   : > { %4366 = vmatpush.bf16.msrb.mxu2 %v4346_v15  ;;  %v3386_v62 = vsel %vm8685_vm11, %v9464_v39, %v3383_v30  ;;  %vm8707_vm10 = vcmp.le.f32.partialorder %v9469_v14, 0.7853982  ;;  %v3695_v38 = vsel %vm3572_vm3, %v3694_v21, %v8675_v12  ;;  %v3404_v23 = vadd.s32 3, %v3387_v42 }
 0x549   : > { %v3388_v31 = vmul.f32 %v3386_v62, %v3386_v62  ;;  %vm4619_vm0 = vcmp.lt.s32.totalorder %v4618_v58, 0  ;;  %v3697_v6 = vsel %vm8707_vm10, 0, %v3695_v38  ;;  %vm3713_vm8 = vweird.f32 %v9468_v63 }
 0x54a   : > { %v3679_v5 = vsel %vm4619_vm0, 0, %v4618_v58  ;;  %v3405_v28 = vand.u32 3, %v3404_v23  ;;  %v3714_v10 = vadd.s32 3, %v3697_v6 }
 0x54b   : > { %v3396_v57 = vmul.f32 -0.00019511016, %v3388_v31  ;;  %v3680_v19 = vsub.s32 32, %v3679_v5  ;;  %v3684_v59 = vsub.s32 4294967266, %v3679_v5  ;;  %v3681_v13 = vshll.u32 %v3672_v56, %v3679_v5  ;;  %4632 = vmatmul.msk.bf16.vlgmr.msrb.gmra.mxu2 %vm1732_vm9, %v8699_v2 }
 0x54c   : > { %v3389_v35 = vmul.f32 -0.001358992, %v3388_v31  ;;  %vm3407_vm14 = vcmp.eq.s32.totalorder %v3405_v28, 0  ;;  %v3715_v34 = vand.u32 3, %v3714_v10  ;;  %vm3410_vm2 = vcmp.eq.s32.totalorder %v3405_v28, 2 }
 0x54d   : > { %v3397_v32 = vadd.f32 0.008332121, %v3396_v57  ;;  %v3682_v60 = vshrl.u32 %v3664_v44, %v3680_v19  ;;  %v3685_v9 = vadd.s32 127, %v3684_v59  ;;  %vm3406_vm5 = vcmp.lt.s32.totalorder %v3405_v28, 2 }
 0x54e   : > { %v3390_v4 = vadd.f32 0.041655596, %v3389_v35  ;;  %vm3717_vm7 = vcmp.eq.s32.totalorder %v3715_v34, 0  ;;  %vm3720_vm6 = vcmp.eq.s32.totalorder %v3715_v34, 2  ;;  %vm3716_vm12 = vcmp.lt.s32.totalorder %v3715_v34, 2 }
 0x54f   : > { %v3683_v25 = vor.u32 %v3682_v60, %v3681_v13  ;;  %v3686_v3 = vshll.u32 %v3685_v9, 23  ;;  %v3398_v45 = vmul.f32 %v3397_v32, %v3388_v31  ;;  %v4354_v60 = vpop.permute.xlu0 %4353 }
 0x550   : > { %v3391_v24 = vmul.f32 %v3390_v4, %v3388_v31 }
 0x551   : > { %v3687_v17 = vor.u32 4788187, %v3686_v3  ;;  %v3690_v48 = vcvt.s32.f32 %v3683_v25  ;;  %v3399_v16 = vadd.f32 -0.16666654, %v3398_v45 }
 0x552   : > { %v3392_v41 = vadd.f32 -0.4999988, %v3391_v24 }
 0x553   : > { %v3688_v46 = vand.u32 2147483647, %v3687_v17  ;;  %v3400_v18 = vmul.f32 %v3399_v16, %v3388_v31 }
 0x554   : > { %v3393_v54 = vmul.f32 %v3392_v41, %v3388_v31 }
 0x555   : > { %v3691_v50 = vmul.f32 %v3690_v48, %v3688_v46  ;;  %v3401_v51 = vadd.f32 1.0, %v3400_v18 }
 0x556   : > { %v3394_v29 = vadd.f32 1.0, %v3393_v54 }
 0x557   : > { %v3692_v1 = vxor.u32 2147483648, %v3691_v50  ;;  %v3402_v61 = vmul.f32 %v3401_v51, %v3386_v62 }
 0x558   : > { %v3411_v40 = vxor.u32 2147483648, %v3394_v29 }
 0x559   : > { %v3693_v8 = vsel %vm3572_vm3, %v3692_v1, %v3691_v50  ;;  %v3408_v26 = vxor.u32 2147483648, %v3402_v61 }
 0x55a   : > { %v3696_v0 = vsel %vm8707_vm10, %v9468_v63, %v3693_v8  ;;  %v3412_v58 = vsel %vm3410_vm2, %v3411_v40, %v3402_v61 }
 0x55b   : > { %v3698_v36 = vmul.f32 %v3696_v0, %v3696_v0  ;;  %v3409_v7 = vsel %vm3407_vm14, %v3394_v29, %v3408_v26 }
 0x55c   : > { %v3413_v57 = vsel %vm3406_vm5, %v3409_v7, %v3412_v58 }
 0x55d   : > { %v3699_v22 = vmul.f32 -0.001358992, %v3698_v36  ;;  %v3706_v52 = vmul.f32 -0.00019511016, %v3698_v36  ;;  %v3414_v59 = vsel %vm3403_vm13, nan, %v3413_v57 }
 0x55f   : > { %v3700_v55 = vadd.f32 0.041655596, %v3699_v22  ;;  %v3707_v47 = vadd.f32 0.008332121, %v3706_v52 }
 0x561   : > { %v3701_v56 = vmul.f32 %v3700_v55, %v3698_v36  ;;  %v3708_v27 = vmul.f32 %v3707_v47, %v3698_v36 }
 0x563   : > { %v3702_v37 = vadd.f32 -0.4999988, %v3701_v56  ;;  %v3709_v43 = vadd.f32 -0.16666654, %v3708_v27 }
 0x565   : > { %v3703_v15 = vmul.f32 %v3702_v37, %v3698_v36  ;;  %v3710_v33 = vmul.f32 %v3709_v43, %v3698_v36 }
 0x567   : > { %v3704_v12 = vadd.f32 1.0, %v3703_v15  ;;  %v3711_v11 = vadd.f32 1.0, %v3710_v33 }
 0x569   : > { %v3712_v30 = vmul.f32 %v3711_v11, %v3696_v0  ;;  %v3721_v62 = vxor.u32 2147483648, %v3704_v12 }
 0x56b   : > { %v3718_v31 = vxor.u32 2147483648, %v3712_v30  ;;  %v3722_v44 = vsel %vm3720_vm6, %v3721_v62, %v3712_v30 }
 0x56d   : > { %v3719_v5 = vsel %vm3717_vm7, %v3704_v12, %v3718_v31 }
 0x56e   : > { %v3723_v19 = vsel %vm3716_vm12, %v3719_v5, %v3722_v44 }
 0x56f   : > { %v3724_v32 = vsel %vm3713_vm8, nan, %v3723_v19 }
 0x570   : > { %v4347_v13 = vpack.c.bf16 %v3724_v32, %v3414_v59 }
 0x572   : > { %4379 = vmatpush.bf16.msrb.mxu3 %v4347_v13 }
 0x575   : > { %4633 = vmatmul.msk.bf16.vlgmr.msrb.gmra.mxu3 %vm1732_vm9, %v8699_v2 }
 0x5ce   : > { %v4368_v9 = vpop.f32.mrf.mxu2 }
 0x5cf   : > { %v4369_v35 = vadd.f32 %v4368_v9, %v4354_v60 }
 0x5d1   : > { %4712 = vtanh.f32 %v4369_v35 }
 0x5d6   : > { %v4370_v25 = vpop.f32.mrf.mxu2 }
 0x5d7   : > { %v4713_v3 = vpop.eup %4712 }
 0x5d8   : > { %4387 = vst [vmem:[%s326_s18] sm:$0xff] %v4713_v3 }
 0x5f8   : > { %v4381_v39 = vpop.f32.mrf.mxu3 }
 0x5f9   : > { %v4382_v45 = vadd.f32 %v4381_v39, %v4354_v60 }
 0x5fb   : > { %4714 = vtanh.f32 %v4382_v45 }
 0x600   : > { %v4383_v17 = vpop.f32.mrf.mxu3 }
 0x601   : > { %v4715_v2 = vpop.eup %4714 }
 0x602   : > { %4388 = vst [vmem:[%s326_s18 + $0x8] sm:$0xff] %v4715_v2 }
 0x603   : > { %4743 = shalt.err (!%p4740_p5)
}
 0x604   : > { %4647 = dma.vmem_to_hbm [thread:$0]  (%p4883_p4), %s4406_s23, 256, %s4408_s30, %s4390_s8  }
 0x605 PF: > { %p4653_p6 = scmp.ge.s32.totalorder %s4794_s29, 2  ;;  %s4419_s16 = sand.u32 1, %s4774_s24  }
 0x606   : > { %s4420_s18 = scalar_lea.sflag [#allocation3], %s4419_s16 }
 0x607   : > { %p4650_p7 = pnand %p4653_p6, %p4890_p8 }
 0x609   : > { %p4651_p9 = pneg %p4650_p7 }
 0x60b   : > { %4769 = dma.done.wait (%p4651_p9), %s4420_s18, 256  }
 0x60c   : > { %4771 = vsyncadd (%p4651_p9), %s4420_s18, 4294967040  ;;  %s20_s29 = sadd.s32 1, %s4794_s29   ;;  %s9472_s24 = smov %s4778_s25 }
 0x60d   : > { %p17_p10 = scmp.ge.s32.totalorder %s20_s29, 4   ;;  %s9473_s25 = smov %s4782_s26 }
 0x60e   : > { %s9474_s26 = smov %s4896_s14  ;;  %s9475_s27 = smov %s4790_s28 }
 0x60f   : > { %s9476_s28 = smov %s9478_s9  ;;  %19 = sbr.rel (!%p17_p10) target bundleno = 4 (0x4), region = 91 }
 0x614   :  { %4426 = vsyncpa [#allocation3], 1 }
 0x615   :  { %4428 = vsyncpa [#allocation3 + $0x1], 1 }

</bundles_post_ra>
